<compile_context>
chip_gen: v7x
topology: tpu7x:2x2x1
jax: 0.10.0
libtpu: 0.0.40
codegen_flags: <defaults>
</compile_context>

<pallas_src>
import math
import functools

import numpy as np
import jax
import jax.numpy as jnp
from jax.experimental import pallas as pl
from jax.experimental.pallas import tpu as pltpu


# ----------------------------- RoPE table helpers ---------------------------

def _axial_angles(head_dim, end_x, end_y, theta=10000.0):
    # matches compute_axial_cis: (N, head_dim//2) angles, x-freqs then y-freqs.
    freqs = 1.0 / theta ** (
        np.arange(0, head_dim, 4)[: head_dim // 4].astype(np.float32) / head_dim)
    t = np.arange(end_x * end_y, dtype=np.float32)
    t_x = t % end_x
    t_y = np.floor(t / end_x)
    return np.concatenate([np.outer(t_x, freqs), np.outer(t_y, freqs)],
                          axis=-1).astype(np.float32)


def _interleaved_rope_tables(ang):
    # Full-width (N, D) tables for the interleaved (2j, 2j+1) complex pairing:
    #     rope(x) = x * cos_f + (x @ SW) * sin_sf
    # with cos_f = [c0,c0,c1,c1,...], sin_sf = [-s0,+s0,-s1,+s1,...].
    cos = np.cos(ang)
    sin = np.sin(ang)
    n, h = ang.shape
    cos_f = np.repeat(cos, 2, axis=-1).astype(np.float32)
    sin_sf = np.stack([-sin, sin], axis=-1).reshape(n, 2 * h).astype(np.float32)
    return cos_f, sin_sf


def _pair_swap_matrix(d):
    # SW such that (x @ SW)[..., c] = x[..., c ^ 1]  (swap within complex pairs).
    idx = np.arange(d)
    sw = np.zeros((d, d), np.float32)
    sw[idx, idx ^ 1] = 1.0
    return sw


# ------------------------------ fused kernel --------------------------------

def _memory_attention_kernel(
        x_ref, memkv_ref, memv_ref,
        cosq_ref, sinq_ref, cosk_ref, sink_ref, sw_ref,
        ln1g_ref, ln1b_ref,
        saqw_ref, saqb_ref, sakw_ref, sakb_ref, savw_ref, savb_ref,
        saow_ref, saob_ref,
        ln2g_ref, ln2b_ref,
        caqw_ref, caqb_ref, cakw_ref, cakb_ref, cavw_ref, cavb_ref,
        caow_ref, caob_ref,
        ln3g_ref, ln3b_ref,
        l1w_ref, l1b_ref, l2w_ref, l2b_ref,
        fng_ref, fnb_ref,
        o_ref, *, num_layers):
    # One grid step == one batch element; whole transformer stack runs here.
    sw = sw_ref[...]          # (D, D) pair-swap matrix
    cos_q = cosq_ref[...]     # (Lq, D)
    sin_q = sinq_ref[...]
    cos_k = cosk_ref[...]     # (Lm, D) (identity rows for excluded obj-ptr tokens)
    sin_k = sink_ref[...]

    def b2(ref, i):
        # (1, cols) slice of a (num_layers, cols) stacked parameter.
        return ref[pl.ds(i, 1), :]

    def layer_norm(x2, g, b):
        mu = jnp.mean(x2, axis=-1, keepdims=True)
        xc = x2 - mu
        var = jnp.mean(xc * xc, axis=-1, keepdims=True)
        return xc * jax.lax.rsqrt(var + 1e-5) * g + b

    def rope(x2, cos_f, sin_sf):
        # Interleaved RoPE; the pair swap is a tiny constant MXU matmul,
        # avoiding cross-lane shuffles / strided gathers entirely.
        swapped = jnp.dot(x2, sw, preferred_element_type=jnp.float32)
        return x2 * cos_f + swapped * sin_sf

    def attend(q2, k2, v2):
        # 1/sqrt(D) is already folded into the q projection weights.
        s = jax.lax.dot_general(q2, k2, (((1,), (1,)), ((), ())),
                                preferred_element_type=jnp.float32)
        m = jnp.max(s, axis=-1, keepdims=True)
        p = jnp.exp(s - m)
        denom = jnp.sum(p, axis=-1, keepdims=True)
        o = jnp.dot(p, v2, preferred_element_type=jnp.float32)
        return o * pl.reciprocal(denom, approx=True)

    def proj(x2, w_ref, bias_ref, li):
        return (jnp.dot(x2, w_ref[li], preferred_element_type=jnp.float32)
                + b2(bias_ref, li))

    x = x_ref[0]          # (Lq, C)
    memkv = memkv_ref[0]  # (Lm, KV)  == memory + memory_pos (hoisted)
    memv = memv_ref[0]    # (Lm, KV)

    for li in range(num_layers):
        # ---- self-attention block (pre-LN) ----
        t2 = layer_norm(x, b2(ln1g_ref, li), b2(ln1b_ref, li))
        q = rope(proj(t2, saqw_ref, saqb_ref, li), cos_q, sin_q)
        k = rope(proj(t2, sakw_ref, sakb_ref, li), cos_q, sin_q)
        v = proj(t2, savw_ref, savb_ref, li)
        x = x + proj(attend(q, k, v), saow_ref, saob_ref, li)

        # ---- cross-attention block ----
        t2 = layer_norm(x, b2(ln2g_ref, li), b2(ln2b_ref, li))
        q = rope(proj(t2, caqw_ref, caqb_ref, li), cos_q, sin_q)
        k = rope(proj(memkv, cakw_ref, cakb_ref, li), cos_k, sin_k)
        v = proj(memv, cavw_ref, cavb_ref, li)
        x = x + proj(attend(q, k, v), caow_ref, caob_ref, li)

        # ---- feed-forward block ----
        t2 = layer_norm(x, b2(ln3g_ref, li), b2(ln3b_ref, li))
        h = jnp.maximum(proj(t2, l1w_ref, l1b_ref, li), 0.0)
        x = x + proj(h, l2w_ref, l2b_ref, li)

    o_ref[0] = layer_norm(x, fng_ref[...], fnb_ref[...])


def _run_fused(x_b, memkv_b, memv_b, consts, flat_params, num_layers):
    B, Lq, C = x_b.shape
    inputs = [x_b, memkv_b, memv_b] + list(consts) + list(flat_params)

    def split_spec(a):
        nd = a.ndim
        return pl.BlockSpec((1,) + tuple(a.shape[1:]),
                            lambda b, _nd=nd: (b,) + (0,) * (_nd - 1))

    def whole_spec(a):
        nd = a.ndim
        return pl.BlockSpec(tuple(a.shape), lambda b, _nd=nd: (0,) * _nd)

    in_specs = ([split_spec(x_b), split_spec(memkv_b), split_spec(memv_b)]
                + [whole_spec(a) for a in inputs[3:]])

    kernel = functools.partial(_memory_attention_kernel, num_layers=num_layers)
    return pl.pallas_call(
        kernel,
        out_shape=jax.ShapeDtypeStruct((B, Lq, C), jnp.float32),
        grid=(B,),
        in_specs=in_specs,
        out_specs=pl.BlockSpec((1, Lq, C), lambda b: (b, 0, 0)),
        compiler_params=pltpu.CompilerParams(
            dimension_semantics=("parallel",)),   # shards batch across v7x's 2 TCs
    )(*inputs)


# ------------------------- parameter preparation ----------------------------

def prepare_fused_params(params, head_dim):
    """Stack per-layer weights along a leading layer axis and fold the
    1/sqrt(head_dim) attention scale into the q projections (head_nums == 1)."""
    scale = 1.0 / math.sqrt(head_dim)

    def stk(fn):
        return jnp.stack([fn(lp) for lp in params["layers"]], axis=0)

    flat = [
        stk(lambda lp: lp["norm1"]["g"]), stk(lambda lp: lp["norm1"]["b"]),
        stk(lambda lp: lp["self_attn"]["q"]["w"] * scale),
        stk(lambda lp: lp["self_attn"]["q"]["b"] * scale),
        stk(lambda lp: lp["self_attn"]["k"]["w"]),
        stk(lambda lp: lp["self_attn"]["k"]["b"]),
        stk(lambda lp: lp["self_attn"]["v"]["w"]),
        stk(lambda lp: lp["self_attn"]["v"]["b"]),
        stk(lambda lp: lp["self_attn"]["o"]["w"]),
        stk(lambda lp: lp["self_attn"]["o"]["b"]),
        stk(lambda lp: lp["norm2"]["g"]), stk(lambda lp: lp["norm2"]["b"]),
        stk(lambda lp: lp["cross_attn"]["q"]["w"] * scale),
        stk(lambda lp: lp["cross_attn"]["q"]["b"] * scale),
        stk(lambda lp: lp["cross_attn"]["k"]["w"]),
        stk(lambda lp: lp["cross_attn"]["k"]["b"]),
        stk(lambda lp: lp["cross_attn"]["v"]["w"]),
        stk(lambda lp: lp["cross_attn"]["v"]["b"]),
        stk(lambda lp: lp["cross_attn"]["o"]["w"]),
        stk(lambda lp: lp["cross_attn"]["o"]["b"]),
        stk(lambda lp: lp["norm3"]["g"]), stk(lambda lp: lp["norm3"]["b"]),
        stk(lambda lp: lp["lin1"]["w"]), stk(lambda lp: lp["lin1"]["b"]),
        stk(lambda lp: lp["lin2"]["w"]), stk(lambda lp: lp["lin2"]["b"]),
        params["norm"]["g"].reshape(1, -1), params["norm"]["b"].reshape(1, -1),
    ]
    return flat


# ------------------------------ forward pass ---------------------------------

def memory_attention(fused_params, curr, memory, curr_pos, memory_pos,
                     num_obj_ptr_tokens=0):
    """curr/curr_pos: (Lq, B, C); memory/memory_pos: (Lm, B, 64). Returns (Lq, B, C)."""
    Lq, B, C = curr.shape
    Lm = memory.shape[0]
    head_dim = C  # head_nums = 1, downsample_rate = 1

    x = curr + 0.1 * curr_pos
    x_b = jnp.transpose(x, (1, 0, 2))               # (B, Lq, C)
    mem_b = jnp.transpose(memory, (1, 0, 2))        # (B, Lm, 64)
    mem_pos_b = jnp.transpose(memory_pos, (1, 0, 2))
    memkv_b = mem_b + mem_pos_b                     # loop-invariant: hoisted out of layers

    side = int(round(math.sqrt(Lq)))
    assert side * side == Lq, "query length must be a perfect square for axial RoPE"
    cos_q, sin_q = _interleaved_rope_tables(_axial_angles(head_dim, side, side))

    num_k_rope = Lm - num_obj_ptr_tokens
    assert num_k_rope % Lq == 0, "rope_k_repeat requires len(k_rope) % len(q) == 0"
    r = num_k_rope // Lq
    cos_k = np.concatenate([np.tile(cos_q, (r, 1)),
                            np.ones((num_obj_ptr_tokens, head_dim), np.float32)], 0)
    sin_k = np.concatenate([np.tile(sin_q, (r, 1)),
                            np.zeros((num_obj_ptr_tokens, head_dim), np.float32)], 0)
    sw = _pair_swap_matrix(head_dim)

    consts = [jnp.asarray(a) for a in (cos_q, sin_q, cos_k, sin_k, sw)]
    num_layers = fused_params[0].shape[0]
    out_b = _run_fused(x_b, memkv_b, mem_b, consts, fused_params, num_layers)
    return jnp.transpose(out_b, (1, 0, 2))          # back to (Lq, B, C)


# --------------------------- parameter initialisers --------------------------

def init_linear_params(key, in_dim, out_dim):
    k1, k2 = jax.random.split(key)
    w = jax.random.normal(k1, (in_dim, out_dim), jnp.float32) / math.sqrt(in_dim)
    b = jax.random.normal(k2, (out_dim,), jnp.float32) * 0.02
    return {"w": w, "b": b}


def _ln_params(dim):
    return {"g": jnp.ones((dim,), jnp.float32), "b": jnp.zeros((dim,), jnp.float32)}


def init_memory_attention_params(key, inplanes, kv_planes, ffn_planes, layer_nums):
    layers = []
    keys = jax.random.split(key, layer_nums)
    for li in range(layer_nums):
        ks = jax.random.split(keys[li], 10)
        lp = {
            "self_attn": {
                "q": init_linear_params(ks[0], inplanes, inplanes),
                "k": init_linear_params(ks[1], inplanes, inplanes),
                "v": init_linear_params(ks[2], inplanes, inplanes),
                "o": init_linear_params(ks[3], inplanes, inplanes),
            },
            "cross_attn": {
                "q": init_linear_params(ks[4], inplanes, inplanes),
                "k": init_linear_params(ks[5], kv_planes, inplanes),
                "v": init_linear_params(ks[6], kv_planes, inplanes),
                "o": init_linear_params(ks[7], inplanes, inplanes),
            },
            "lin1": init_linear_params(ks[8], inplanes, ffn_planes),
            "lin2": init_linear_params(ks[9], ffn_planes, inplanes),
            "norm1": _ln_params(inplanes),
            "norm2": _ln_params(inplanes),
            "norm3": _ln_params(inplanes),
        }
        layers.append(lp)
    return {"layers": layers, "norm": _ln_params(inplanes)}


# ------------------- unfused pure-JAX reference (sanity check) ---------------

def _reference_memory_attention(params, curr, memory, curr_pos, memory_pos,
                                num_obj_ptr_tokens):
    hi = jax.lax.Precision.HIGHEST

    def mm(a, b):
        return jnp.matmul(a, b, precision=hi)

    def ln(x, g, b):
        mu = jnp.mean(x, axis=-1, keepdims=True)
        var = jnp.mean((x - mu) ** 2, axis=-1, keepdims=True)
        return (x - mu) / jnp.sqrt(var + 1e-5) * g + b

    def rope(x, cos_h, sin_h):
        xr, xi = x[..., 0::2], x[..., 1::2]
        out = jnp.stack([xr * cos_h - xi * sin_h, xr * sin_h + xi * cos_h], -1)
        return out.reshape(x.shape)

    def attn(p, q_in, k_in, v_in, cos_h, sin_h, cos_hk, sin_hk, num_k_rope):
        q = mm(q_in, p["q"]["w"]) + p["q"]["b"]
        k = mm(k_in, p["k"]["w"]) + p["k"]["b"]
        v = mm(v_in, p["v"]["w"]) + p["v"]["b"]
        d = q.shape[-1]
        q = rope(q, cos_h, sin_h)
        k = jnp.concatenate([rope(k[:, :num_k_rope], cos_hk, sin_hk),
                             k[:, num_k_rope:]], axis=1)
        s = jnp.einsum("bqd,bkd->bqk", q, k, precision=hi) / math.sqrt(d)
        w = jax.nn.softmax(s, axis=-1)
        o = jnp.einsum("bqk,bkd->bqd", w, v, precision=hi)
        return mm(o, p["o"]["w"]) + p["o"]["b"]

    x = jnp.transpose(curr + 0.1 * curr_pos, (1, 0, 2))
    mem = jnp.transpose(memory, (1, 0, 2))
    memp = jnp.transpose(memory_pos, (1, 0, 2))
    _, Lq, C = x.shape
    Lm = mem.shape[1]
    side = int(round(math.sqrt(Lq)))
    ang = _axial_angles(C, side, side)
    cos_h = jnp.asarray(np.cos(ang))
    sin_h = jnp.asarray(np.sin(ang))
    num_k_rope = Lm - num_obj_ptr_tokens
    r = num_k_rope // Lq
    cos_hk = jnp.tile(cos_h, (r, 1))
    sin_hk = jnp.tile(sin_h, (r, 1))

    for lp in params["layers"]:
        t2 = ln(x, lp["norm1"]["g"], lp["norm1"]["b"])
        x = x + attn(lp["self_attn"], t2, t2, t2, cos_h, sin_h, cos_h, sin_h, Lq)
        t2 = ln(x, lp["norm2"]["g"], lp["norm2"]["b"])
        x = x + attn(lp["cross_attn"], t2, mem + memp, mem,
                     cos_h, sin_h, cos_hk, sin_hk, num_k_rope)
        t2 = ln(x, lp["norm3"]["g"], lp["norm3"]["b"])
        h = jax.nn.relu(mm(t2, lp["lin1"]["w"]) + lp["lin1"]["b"])
        x = x + (mm(h, lp["lin2"]["w"]) + lp["lin2"]["b"])
    x = ln(x, params["norm"]["g"], params["norm"]["b"])
    return jnp.transpose(x, (1, 0, 2))


# ----------------------------------- main ------------------------------------

if __name__ == "__main__":
    INPLANES = 32     # model width (head_nums=1, downsample_rate=1 -> head_dim=32)
    KV_PLANES = 64    # cross_attn_image kv_inplanes is hard-coded to 64
    FFN_PLANES = 64
    LAYER_NUMS = 2
    B = 2
    LQ = 16           # 4x4 spatial grid -> perfect square for axial RoPE
    LM = 36           # (36 - 4) = 32 = 2*16 so rope_k_repeat tiles evenly
    NUM_OBJ_PTR_TOKENS = 4

    root = jax.random.PRNGKey(0)
    k_curr, k_cpos, k_mem, k_mpos, k_par = jax.random.split(root, 5)

    curr = jax.random.normal(k_curr, (LQ, B, INPLANES), jnp.float32)
    curr_pos = jax.random.normal(k_cpos, (LQ, B, INPLANES), jnp.float32)
    memory = jax.random.normal(k_mem, (LM, B, KV_PLANES), jnp.float32)
    memory_pos = jax.random.normal(k_mpos, (LM, B, KV_PLANES), jnp.float32)

    params = init_memory_attention_params(k_par, INPLANES, KV_PLANES,
                                          FFN_PLANES, LAYER_NUMS)
    fused_params = prepare_fused_params(params, head_dim=INPLANES)

    fwd = jax.jit(memory_attention, static_argnames=("num_obj_ptr_tokens",))
    out = fwd(fused_params, curr, memory, curr_pos, memory_pos,
              num_obj_ptr_tokens=NUM_OBJ_PTR_TOKENS)
    out = jax.block_until_ready(out)

    assert out.shape == (LQ, B, INPLANES)
    assert bool(jnp.all(jnp.isfinite(out)))

    # correctness sanity check against an unfused pure-JAX reference
    ref = _reference_memory_attention(params, curr, memory, curr_pos, memory_pos,
                                      NUM_OBJ_PTR_TOKENS)
    ref = jax.block_until_ready(ref)
    max_err = float(np.max(np.abs(np.asarray(out) - np.asarray(ref))))
    assert np.allclose(np.asarray(out), np.asarray(ref), rtol=5e-2, atol=5e-2), max_err

    print("KERNEL_OK")
</pallas_src>

<mosaic_0001>
module attributes {stable_mosaic.version = 11 : i64} {
  func.func @_memory_attention_kernel(%arg0: i32, %arg1: memref<1x16x32xf32, #tpu.memory_space<vmem>>, %arg2: memref<1x36x64xf32, #tpu.memory_space<vmem>>, %arg3: memref<1x36x64xf32, #tpu.memory_space<vmem>>, %arg4: memref<16x32xf32, #tpu.memory_space<vmem>>, %arg5: memref<16x32xf32, #tpu.memory_space<vmem>>, %arg6: memref<36x32xf32, #tpu.memory_space<vmem>>, %arg7: memref<36x32xf32, #tpu.memory_space<vmem>>, %arg8: memref<32x32xf32, #tpu.memory_space<vmem>>, %arg9: memref<2x32xf32, #tpu.memory_space<vmem>>, %arg10: memref<2x32xf32, #tpu.memory_space<vmem>>, %arg11: memref<2x32x32xf32, #tpu.memory_space<vmem>>, %arg12: memref<2x32xf32, #tpu.memory_space<vmem>>, %arg13: memref<2x32x32xf32, #tpu.memory_space<vmem>>, %arg14: memref<2x32xf32, #tpu.memory_space<vmem>>, %arg15: memref<2x32x32xf32, #tpu.memory_space<vmem>>, %arg16: memref<2x32xf32, #tpu.memory_space<vmem>>, %arg17: memref<2x32x32xf32, #tpu.memory_space<vmem>>, %arg18: memref<2x32xf32, #tpu.memory_space<vmem>>, %arg19: memref<2x32xf32, #tpu.memory_space<vmem>>, %arg20: memref<2x32xf32, #tpu.memory_space<vmem>>, %arg21: memref<2x32x32xf32, #tpu.memory_space<vmem>>, %arg22: memref<2x32xf32, #tpu.memory_space<vmem>>, %arg23: memref<2x64x32xf32, #tpu.memory_space<vmem>>, %arg24: memref<2x32xf32, #tpu.memory_space<vmem>>, %arg25: memref<2x64x32xf32, #tpu.memory_space<vmem>>, %arg26: memref<2x32xf32, #tpu.memory_space<vmem>>, %arg27: memref<2x32x32xf32, #tpu.memory_space<vmem>>, %arg28: memref<2x32xf32, #tpu.memory_space<vmem>>, %arg29: memref<2x32xf32, #tpu.memory_space<vmem>>, %arg30: memref<2x32xf32, #tpu.memory_space<vmem>>, %arg31: memref<2x32x64xf32, #tpu.memory_space<vmem>>, %arg32: memref<2x64xf32, #tpu.memory_space<vmem>>, %arg33: memref<2x64x32xf32, #tpu.memory_space<vmem>>, %arg34: memref<2x32xf32, #tpu.memory_space<vmem>>, %arg35: memref<1x32xf32, #tpu.memory_space<vmem>>, %arg36: memref<1x32xf32, #tpu.memory_space<vmem>>, %arg37: memref<1x16x32xf32, #tpu.memory_space<vmem>>) attributes {dimension_semantics = [#tpu.dimension_semantics<parallel>], iteration_bounds = array<i64: 2>, scalar_prefetch = 0 : i64, scratch_operands = 0 : i64, tpu.core_type = #tpu.core_type<tc>, window_params = [{transform_indices = @transform_0, window_bounds = array<i64: 1, 16, 32>}, {transform_indices = @transform_1, window_bounds = array<i64: 1, 36, 64>}, {transform_indices = @transform_2, window_bounds = array<i64: 1, 36, 64>}, {pipeline_mode = #tpu.pipeline_mode<synchronous>, transform_indices = @transform_3, window_bounds = array<i64: 16, 32>}, {pipeline_mode = #tpu.pipeline_mode<synchronous>, transform_indices = @transform_4, window_bounds = array<i64: 16, 32>}, {pipeline_mode = #tpu.pipeline_mode<synchronous>, transform_indices = @transform_5, window_bounds = array<i64: 36, 32>}, {pipeline_mode = #tpu.pipeline_mode<synchronous>, transform_indices = @transform_6, window_bounds = array<i64: 36, 32>}, {pipeline_mode = #tpu.pipeline_mode<synchronous>, transform_indices = @transform_7, window_bounds = array<i64: 32, 32>}, {pipeline_mode = #tpu.pipeline_mode<synchronous>, transform_indices = @transform_8, window_bounds = array<i64: 2, 32>}, {pipeline_mode = #tpu.pipeline_mode<synchronous>, transform_indices = @transform_9, window_bounds = array<i64: 2, 32>}, {pipeline_mode = #tpu.pipeline_mode<synchronous>, transform_indices = @transform_10, window_bounds = array<i64: 2, 32, 32>}, {pipeline_mode = #tpu.pipeline_mode<synchronous>, transform_indices = @transform_11, window_bounds = array<i64: 2, 32>}, {pipeline_mode = #tpu.pipeline_mode<synchronous>, transform_indices = @transform_12, window_bounds = array<i64: 2, 32, 32>}, {pipeline_mode = #tpu.pipeline_mode<synchronous>, transform_indices = @transform_13, window_bounds = array<i64: 2, 32>}, {pipeline_mode = #tpu.pipeline_mode<synchronous>, transform_indices = @transform_14, window_bounds = array<i64: 2, 32, 32>}, {pipeline_mode = #tpu.pipeline_mode<synchronous>, transform_indices = @transform_15, window_bounds = array<i64: 2, 32>}, {pipeline_mode = #tpu.pipeline_mode<synchronous>, transform_indices = @transform_16, window_bounds = array<i64: 2, 32, 32>}, {pipeline_mode = #tpu.pipeline_mode<synchronous>, transform_indices = @transform_17, window_bounds = array<i64: 2, 32>}, {pipeline_mode = #tpu.pipeline_mode<synchronous>, transform_indices = @transform_18, window_bounds = array<i64: 2, 32>}, {pipeline_mode = #tpu.pipeline_mode<synchronous>, transform_indices = @transform_19, window_bounds = array<i64: 2, 32>}, {pipeline_mode = #tpu.pipeline_mode<synchronous>, transform_indices = @transform_20, window_bounds = array<i64: 2, 32, 32>}, {pipeline_mode = #tpu.pipeline_mode<synchronous>, transform_indices = @transform_21, window_bounds = array<i64: 2, 32>}, {pipeline_mode = #tpu.pipeline_mode<synchronous>, transform_indices = @transform_22, window_bounds = array<i64: 2, 64, 32>}, {pipeline_mode = #tpu.pipeline_mode<synchronous>, transform_indices = @transform_23, window_bounds = array<i64: 2, 32>}, {pipeline_mode = #tpu.pipeline_mode<synchronous>, transform_indices = @transform_24, window_bounds = array<i64: 2, 64, 32>}, {pipeline_mode = #tpu.pipeline_mode<synchronous>, transform_indices = @transform_25, window_bounds = array<i64: 2, 32>}, {pipeline_mode = #tpu.pipeline_mode<synchronous>, transform_indices = @transform_26, window_bounds = array<i64: 2, 32, 32>}, {pipeline_mode = #tpu.pipeline_mode<synchronous>, transform_indices = @transform_27, window_bounds = array<i64: 2, 32>}, {pipeline_mode = #tpu.pipeline_mode<synchronous>, transform_indices = @transform_28, window_bounds = array<i64: 2, 32>}, {pipeline_mode = #tpu.pipeline_mode<synchronous>, transform_indices = @transform_29, window_bounds = array<i64: 2, 32>}, {pipeline_mode = #tpu.pipeline_mode<synchronous>, transform_indices = @transform_30, window_bounds = array<i64: 2, 32, 64>}, {pipeline_mode = #tpu.pipeline_mode<synchronous>, transform_indices = @transform_31, window_bounds = array<i64: 2, 64>}, {pipeline_mode = #tpu.pipeline_mode<synchronous>, transform_indices = @transform_32, window_bounds = array<i64: 2, 64, 32>}, {pipeline_mode = #tpu.pipeline_mode<synchronous>, transform_indices = @transform_33, window_bounds = array<i64: 2, 32>}, {pipeline_mode = #tpu.pipeline_mode<synchronous>, transform_indices = @transform_34, window_bounds = array<i64: 1, 32>}, {pipeline_mode = #tpu.pipeline_mode<synchronous>, transform_indices = @transform_35, window_bounds = array<i64: 1, 32>}, {transform_indices = @transform_36, window_bounds = array<i64: 1, 16, 32>}]} {
    %c0 = arith.constant 0 : index
    %c0_0 = arith.constant 0 : index
    %0 = vector.load %arg8[%c0, %c0_0] : memref<32x32xf32, #tpu.memory_space<vmem>>, vector<32x32xf32>
    %c0_1 = arith.constant 0 : index
    %c0_2 = arith.constant 0 : index
    %1 = vector.load %arg4[%c0_1, %c0_2] : memref<16x32xf32, #tpu.memory_space<vmem>>, vector<16x32xf32>
    %c0_3 = arith.constant 0 : index
    %c0_4 = arith.constant 0 : index
    %2 = vector.load %arg5[%c0_3, %c0_4] : memref<16x32xf32, #tpu.memory_space<vmem>>, vector<16x32xf32>
    %c0_5 = arith.constant 0 : index
    %c0_6 = arith.constant 0 : index
    %3 = vector.load %arg6[%c0_5, %c0_6] : memref<36x32xf32, #tpu.memory_space<vmem>>, vector<36x32xf32>
    %c0_7 = arith.constant 0 : index
    %c0_8 = arith.constant 0 : index
    %4 = vector.load %arg7[%c0_7, %c0_8] : memref<36x32xf32, #tpu.memory_space<vmem>>, vector<36x32xf32>
    %c0_9 = arith.constant 0 : index
    %c0_10 = arith.constant 0 : index
    %c0_11 = arith.constant 0 : index
    %5 = vector.load %arg1[%c0_9, %c0_10, %c0_11] : memref<1x16x32xf32, #tpu.memory_space<vmem>>, vector<1x16x32xf32>
    %6 = vector.shape_cast %5 : vector<1x16x32xf32> to vector<16x32xf32>
    %c0_12 = arith.constant 0 : index
    %c0_13 = arith.constant 0 : index
    %c0_14 = arith.constant 0 : index
    %7 = vector.load %arg2[%c0_12, %c0_13, %c0_14] : memref<1x36x64xf32, #tpu.memory_space<vmem>>, vector<1x36x64xf32>
    %8 = vector.shape_cast %7 : vector<1x36x64xf32> to vector<36x64xf32>
    %c0_15 = arith.constant 0 : index
    %c0_16 = arith.constant 0 : index
    %c0_17 = arith.constant 0 : index
    %9 = vector.load %arg3[%c0_15, %c0_16, %c0_17] : memref<1x36x64xf32, #tpu.memory_space<vmem>>, vector<1x36x64xf32>
    %10 = vector.shape_cast %9 : vector<1x36x64xf32> to vector<36x64xf32>
    %c0_18 = arith.constant 0 : index
    %c0_19 = arith.constant 0 : index
    %11 = vector.load %arg9[%c0_18, %c0_19] : memref<2x32xf32, #tpu.memory_space<vmem>>, vector<1x32xf32>
    %c0_20 = arith.constant 0 : index
    %c0_21 = arith.constant 0 : index
    %12 = vector.load %arg10[%c0_20, %c0_21] : memref<2x32xf32, #tpu.memory_space<vmem>>, vector<1x32xf32>
    %cst = arith.constant dense<0.000000e+00> : vector<16xf32>
    %13 = vector.multi_reduction <add>, %6, %cst [1] : vector<16x32xf32> to vector<16xf32>
    %14 = vector.shape_cast %13 : vector<16xf32> to vector<16x1xf32>
    %cst_22 = arith.constant 3.200000e+01 : f32
    %15 = vector.broadcast %cst_22 : f32 to vector<16x1xf32>
    %16 = arith.divf %14, %15 : vector<16x1xf32>
    %17 = vector.broadcast %16 : vector<16x1xf32> to vector<16x32xf32>
    %18 = arith.subf %6, %17 : vector<16x32xf32>
    %19 = arith.mulf %18, %18 : vector<16x32xf32>
    %cst_23 = arith.constant dense<0.000000e+00> : vector<16xf32>
    %20 = vector.multi_reduction <add>, %19, %cst_23 [1] : vector<16x32xf32> to vector<16xf32>
    %21 = vector.shape_cast %20 : vector<16xf32> to vector<16x1xf32>
    %cst_24 = arith.constant 3.200000e+01 : f32
    %22 = vector.broadcast %cst_24 : f32 to vector<16x1xf32>
    %23 = arith.divf %21, %22 : vector<16x1xf32>
    %cst_25 = arith.constant 9.99999974E-6 : f32
    %24 = vector.broadcast %cst_25 : f32 to vector<16x1xf32>
    %25 = arith.addf %23, %24 : vector<16x1xf32>
    %26 = math.rsqrt %25 : vector<16x1xf32>
    %27 = vector.broadcast %26 : vector<16x1xf32> to vector<16x32xf32>
    %28 = arith.mulf %18, %27 : vector<16x32xf32>
    %29 = vector.broadcast %11 : vector<1x32xf32> to vector<16x32xf32>
    %30 = arith.mulf %28, %29 : vector<16x32xf32>
    %31 = vector.broadcast %12 : vector<1x32xf32> to vector<16x32xf32>
    %32 = arith.addf %30, %31 : vector<16x32xf32>
    %c0_26 = arith.constant 0 : index
    %c0_27 = arith.constant 0 : index
    %c0_28 = arith.constant 0 : index
    %33 = vector.load %arg11[%c0_26, %c0_27, %c0_28] : memref<2x32x32xf32, #tpu.memory_space<vmem>>, vector<1x32x32xf32>
    %34 = vector.shape_cast %33 : vector<1x32x32xf32> to vector<32x32xf32>
    %cst_29 = arith.constant dense<0.000000e+00> : vector<16x32xf32>
    %35 = tpu.matmul %32, %34, %cst_29 {dimension_numbers = #tpu.dot_dimension_numbers<[1], [0], [0], [1], [0, 0, 1, 1], [], []>} : vector<16x32xf32>, vector<32x32xf32>, vector<16x32xf32> -> vector<16x32xf32>
    %c0_30 = arith.constant 0 : index
    %c0_31 = arith.constant 0 : index
    %36 = vector.load %arg12[%c0_30, %c0_31] : memref<2x32xf32, #tpu.memory_space<vmem>>, vector<1x32xf32>
    %37 = vector.broadcast %36 : vector<1x32xf32> to vector<16x32xf32>
    %38 = arith.addf %35, %37 : vector<16x32xf32>
    %cst_32 = arith.constant dense<0.000000e+00> : vector<16x32xf32>
    %39 = tpu.matmul %38, %0, %cst_32 {dimension_numbers = #tpu.dot_dimension_numbers<[1], [0], [0], [1], [0, 0, 1, 1], [], []>} : vector<16x32xf32>, vector<32x32xf32>, vector<16x32xf32> -> vector<16x32xf32>
    %40 = arith.mulf %38, %1 : vector<16x32xf32>
    %41 = arith.mulf %39, %2 : vector<16x32xf32>
    %42 = arith.addf %40, %41 : vector<16x32xf32>
    %c0_33 = arith.constant 0 : index
    %c0_34 = arith.constant 0 : index
    %c0_35 = arith.constant 0 : index
    %43 = vector.load %arg13[%c0_33, %c0_34, %c0_35] : memref<2x32x32xf32, #tpu.memory_space<vmem>>, vector<1x32x32xf32>
    %44 = vector.shape_cast %43 : vector<1x32x32xf32> to vector<32x32xf32>
    %cst_36 = arith.constant dense<0.000000e+00> : vector<16x32xf32>
    %45 = tpu.matmul %32, %44, %cst_36 {dimension_numbers = #tpu.dot_dimension_numbers<[1], [0], [0], [1], [0, 0, 1, 1], [], []>} : vector<16x32xf32>, vector<32x32xf32>, vector<16x32xf32> -> vector<16x32xf32>
    %c0_37 = arith.constant 0 : index
    %c0_38 = arith.constant 0 : index
    %46 = vector.load %arg14[%c0_37, %c0_38] : memref<2x32xf32, #tpu.memory_space<vmem>>, vector<1x32xf32>
    %47 = vector.broadcast %46 : vector<1x32xf32> to vector<16x32xf32>
    %48 = arith.addf %45, %47 : vector<16x32xf32>
    %cst_39 = arith.constant dense<0.000000e+00> : vector<16x32xf32>
    %49 = tpu.matmul %48, %0, %cst_39 {dimension_numbers = #tpu.dot_dimension_numbers<[1], [0], [0], [1], [0, 0, 1, 1], [], []>} : vector<16x32xf32>, vector<32x32xf32>, vector<16x32xf32> -> vector<16x32xf32>
    %50 = arith.mulf %48, %1 : vector<16x32xf32>
    %51 = arith.mulf %49, %2 : vector<16x32xf32>
    %52 = arith.addf %50, %51 : vector<16x32xf32>
    %c0_40 = arith.constant 0 : index
    %c0_41 = arith.constant 0 : index
    %c0_42 = arith.constant 0 : index
    %53 = vector.load %arg15[%c0_40, %c0_41, %c0_42] : memref<2x32x32xf32, #tpu.memory_space<vmem>>, vector<1x32x32xf32>
    %54 = vector.shape_cast %53 : vector<1x32x32xf32> to vector<32x32xf32>
    %cst_43 = arith.constant dense<0.000000e+00> : vector<16x32xf32>
    %55 = tpu.matmul %32, %54, %cst_43 {dimension_numbers = #tpu.dot_dimension_numbers<[1], [0], [0], [1], [0, 0, 1, 1], [], []>} : vector<16x32xf32>, vector<32x32xf32>, vector<16x32xf32> -> vector<16x32xf32>
    %c0_44 = arith.constant 0 : index
    %c0_45 = arith.constant 0 : index
    %56 = vector.load %arg16[%c0_44, %c0_45] : memref<2x32xf32, #tpu.memory_space<vmem>>, vector<1x32xf32>
    %57 = vector.broadcast %56 : vector<1x32xf32> to vector<16x32xf32>
    %58 = arith.addf %55, %57 : vector<16x32xf32>
    %cst_46 = arith.constant dense<0.000000e+00> : vector<16x16xf32>
    %59 = tpu.matmul %42, %52, %cst_46 {dimension_numbers = #tpu.dot_dimension_numbers<[1], [1], [0], [0], [0, 0, 1, 0], [], []>} : vector<16x32xf32>, vector<16x32xf32>, vector<16x16xf32> -> vector<16x16xf32>
    %cst_47 = arith.constant dense<0xFF800000> : vector<16xf32>
    %60 = vector.multi_reduction <maximumf>, %59, %cst_47 [1] : vector<16x16xf32> to vector<16xf32>
    %61 = vector.shape_cast %60 : vector<16xf32> to vector<16x1xf32>
    %62 = vector.broadcast %61 : vector<16x1xf32> to vector<16x16xf32>
    %63 = arith.subf %59, %62 : vector<16x16xf32>
    %64 = math.exp %63 : vector<16x16xf32>
    %cst_48 = arith.constant dense<0.000000e+00> : vector<16xf32>
    %65 = vector.multi_reduction <add>, %64, %cst_48 [1] : vector<16x16xf32> to vector<16xf32>
    %66 = vector.shape_cast %65 : vector<16xf32> to vector<16x1xf32>
    %cst_49 = arith.constant dense<0.000000e+00> : vector<16x32xf32>
    %67 = tpu.matmul %64, %58, %cst_49 {dimension_numbers = #tpu.dot_dimension_numbers<[1], [0], [0], [1], [0, 0, 1, 1], [], []>} : vector<16x16xf32>, vector<16x32xf32>, vector<16x32xf32> -> vector<16x32xf32>
    %68 = tpu.reciprocal %66 {approx = true} : vector<16x1xf32> -> vector<16x1xf32>
    %69 = vector.broadcast %68 : vector<16x1xf32> to vector<16x32xf32>
    %70 = arith.mulf %67, %69 : vector<16x32xf32>
    %c0_50 = arith.constant 0 : index
    %c0_51 = arith.constant 0 : index
    %c0_52 = arith.constant 0 : index
    %71 = vector.load %arg17[%c0_50, %c0_51, %c0_52] : memref<2x32x32xf32, #tpu.memory_space<vmem>>, vector<1x32x32xf32>
    %72 = vector.shape_cast %71 : vector<1x32x32xf32> to vector<32x32xf32>
    %cst_53 = arith.constant dense<0.000000e+00> : vector<16x32xf32>
    %73 = tpu.matmul %70, %72, %cst_53 {dimension_numbers = #tpu.dot_dimension_numbers<[1], [0], [0], [1], [0, 0, 1, 1], [], []>} : vector<16x32xf32>, vector<32x32xf32>, vector<16x32xf32> -> vector<16x32xf32>
    %c0_54 = arith.constant 0 : index
    %c0_55 = arith.constant 0 : index
    %74 = vector.load %arg18[%c0_54, %c0_55] : memref<2x32xf32, #tpu.memory_space<vmem>>, vector<1x32xf32>
    %75 = vector.broadcast %74 : vector<1x32xf32> to vector<16x32xf32>
    %76 = arith.addf %73, %75 : vector<16x32xf32>
    %77 = arith.addf %6, %76 : vector<16x32xf32>
    %c0_56 = arith.constant 0 : index
    %c0_57 = arith.constant 0 : index
    %78 = vector.load %arg19[%c0_56, %c0_57] : memref<2x32xf32, #tpu.memory_space<vmem>>, vector<1x32xf32>
    %c0_58 = arith.constant 0 : index
    %c0_59 = arith.constant 0 : index
    %79 = vector.load %arg20[%c0_58, %c0_59] : memref<2x32xf32, #tpu.memory_space<vmem>>, vector<1x32xf32>
    %cst_60 = arith.constant dense<0.000000e+00> : vector<16xf32>
    %80 = vector.multi_reduction <add>, %77, %cst_60 [1] : vector<16x32xf32> to vector<16xf32>
    %81 = vector.shape_cast %80 : vector<16xf32> to vector<16x1xf32>
    %cst_61 = arith.constant 3.200000e+01 : f32
    %82 = vector.broadcast %cst_61 : f32 to vector<16x1xf32>
    %83 = arith.divf %81, %82 : vector<16x1xf32>
    %84 = vector.broadcast %83 : vector<16x1xf32> to vector<16x32xf32>
    %85 = arith.subf %77, %84 : vector<16x32xf32>
    %86 = arith.mulf %85, %85 : vector<16x32xf32>
    %cst_62 = arith.constant dense<0.000000e+00> : vector<16xf32>
    %87 = vector.multi_reduction <add>, %86, %cst_62 [1] : vector<16x32xf32> to vector<16xf32>
    %88 = vector.shape_cast %87 : vector<16xf32> to vector<16x1xf32>
    %cst_63 = arith.constant 3.200000e+01 : f32
    %89 = vector.broadcast %cst_63 : f32 to vector<16x1xf32>
    %90 = arith.divf %88, %89 : vector<16x1xf32>
    %cst_64 = arith.constant 9.99999974E-6 : f32
    %91 = vector.broadcast %cst_64 : f32 to vector<16x1xf32>
    %92 = arith.addf %90, %91 : vector<16x1xf32>
    %93 = math.rsqrt %92 : vector<16x1xf32>
    %94 = vector.broadcast %93 : vector<16x1xf32> to vector<16x32xf32>
    %95 = arith.mulf %85, %94 : vector<16x32xf32>
    %96 = vector.broadcast %78 : vector<1x32xf32> to vector<16x32xf32>
    %97 = arith.mulf %95, %96 : vector<16x32xf32>
    %98 = vector.broadcast %79 : vector<1x32xf32> to vector<16x32xf32>
    %99 = arith.addf %97, %98 : vector<16x32xf32>
    %c0_65 = arith.constant 0 : index
    %c0_66 = arith.constant 0 : index
    %c0_67 = arith.constant 0 : index
    %100 = vector.load %arg21[%c0_65, %c0_66, %c0_67] : memref<2x32x32xf32, #tpu.memory_space<vmem>>, vector<1x32x32xf32>
    %101 = vector.shape_cast %100 : vector<1x32x32xf32> to vector<32x32xf32>
    %cst_68 = arith.constant dense<0.000000e+00> : vector<16x32xf32>
    %102 = tpu.matmul %99, %101, %cst_68 {dimension_numbers = #tpu.dot_dimension_numbers<[1], [0], [0], [1], [0, 0, 1, 1], [], []>} : vector<16x32xf32>, vector<32x32xf32>, vector<16x32xf32> -> vector<16x32xf32>
    %c0_69 = arith.constant 0 : index
    %c0_70 = arith.constant 0 : index
    %103 = vector.load %arg22[%c0_69, %c0_70] : memref<2x32xf32, #tpu.memory_space<vmem>>, vector<1x32xf32>
    %104 = vector.broadcast %103 : vector<1x32xf32> to vector<16x32xf32>
    %105 = arith.addf %102, %104 : vector<16x32xf32>
    %cst_71 = arith.constant dense<0.000000e+00> : vector<16x32xf32>
    %106 = tpu.matmul %105, %0, %cst_71 {dimension_numbers = #tpu.dot_dimension_numbers<[1], [0], [0], [1], [0, 0, 1, 1], [], []>} : vector<16x32xf32>, vector<32x32xf32>, vector<16x32xf32> -> vector<16x32xf32>
    %107 = arith.mulf %105, %1 : vector<16x32xf32>
    %108 = arith.mulf %106, %2 : vector<16x32xf32>
    %109 = arith.addf %107, %108 : vector<16x32xf32>
    %c0_72 = arith.constant 0 : index
    %c0_73 = arith.constant 0 : index
    %c0_74 = arith.constant 0 : index
    %110 = vector.load %arg23[%c0_72, %c0_73, %c0_74] : memref<2x64x32xf32, #tpu.memory_space<vmem>>, vector<1x64x32xf32>
    %111 = vector.shape_cast %110 : vector<1x64x32xf32> to vector<64x32xf32>
    %cst_75 = arith.constant dense<0.000000e+00> : vector<36x32xf32>
    %112 = tpu.matmul %8, %111, %cst_75 {dimension_numbers = #tpu.dot_dimension_numbers<[1], [0], [0], [1], [0, 0, 1, 1], [], []>} : vector<36x64xf32>, vector<64x32xf32>, vector<36x32xf32> -> vector<36x32xf32>
    %c0_76 = arith.constant 0 : index
    %c0_77 = arith.constant 0 : index
    %113 = vector.load %arg24[%c0_76, %c0_77] : memref<2x32xf32, #tpu.memory_space<vmem>>, vector<1x32xf32>
    %114 = vector.broadcast %113 : vector<1x32xf32> to vector<36x32xf32>
    %115 = arith.addf %112, %114 : vector<36x32xf32>
    %cst_78 = arith.constant dense<0.000000e+00> : vector<36x32xf32>
    %116 = tpu.matmul %115, %0, %cst_78 {dimension_numbers = #tpu.dot_dimension_numbers<[1], [0], [0], [1], [0, 0, 1, 1], [], []>} : vector<36x32xf32>, vector<32x32xf32>, vector<36x32xf32> -> vector<36x32xf32>
    %117 = arith.mulf %115, %3 : vector<36x32xf32>
    %118 = arith.mulf %116, %4 : vector<36x32xf32>
    %119 = arith.addf %117, %118 : vector<36x32xf32>
    %c0_79 = arith.constant 0 : index
    %c0_80 = arith.constant 0 : index
    %c0_81 = arith.constant 0 : index
    %120 = vector.load %arg25[%c0_79, %c0_80, %c0_81] : memref<2x64x32xf32, #tpu.memory_space<vmem>>, vector<1x64x32xf32>
    %121 = vector.shape_cast %120 : vector<1x64x32xf32> to vector<64x32xf32>
    %cst_82 = arith.constant dense<0.000000e+00> : vector<36x32xf32>
    %122 = tpu.matmul %10, %121, %cst_82 {dimension_numbers = #tpu.dot_dimension_numbers<[1], [0], [0], [1], [0, 0, 1, 1], [], []>} : vector<36x64xf32>, vector<64x32xf32>, vector<36x32xf32> -> vector<36x32xf32>
    %c0_83 = arith.constant 0 : index
    %c0_84 = arith.constant 0 : index
    %123 = vector.load %arg26[%c0_83, %c0_84] : memref<2x32xf32, #tpu.memory_space<vmem>>, vector<1x32xf32>
    %124 = vector.broadcast %123 : vector<1x32xf32> to vector<36x32xf32>
    %125 = arith.addf %122, %124 : vector<36x32xf32>
    %cst_85 = arith.constant dense<0.000000e+00> : vector<16x36xf32>
    %126 = tpu.matmul %109, %119, %cst_85 {dimension_numbers = #tpu.dot_dimension_numbers<[1], [1], [0], [0], [0, 0, 1, 0], [], []>} : vector<16x32xf32>, vector<36x32xf32>, vector<16x36xf32> -> vector<16x36xf32>
    %cst_86 = arith.constant dense<0xFF800000> : vector<16xf32>
    %127 = vector.multi_reduction <maximumf>, %126, %cst_86 [1] : vector<16x36xf32> to vector<16xf32>
    %128 = vector.shape_cast %127 : vector<16xf32> to vector<16x1xf32>
    %129 = vector.broadcast %128 : vector<16x1xf32> to vector<16x36xf32>
    %130 = arith.subf %126, %129 : vector<16x36xf32>
    %131 = math.exp %130 : vector<16x36xf32>
    %cst_87 = arith.constant dense<0.000000e+00> : vector<16xf32>
    %132 = vector.multi_reduction <add>, %131, %cst_87 [1] : vector<16x36xf32> to vector<16xf32>
    %133 = vector.shape_cast %132 : vector<16xf32> to vector<16x1xf32>
    %cst_88 = arith.constant dense<0.000000e+00> : vector<16x32xf32>
    %134 = tpu.matmul %131, %125, %cst_88 {dimension_numbers = #tpu.dot_dimension_numbers<[1], [0], [0], [1], [0, 0, 1, 1], [], []>} : vector<16x36xf32>, vector<36x32xf32>, vector<16x32xf32> -> vector<16x32xf32>
    %135 = tpu.reciprocal %133 {approx = true} : vector<16x1xf32> -> vector<16x1xf32>
    %136 = vector.broadcast %135 : vector<16x1xf32> to vector<16x32xf32>
    %137 = arith.mulf %134, %136 : vector<16x32xf32>
    %c0_89 = arith.constant 0 : index
    %c0_90 = arith.constant 0 : index
    %c0_91 = arith.constant 0 : index
    %138 = vector.load %arg27[%c0_89, %c0_90, %c0_91] : memref<2x32x32xf32, #tpu.memory_space<vmem>>, vector<1x32x32xf32>
    %139 = vector.shape_cast %138 : vector<1x32x32xf32> to vector<32x32xf32>
    %cst_92 = arith.constant dense<0.000000e+00> : vector<16x32xf32>
    %140 = tpu.matmul %137, %139, %cst_92 {dimension_numbers = #tpu.dot_dimension_numbers<[1], [0], [0], [1], [0, 0, 1, 1], [], []>} : vector<16x32xf32>, vector<32x32xf32>, vector<16x32xf32> -> vector<16x32xf32>
    %c0_93 = arith.constant 0 : index
    %c0_94 = arith.constant 0 : index
    %141 = vector.load %arg28[%c0_93, %c0_94] : memref<2x32xf32, #tpu.memory_space<vmem>>, vector<1x32xf32>
    %142 = vector.broadcast %141 : vector<1x32xf32> to vector<16x32xf32>
    %143 = arith.addf %140, %142 : vector<16x32xf32>
    %144 = arith.addf %77, %143 : vector<16x32xf32>
    %c0_95 = arith.constant 0 : index
    %c0_96 = arith.constant 0 : index
    %145 = vector.load %arg29[%c0_95, %c0_96] : memref<2x32xf32, #tpu.memory_space<vmem>>, vector<1x32xf32>
    %c0_97 = arith.constant 0 : index
    %c0_98 = arith.constant 0 : index
    %146 = vector.load %arg30[%c0_97, %c0_98] : memref<2x32xf32, #tpu.memory_space<vmem>>, vector<1x32xf32>
    %cst_99 = arith.constant dense<0.000000e+00> : vector<16xf32>
    %147 = vector.multi_reduction <add>, %144, %cst_99 [1] : vector<16x32xf32> to vector<16xf32>
    %148 = vector.shape_cast %147 : vector<16xf32> to vector<16x1xf32>
    %cst_100 = arith.constant 3.200000e+01 : f32
    %149 = vector.broadcast %cst_100 : f32 to vector<16x1xf32>
    %150 = arith.divf %148, %149 : vector<16x1xf32>
    %151 = vector.broadcast %150 : vector<16x1xf32> to vector<16x32xf32>
    %152 = arith.subf %144, %151 : vector<16x32xf32>
    %153 = arith.mulf %152, %152 : vector<16x32xf32>
    %cst_101 = arith.constant dense<0.000000e+00> : vector<16xf32>
    %154 = vector.multi_reduction <add>, %153, %cst_101 [1] : vector<16x32xf32> to vector<16xf32>
    %155 = vector.shape_cast %154 : vector<16xf32> to vector<16x1xf32>
    %cst_102 = arith.constant 3.200000e+01 : f32
    %156 = vector.broadcast %cst_102 : f32 to vector<16x1xf32>
    %157 = arith.divf %155, %156 : vector<16x1xf32>
    %cst_103 = arith.constant 9.99999974E-6 : f32
    %158 = vector.broadcast %cst_103 : f32 to vector<16x1xf32>
    %159 = arith.addf %157, %158 : vector<16x1xf32>
    %160 = math.rsqrt %159 : vector<16x1xf32>
    %161 = vector.broadcast %160 : vector<16x1xf32> to vector<16x32xf32>
    %162 = arith.mulf %152, %161 : vector<16x32xf32>
    %163 = vector.broadcast %145 : vector<1x32xf32> to vector<16x32xf32>
    %164 = arith.mulf %162, %163 : vector<16x32xf32>
    %165 = vector.broadcast %146 : vector<1x32xf32> to vector<16x32xf32>
    %166 = arith.addf %164, %165 : vector<16x32xf32>
    %c0_104 = arith.constant 0 : index
    %c0_105 = arith.constant 0 : index
    %c0_106 = arith.constant 0 : index
    %167 = vector.load %arg31[%c0_104, %c0_105, %c0_106] : memref<2x32x64xf32, #tpu.memory_space<vmem>>, vector<1x32x64xf32>
    %168 = vector.shape_cast %167 : vector<1x32x64xf32> to vector<32x64xf32>
    %cst_107 = arith.constant dense<0.000000e+00> : vector<16x64xf32>
    %169 = tpu.matmul %166, %168, %cst_107 {dimension_numbers = #tpu.dot_dimension_numbers<[1], [0], [0], [1], [0, 0, 1, 1], [], []>} : vector<16x32xf32>, vector<32x64xf32>, vector<16x64xf32> -> vector<16x64xf32>
    %c0_108 = arith.constant 0 : index
    %c0_109 = arith.constant 0 : index
    %170 = vector.load %arg32[%c0_108, %c0_109] : memref<2x64xf32, #tpu.memory_space<vmem>>, vector<1x64xf32>
    %171 = vector.broadcast %170 : vector<1x64xf32> to vector<16x64xf32>
    %172 = arith.addf %169, %171 : vector<16x64xf32>
    %cst_110 = arith.constant 0.000000e+00 : f32
    %173 = vector.broadcast %cst_110 : f32 to vector<16x64xf32>
    %174 = arith.maximumf %172, %173 : vector<16x64xf32>
    %c0_111 = arith.constant 0 : index
    %c0_112 = arith.constant 0 : index
    %c0_113 = arith.constant 0 : index
    %175 = vector.load %arg33[%c0_111, %c0_112, %c0_113] : memref<2x64x32xf32, #tpu.memory_space<vmem>>, vector<1x64x32xf32>
    %176 = vector.shape_cast %175 : vector<1x64x32xf32> to vector<64x32xf32>
    %cst_114 = arith.constant dense<0.000000e+00> : vector<16x32xf32>
    %177 = tpu.matmul %174, %176, %cst_114 {dimension_numbers = #tpu.dot_dimension_numbers<[1], [0], [0], [1], [0, 0, 1, 1], [], []>} : vector<16x64xf32>, vector<64x32xf32>, vector<16x32xf32> -> vector<16x32xf32>
    %c0_115 = arith.constant 0 : index
    %c0_116 = arith.constant 0 : index
    %178 = vector.load %arg34[%c0_115, %c0_116] : memref<2x32xf32, #tpu.memory_space<vmem>>, vector<1x32xf32>
    %179 = vector.broadcast %178 : vector<1x32xf32> to vector<16x32xf32>
    %180 = arith.addf %177, %179 : vector<16x32xf32>
    %181 = arith.addf %144, %180 : vector<16x32xf32>
    %c1 = arith.constant 1 : index
    %c0_117 = arith.constant 0 : index
    %182 = vector.load %arg9[%c1, %c0_117] : memref<2x32xf32, #tpu.memory_space<vmem>>, vector<1x32xf32>
    %c1_118 = arith.constant 1 : index
    %c0_119 = arith.constant 0 : index
    %183 = vector.load %arg10[%c1_118, %c0_119] : memref<2x32xf32, #tpu.memory_space<vmem>>, vector<1x32xf32>
    %cst_120 = arith.constant dense<0.000000e+00> : vector<16xf32>
    %184 = vector.multi_reduction <add>, %181, %cst_120 [1] : vector<16x32xf32> to vector<16xf32>
    %185 = vector.shape_cast %184 : vector<16xf32> to vector<16x1xf32>
    %cst_121 = arith.constant 3.200000e+01 : f32
    %186 = vector.broadcast %cst_121 : f32 to vector<16x1xf32>
    %187 = arith.divf %185, %186 : vector<16x1xf32>
    %188 = vector.broadcast %187 : vector<16x1xf32> to vector<16x32xf32>
    %189 = arith.subf %181, %188 : vector<16x32xf32>
    %190 = arith.mulf %189, %189 : vector<16x32xf32>
    %cst_122 = arith.constant dense<0.000000e+00> : vector<16xf32>
    %191 = vector.multi_reduction <add>, %190, %cst_122 [1] : vector<16x32xf32> to vector<16xf32>
    %192 = vector.shape_cast %191 : vector<16xf32> to vector<16x1xf32>
    %cst_123 = arith.constant 3.200000e+01 : f32
    %193 = vector.broadcast %cst_123 : f32 to vector<16x1xf32>
    %194 = arith.divf %192, %193 : vector<16x1xf32>
    %cst_124 = arith.constant 9.99999974E-6 : f32
    %195 = vector.broadcast %cst_124 : f32 to vector<16x1xf32>
    %196 = arith.addf %194, %195 : vector<16x1xf32>
    %197 = math.rsqrt %196 : vector<16x1xf32>
    %198 = vector.broadcast %197 : vector<16x1xf32> to vector<16x32xf32>
    %199 = arith.mulf %189, %198 : vector<16x32xf32>
    %200 = vector.broadcast %182 : vector<1x32xf32> to vector<16x32xf32>
    %201 = arith.mulf %199, %200 : vector<16x32xf32>
    %202 = vector.broadcast %183 : vector<1x32xf32> to vector<16x32xf32>
    %203 = arith.addf %201, %202 : vector<16x32xf32>
    %c1_125 = arith.constant 1 : index
    %c0_126 = arith.constant 0 : index
    %c0_127 = arith.constant 0 : index
    %204 = vector.load %arg11[%c1_125, %c0_126, %c0_127] : memref<2x32x32xf32, #tpu.memory_space<vmem>>, vector<1x32x32xf32>
    %205 = vector.shape_cast %204 : vector<1x32x32xf32> to vector<32x32xf32>
    %cst_128 = arith.constant dense<0.000000e+00> : vector<16x32xf32>
    %206 = tpu.matmul %203, %205, %cst_128 {dimension_numbers = #tpu.dot_dimension_numbers<[1], [0], [0], [1], [0, 0, 1, 1], [], []>} : vector<16x32xf32>, vector<32x32xf32>, vector<16x32xf32> -> vector<16x32xf32>
    %c1_129 = arith.constant 1 : index
    %c0_130 = arith.constant 0 : index
    %207 = vector.load %arg12[%c1_129, %c0_130] : memref<2x32xf32, #tpu.memory_space<vmem>>, vector<1x32xf32>
    %208 = vector.broadcast %207 : vector<1x32xf32> to vector<16x32xf32>
    %209 = arith.addf %206, %208 : vector<16x32xf32>
    %cst_131 = arith.constant dense<0.000000e+00> : vector<16x32xf32>
    %210 = tpu.matmul %209, %0, %cst_131 {dimension_numbers = #tpu.dot_dimension_numbers<[1], [0], [0], [1], [0, 0, 1, 1], [], []>} : vector<16x32xf32>, vector<32x32xf32>, vector<16x32xf32> -> vector<16x32xf32>
    %211 = arith.mulf %209, %1 : vector<16x32xf32>
    %212 = arith.mulf %210, %2 : vector<16x32xf32>
    %213 = arith.addf %211, %212 : vector<16x32xf32>
    %c1_132 = arith.constant 1 : index
    %c0_133 = arith.constant 0 : index
    %c0_134 = arith.constant 0 : index
    %214 = vector.load %arg13[%c1_132, %c0_133, %c0_134] : memref<2x32x32xf32, #tpu.memory_space<vmem>>, vector<1x32x32xf32>
    %215 = vector.shape_cast %214 : vector<1x32x32xf32> to vector<32x32xf32>
    %cst_135 = arith.constant dense<0.000000e+00> : vector<16x32xf32>
    %216 = tpu.matmul %203, %215, %cst_135 {dimension_numbers = #tpu.dot_dimension_numbers<[1], [0], [0], [1], [0, 0, 1, 1], [], []>} : vector<16x32xf32>, vector<32x32xf32>, vector<16x32xf32> -> vector<16x32xf32>
    %c1_136 = arith.constant 1 : index
    %c0_137 = arith.constant 0 : index
    %217 = vector.load %arg14[%c1_136, %c0_137] : memref<2x32xf32, #tpu.memory_space<vmem>>, vector<1x32xf32>
    %218 = vector.broadcast %217 : vector<1x32xf32> to vector<16x32xf32>
    %219 = arith.addf %216, %218 : vector<16x32xf32>
    %cst_138 = arith.constant dense<0.000000e+00> : vector<16x32xf32>
    %220 = tpu.matmul %219, %0, %cst_138 {dimension_numbers = #tpu.dot_dimension_numbers<[1], [0], [0], [1], [0, 0, 1, 1], [], []>} : vector<16x32xf32>, vector<32x32xf32>, vector<16x32xf32> -> vector<16x32xf32>
    %221 = arith.mulf %219, %1 : vector<16x32xf32>
    %222 = arith.mulf %220, %2 : vector<16x32xf32>
    %223 = arith.addf %221, %222 : vector<16x32xf32>
    %c1_139 = arith.constant 1 : index
    %c0_140 = arith.constant 0 : index
    %c0_141 = arith.constant 0 : index
    %224 = vector.load %arg15[%c1_139, %c0_140, %c0_141] : memref<2x32x32xf32, #tpu.memory_space<vmem>>, vector<1x32x32xf32>
    %225 = vector.shape_cast %224 : vector<1x32x32xf32> to vector<32x32xf32>
    %cst_142 = arith.constant dense<0.000000e+00> : vector<16x32xf32>
    %226 = tpu.matmul %203, %225, %cst_142 {dimension_numbers = #tpu.dot_dimension_numbers<[1], [0], [0], [1], [0, 0, 1, 1], [], []>} : vector<16x32xf32>, vector<32x32xf32>, vector<16x32xf32> -> vector<16x32xf32>
    %c1_143 = arith.constant 1 : index
    %c0_144 = arith.constant 0 : index
    %227 = vector.load %arg16[%c1_143, %c0_144] : memref<2x32xf32, #tpu.memory_space<vmem>>, vector<1x32xf32>
    %228 = vector.broadcast %227 : vector<1x32xf32> to vector<16x32xf32>
    %229 = arith.addf %226, %228 : vector<16x32xf32>
    %cst_145 = arith.constant dense<0.000000e+00> : vector<16x16xf32>
    %230 = tpu.matmul %213, %223, %cst_145 {dimension_numbers = #tpu.dot_dimension_numbers<[1], [1], [0], [0], [0, 0, 1, 0], [], []>} : vector<16x32xf32>, vector<16x32xf32>, vector<16x16xf32> -> vector<16x16xf32>
    %cst_146 = arith.constant dense<0xFF800000> : vector<16xf32>
    %231 = vector.multi_reduction <maximumf>, %230, %cst_146 [1] : vector<16x16xf32> to vector<16xf32>
    %232 = vector.shape_cast %231 : vector<16xf32> to vector<16x1xf32>
    %233 = vector.broadcast %232 : vector<16x1xf32> to vector<16x16xf32>
    %234 = arith.subf %230, %233 : vector<16x16xf32>
    %235 = math.exp %234 : vector<16x16xf32>
    %cst_147 = arith.constant dense<0.000000e+00> : vector<16xf32>
    %236 = vector.multi_reduction <add>, %235, %cst_147 [1] : vector<16x16xf32> to vector<16xf32>
    %237 = vector.shape_cast %236 : vector<16xf32> to vector<16x1xf32>
    %cst_148 = arith.constant dense<0.000000e+00> : vector<16x32xf32>
    %238 = tpu.matmul %235, %229, %cst_148 {dimension_numbers = #tpu.dot_dimension_numbers<[1], [0], [0], [1], [0, 0, 1, 1], [], []>} : vector<16x16xf32>, vector<16x32xf32>, vector<16x32xf32> -> vector<16x32xf32>
    %239 = tpu.reciprocal %237 {approx = true} : vector<16x1xf32> -> vector<16x1xf32>
    %240 = vector.broadcast %239 : vector<16x1xf32> to vector<16x32xf32>
    %241 = arith.mulf %238, %240 : vector<16x32xf32>
    %c1_149 = arith.constant 1 : index
    %c0_150 = arith.constant 0 : index
    %c0_151 = arith.constant 0 : index
    %242 = vector.load %arg17[%c1_149, %c0_150, %c0_151] : memref<2x32x32xf32, #tpu.memory_space<vmem>>, vector<1x32x32xf32>
    %243 = vector.shape_cast %242 : vector<1x32x32xf32> to vector<32x32xf32>
    %cst_152 = arith.constant dense<0.000000e+00> : vector<16x32xf32>
    %244 = tpu.matmul %241, %243, %cst_152 {dimension_numbers = #tpu.dot_dimension_numbers<[1], [0], [0], [1], [0, 0, 1, 1], [], []>} : vector<16x32xf32>, vector<32x32xf32>, vector<16x32xf32> -> vector<16x32xf32>
    %c1_153 = arith.constant 1 : index
    %c0_154 = arith.constant 0 : index
    %245 = vector.load %arg18[%c1_153, %c0_154] : memref<2x32xf32, #tpu.memory_space<vmem>>, vector<1x32xf32>
    %246 = vector.broadcast %245 : vector<1x32xf32> to vector<16x32xf32>
    %247 = arith.addf %244, %246 : vector<16x32xf32>
    %248 = arith.addf %181, %247 : vector<16x32xf32>
    %c1_155 = arith.constant 1 : index
    %c0_156 = arith.constant 0 : index
    %249 = vector.load %arg19[%c1_155, %c0_156] : memref<2x32xf32, #tpu.memory_space<vmem>>, vector<1x32xf32>
    %c1_157 = arith.constant 1 : index
    %c0_158 = arith.constant 0 : index
    %250 = vector.load %arg20[%c1_157, %c0_158] : memref<2x32xf32, #tpu.memory_space<vmem>>, vector<1x32xf32>
    %cst_159 = arith.constant dense<0.000000e+00> : vector<16xf32>
    %251 = vector.multi_reduction <add>, %248, %cst_159 [1] : vector<16x32xf32> to vector<16xf32>
    %252 = vector.shape_cast %251 : vector<16xf32> to vector<16x1xf32>
    %cst_160 = arith.constant 3.200000e+01 : f32
    %253 = vector.broadcast %cst_160 : f32 to vector<16x1xf32>
    %254 = arith.divf %252, %253 : vector<16x1xf32>
    %255 = vector.broadcast %254 : vector<16x1xf32> to vector<16x32xf32>
    %256 = arith.subf %248, %255 : vector<16x32xf32>
    %257 = arith.mulf %256, %256 : vector<16x32xf32>
    %cst_161 = arith.constant dense<0.000000e+00> : vector<16xf32>
    %258 = vector.multi_reduction <add>, %257, %cst_161 [1] : vector<16x32xf32> to vector<16xf32>
    %259 = vector.shape_cast %258 : vector<16xf32> to vector<16x1xf32>
    %cst_162 = arith.constant 3.200000e+01 : f32
    %260 = vector.broadcast %cst_162 : f32 to vector<16x1xf32>
    %261 = arith.divf %259, %260 : vector<16x1xf32>
    %cst_163 = arith.constant 9.99999974E-6 : f32
    %262 = vector.broadcast %cst_163 : f32 to vector<16x1xf32>
    %263 = arith.addf %261, %262 : vector<16x1xf32>
    %264 = math.rsqrt %263 : vector<16x1xf32>
    %265 = vector.broadcast %264 : vector<16x1xf32> to vector<16x32xf32>
    %266 = arith.mulf %256, %265 : vector<16x32xf32>
    %267 = vector.broadcast %249 : vector<1x32xf32> to vector<16x32xf32>
    %268 = arith.mulf %266, %267 : vector<16x32xf32>
    %269 = vector.broadcast %250 : vector<1x32xf32> to vector<16x32xf32>
    %270 = arith.addf %268, %269 : vector<16x32xf32>
    %c1_164 = arith.constant 1 : index
    %c0_165 = arith.constant 0 : index
    %c0_166 = arith.constant 0 : index
    %271 = vector.load %arg21[%c1_164, %c0_165, %c0_166] : memref<2x32x32xf32, #tpu.memory_space<vmem>>, vector<1x32x32xf32>
    %272 = vector.shape_cast %271 : vector<1x32x32xf32> to vector<32x32xf32>
    %cst_167 = arith.constant dense<0.000000e+00> : vector<16x32xf32>
    %273 = tpu.matmul %270, %272, %cst_167 {dimension_numbers = #tpu.dot_dimension_numbers<[1], [0], [0], [1], [0, 0, 1, 1], [], []>} : vector<16x32xf32>, vector<32x32xf32>, vector<16x32xf32> -> vector<16x32xf32>
    %c1_168 = arith.constant 1 : index
    %c0_169 = arith.constant 0 : index
    %274 = vector.load %arg22[%c1_168, %c0_169] : memref<2x32xf32, #tpu.memory_space<vmem>>, vector<1x32xf32>
    %275 = vector.broadcast %274 : vector<1x32xf32> to vector<16x32xf32>
    %276 = arith.addf %273, %275 : vector<16x32xf32>
    %cst_170 = arith.constant dense<0.000000e+00> : vector<16x32xf32>
    %277 = tpu.matmul %276, %0, %cst_170 {dimension_numbers = #tpu.dot_dimension_numbers<[1], [0], [0], [1], [0, 0, 1, 1], [], []>} : vector<16x32xf32>, vector<32x32xf32>, vector<16x32xf32> -> vector<16x32xf32>
    %278 = arith.mulf %276, %1 : vector<16x32xf32>
    %279 = arith.mulf %277, %2 : vector<16x32xf32>
    %280 = arith.addf %278, %279 : vector<16x32xf32>
    %c1_171 = arith.constant 1 : index
    %c0_172 = arith.constant 0 : index
    %c0_173 = arith.constant 0 : index
    %281 = vector.load %arg23[%c1_171, %c0_172, %c0_173] : memref<2x64x32xf32, #tpu.memory_space<vmem>>, vector<1x64x32xf32>
    %282 = vector.shape_cast %281 : vector<1x64x32xf32> to vector<64x32xf32>
    %cst_174 = arith.constant dense<0.000000e+00> : vector<36x32xf32>
    %283 = tpu.matmul %8, %282, %cst_174 {dimension_numbers = #tpu.dot_dimension_numbers<[1], [0], [0], [1], [0, 0, 1, 1], [], []>} : vector<36x64xf32>, vector<64x32xf32>, vector<36x32xf32> -> vector<36x32xf32>
    %c1_175 = arith.constant 1 : index
    %c0_176 = arith.constant 0 : index
    %284 = vector.load %arg24[%c1_175, %c0_176] : memref<2x32xf32, #tpu.memory_space<vmem>>, vector<1x32xf32>
    %285 = vector.broadcast %284 : vector<1x32xf32> to vector<36x32xf32>
    %286 = arith.addf %283, %285 : vector<36x32xf32>
    %cst_177 = arith.constant dense<0.000000e+00> : vector<36x32xf32>
    %287 = tpu.matmul %286, %0, %cst_177 {dimension_numbers = #tpu.dot_dimension_numbers<[1], [0], [0], [1], [0, 0, 1, 1], [], []>} : vector<36x32xf32>, vector<32x32xf32>, vector<36x32xf32> -> vector<36x32xf32>
    %288 = arith.mulf %286, %3 : vector<36x32xf32>
    %289 = arith.mulf %287, %4 : vector<36x32xf32>
    %290 = arith.addf %288, %289 : vector<36x32xf32>
    %c1_178 = arith.constant 1 : index
    %c0_179 = arith.constant 0 : index
    %c0_180 = arith.constant 0 : index
    %291 = vector.load %arg25[%c1_178, %c0_179, %c0_180] : memref<2x64x32xf32, #tpu.memory_space<vmem>>, vector<1x64x32xf32>
    %292 = vector.shape_cast %291 : vector<1x64x32xf32> to vector<64x32xf32>
    %cst_181 = arith.constant dense<0.000000e+00> : vector<36x32xf32>
    %293 = tpu.matmul %10, %292, %cst_181 {dimension_numbers = #tpu.dot_dimension_numbers<[1], [0], [0], [1], [0, 0, 1, 1], [], []>} : vector<36x64xf32>, vector<64x32xf32>, vector<36x32xf32> -> vector<36x32xf32>
    %c1_182 = arith.constant 1 : index
    %c0_183 = arith.constant 0 : index
    %294 = vector.load %arg26[%c1_182, %c0_183] : memref<2x32xf32, #tpu.memory_space<vmem>>, vector<1x32xf32>
    %295 = vector.broadcast %294 : vector<1x32xf32> to vector<36x32xf32>
    %296 = arith.addf %293, %295 : vector<36x32xf32>
    %cst_184 = arith.constant dense<0.000000e+00> : vector<16x36xf32>
    %297 = tpu.matmul %280, %290, %cst_184 {dimension_numbers = #tpu.dot_dimension_numbers<[1], [1], [0], [0], [0, 0, 1, 0], [], []>} : vector<16x32xf32>, vector<36x32xf32>, vector<16x36xf32> -> vector<16x36xf32>
    %cst_185 = arith.constant dense<0xFF800000> : vector<16xf32>
    %298 = vector.multi_reduction <maximumf>, %297, %cst_185 [1] : vector<16x36xf32> to vector<16xf32>
    %299 = vector.shape_cast %298 : vector<16xf32> to vector<16x1xf32>
    %300 = vector.broadcast %299 : vector<16x1xf32> to vector<16x36xf32>
    %301 = arith.subf %297, %300 : vector<16x36xf32>
    %302 = math.exp %301 : vector<16x36xf32>
    %cst_186 = arith.constant dense<0.000000e+00> : vector<16xf32>
    %303 = vector.multi_reduction <add>, %302, %cst_186 [1] : vector<16x36xf32> to vector<16xf32>
    %304 = vector.shape_cast %303 : vector<16xf32> to vector<16x1xf32>
    %cst_187 = arith.constant dense<0.000000e+00> : vector<16x32xf32>
    %305 = tpu.matmul %302, %296, %cst_187 {dimension_numbers = #tpu.dot_dimension_numbers<[1], [0], [0], [1], [0, 0, 1, 1], [], []>} : vector<16x36xf32>, vector<36x32xf32>, vector<16x32xf32> -> vector<16x32xf32>
    %306 = tpu.reciprocal %304 {approx = true} : vector<16x1xf32> -> vector<16x1xf32>
    %307 = vector.broadcast %306 : vector<16x1xf32> to vector<16x32xf32>
    %308 = arith.mulf %305, %307 : vector<16x32xf32>
    %c1_188 = arith.constant 1 : index
    %c0_189 = arith.constant 0 : index
    %c0_190 = arith.constant 0 : index
    %309 = vector.load %arg27[%c1_188, %c0_189, %c0_190] : memref<2x32x32xf32, #tpu.memory_space<vmem>>, vector<1x32x32xf32>
    %310 = vector.shape_cast %309 : vector<1x32x32xf32> to vector<32x32xf32>
    %cst_191 = arith.constant dense<0.000000e+00> : vector<16x32xf32>
    %311 = tpu.matmul %308, %310, %cst_191 {dimension_numbers = #tpu.dot_dimension_numbers<[1], [0], [0], [1], [0, 0, 1, 1], [], []>} : vector<16x32xf32>, vector<32x32xf32>, vector<16x32xf32> -> vector<16x32xf32>
    %c1_192 = arith.constant 1 : index
    %c0_193 = arith.constant 0 : index
    %312 = vector.load %arg28[%c1_192, %c0_193] : memref<2x32xf32, #tpu.memory_space<vmem>>, vector<1x32xf32>
    %313 = vector.broadcast %312 : vector<1x32xf32> to vector<16x32xf32>
    %314 = arith.addf %311, %313 : vector<16x32xf32>
    %315 = arith.addf %248, %314 : vector<16x32xf32>
    %c1_194 = arith.constant 1 : index
    %c0_195 = arith.constant 0 : index
    %316 = vector.load %arg29[%c1_194, %c0_195] : memref<2x32xf32, #tpu.memory_space<vmem>>, vector<1x32xf32>
    %c1_196 = arith.constant 1 : index
    %c0_197 = arith.constant 0 : index
    %317 = vector.load %arg30[%c1_196, %c0_197] : memref<2x32xf32, #tpu.memory_space<vmem>>, vector<1x32xf32>
    %cst_198 = arith.constant dense<0.000000e+00> : vector<16xf32>
    %318 = vector.multi_reduction <add>, %315, %cst_198 [1] : vector<16x32xf32> to vector<16xf32>
    %319 = vector.shape_cast %318 : vector<16xf32> to vector<16x1xf32>
    %cst_199 = arith.constant 3.200000e+01 : f32
    %320 = vector.broadcast %cst_199 : f32 to vector<16x1xf32>
    %321 = arith.divf %319, %320 : vector<16x1xf32>
    %322 = vector.broadcast %321 : vector<16x1xf32> to vector<16x32xf32>
    %323 = arith.subf %315, %322 : vector<16x32xf32>
    %324 = arith.mulf %323, %323 : vector<16x32xf32>
    %cst_200 = arith.constant dense<0.000000e+00> : vector<16xf32>
    %325 = vector.multi_reduction <add>, %324, %cst_200 [1] : vector<16x32xf32> to vector<16xf32>
    %326 = vector.shape_cast %325 : vector<16xf32> to vector<16x1xf32>
    %cst_201 = arith.constant 3.200000e+01 : f32
    %327 = vector.broadcast %cst_201 : f32 to vector<16x1xf32>
    %328 = arith.divf %326, %327 : vector<16x1xf32>
    %cst_202 = arith.constant 9.99999974E-6 : f32
    %329 = vector.broadcast %cst_202 : f32 to vector<16x1xf32>
    %330 = arith.addf %328, %329 : vector<16x1xf32>
    %331 = math.rsqrt %330 : vector<16x1xf32>
    %332 = vector.broadcast %331 : vector<16x1xf32> to vector<16x32xf32>
    %333 = arith.mulf %323, %332 : vector<16x32xf32>
    %334 = vector.broadcast %316 : vector<1x32xf32> to vector<16x32xf32>
    %335 = arith.mulf %333, %334 : vector<16x32xf32>
    %336 = vector.broadcast %317 : vector<1x32xf32> to vector<16x32xf32>
    %337 = arith.addf %335, %336 : vector<16x32xf32>
    %c1_203 = arith.constant 1 : index
    %c0_204 = arith.constant 0 : index
    %c0_205 = arith.constant 0 : index
    %338 = vector.load %arg31[%c1_203, %c0_204, %c0_205] : memref<2x32x64xf32, #tpu.memory_space<vmem>>, vector<1x32x64xf32>
    %339 = vector.shape_cast %338 : vector<1x32x64xf32> to vector<32x64xf32>
    %cst_206 = arith.constant dense<0.000000e+00> : vector<16x64xf32>
    %340 = tpu.matmul %337, %339, %cst_206 {dimension_numbers = #tpu.dot_dimension_numbers<[1], [0], [0], [1], [0, 0, 1, 1], [], []>} : vector<16x32xf32>, vector<32x64xf32>, vector<16x64xf32> -> vector<16x64xf32>
    %c1_207 = arith.constant 1 : index
    %c0_208 = arith.constant 0 : index
    %341 = vector.load %arg32[%c1_207, %c0_208] : memref<2x64xf32, #tpu.memory_space<vmem>>, vector<1x64xf32>
    %342 = vector.broadcast %341 : vector<1x64xf32> to vector<16x64xf32>
    %343 = arith.addf %340, %342 : vector<16x64xf32>
    %cst_209 = arith.constant 0.000000e+00 : f32
    %344 = vector.broadcast %cst_209 : f32 to vector<16x64xf32>
    %345 = arith.maximumf %343, %344 : vector<16x64xf32>
    %c1_210 = arith.constant 1 : index
    %c0_211 = arith.constant 0 : index
    %c0_212 = arith.constant 0 : index
    %346 = vector.load %arg33[%c1_210, %c0_211, %c0_212] : memref<2x64x32xf32, #tpu.memory_space<vmem>>, vector<1x64x32xf32>
    %347 = vector.shape_cast %346 : vector<1x64x32xf32> to vector<64x32xf32>
    %cst_213 = arith.constant dense<0.000000e+00> : vector<16x32xf32>
    %348 = tpu.matmul %345, %347, %cst_213 {dimension_numbers = #tpu.dot_dimension_numbers<[1], [0], [0], [1], [0, 0, 1, 1], [], []>} : vector<16x64xf32>, vector<64x32xf32>, vector<16x32xf32> -> vector<16x32xf32>
    %c1_214 = arith.constant 1 : index
    %c0_215 = arith.constant 0 : index
    %349 = vector.load %arg34[%c1_214, %c0_215] : memref<2x32xf32, #tpu.memory_space<vmem>>, vector<1x32xf32>
    %350 = vector.broadcast %349 : vector<1x32xf32> to vector<16x32xf32>
    %351 = arith.addf %348, %350 : vector<16x32xf32>
    %352 = arith.addf %315, %351 : vector<16x32xf32>
    %c0_216 = arith.constant 0 : index
    %c0_217 = arith.constant 0 : index
    %353 = vector.load %arg35[%c0_216, %c0_217] : memref<1x32xf32, #tpu.memory_space<vmem>>, vector<1x32xf32>
    %c0_218 = arith.constant 0 : index
    %c0_219 = arith.constant 0 : index
    %354 = vector.load %arg36[%c0_218, %c0_219] : memref<1x32xf32, #tpu.memory_space<vmem>>, vector<1x32xf32>
    %cst_220 = arith.constant dense<0.000000e+00> : vector<16xf32>
    %355 = vector.multi_reduction <add>, %352, %cst_220 [1] : vector<16x32xf32> to vector<16xf32>
    %356 = vector.shape_cast %355 : vector<16xf32> to vector<16x1xf32>
    %cst_221 = arith.constant 3.200000e+01 : f32
    %357 = vector.broadcast %cst_221 : f32 to vector<16x1xf32>
    %358 = arith.divf %356, %357 : vector<16x1xf32>
    %359 = vector.broadcast %358 : vector<16x1xf32> to vector<16x32xf32>
    %360 = arith.subf %352, %359 : vector<16x32xf32>
    %361 = arith.mulf %360, %360 : vector<16x32xf32>
    %cst_222 = arith.constant dense<0.000000e+00> : vector<16xf32>
    %362 = vector.multi_reduction <add>, %361, %cst_222 [1] : vector<16x32xf32> to vector<16xf32>
    %363 = vector.shape_cast %362 : vector<16xf32> to vector<16x1xf32>
    %cst_223 = arith.constant 3.200000e+01 : f32
    %364 = vector.broadcast %cst_223 : f32 to vector<16x1xf32>
    %365 = arith.divf %363, %364 : vector<16x1xf32>
    %cst_224 = arith.constant 9.99999974E-6 : f32
    %366 = vector.broadcast %cst_224 : f32 to vector<16x1xf32>
    %367 = arith.addf %365, %366 : vector<16x1xf32>
    %368 = math.rsqrt %367 : vector<16x1xf32>
    %369 = vector.broadcast %368 : vector<16x1xf32> to vector<16x32xf32>
    %370 = arith.mulf %360, %369 : vector<16x32xf32>
    %371 = vector.broadcast %353 : vector<1x32xf32> to vector<16x32xf32>
    %372 = arith.mulf %370, %371 : vector<16x32xf32>
    %373 = vector.broadcast %354 : vector<1x32xf32> to vector<16x32xf32>
    %374 = arith.addf %372, %373 : vector<16x32xf32>
    %c0_225 = arith.constant 0 : index
    %c0_226 = arith.constant 0 : index
    %c0_227 = arith.constant 0 : index
    %375 = vector.load %arg37[%c0_225, %c0_226, %c0_227] : memref<1x16x32xf32, #tpu.memory_space<vmem>>, vector<1x16x32xf32>
    %376 = vector.shape_cast %375 : vector<1x16x32xf32> to vector<16x32xf32>
    %377 = vector.shape_cast %374 : vector<16x32xf32> to vector<1x16x32xf32>
    tpu.vector_store %arg37[%c0_225, %c0_226, %c0_227], %377 {strides = array<i32>} : memref<1x16x32xf32, #tpu.memory_space<vmem>>, vector<1x16x32xf32>,
    return
  }
  func.func @transform_0(%arg0: i32) -> (i32, i32, i32) {
    %c0_i32 = arith.constant 0 : i32
    %c0_i32_0 = arith.constant 0 : i32
    %c0_i32_1 = arith.constant 0 : i32
    return %arg0, %c0_i32, %c0_i32_0 : i32, i32, i32
  }
  func.func @transform_1(%arg0: i32) -> (i32, i32, i32) {
    %c0_i32 = arith.constant 0 : i32
    %c0_i32_0 = arith.constant 0 : i32
    %c0_i32_1 = arith.constant 0 : i32
    return %arg0, %c0_i32, %c0_i32_0 : i32, i32, i32
  }
  func.func @transform_2(%arg0: i32) -> (i32, i32, i32) {
    %c0_i32 = arith.constant 0 : i32
    %c0_i32_0 = arith.constant 0 : i32
    %c0_i32_1 = arith.constant 0 : i32
    return %arg0, %c0_i32, %c0_i32_0 : i32, i32, i32
  }
  func.func @transform_3(%arg0: i32) -> (i32, i32) {
    %c0_i32 = arith.constant 0 : i32
    %c0_i32_0 = arith.constant 0 : i32
    %c0_i32_1 = arith.constant 0 : i32
    return %c0_i32, %c0_i32_0 : i32, i32
  }
  func.func @transform_4(%arg0: i32) -> (i32, i32) {
    %c0_i32 = arith.constant 0 : i32
    %c0_i32_0 = arith.constant 0 : i32
    %c0_i32_1 = arith.constant 0 : i32
    return %c0_i32, %c0_i32_0 : i32, i32
  }
  func.func @transform_5(%arg0: i32) -> (i32, i32) {
    %c0_i32 = arith.constant 0 : i32
    %c0_i32_0 = arith.constant 0 : i32
    %c0_i32_1 = arith.constant 0 : i32
    return %c0_i32, %c0_i32_0 : i32, i32
  }
  func.func @transform_6(%arg0: i32) -> (i32, i32) {
    %c0_i32 = arith.constant 0 : i32
    %c0_i32_0 = arith.constant 0 : i32
    %c0_i32_1 = arith.constant 0 : i32
    return %c0_i32, %c0_i32_0 : i32, i32
  }
  func.func @transform_7(%arg0: i32) -> (i32, i32) {
    %c0_i32 = arith.constant 0 : i32
    %c0_i32_0 = arith.constant 0 : i32
    %c0_i32_1 = arith.constant 0 : i32
    return %c0_i32, %c0_i32_0 : i32, i32
  }
  func.func @transform_8(%arg0: i32) -> (i32, i32) {
    %c0_i32 = arith.constant 0 : i32
    %c0_i32_0 = arith.constant 0 : i32
    %c0_i32_1 = arith.constant 0 : i32
    return %c0_i32, %c0_i32_0 : i32, i32
  }
  func.func @transform_9(%arg0: i32) -> (i32, i32) {
    %c0_i32 = arith.constant 0 : i32
    %c0_i32_0 = arith.constant 0 : i32
    %c0_i32_1 = arith.constant 0 : i32
    return %c0_i32, %c0_i32_0 : i32, i32
  }
  func.func @transform_10(%arg0: i32) -> (i32, i32, i32) {
    %c0_i32 = arith.constant 0 : i32
    %c0_i32_0 = arith.constant 0 : i32
    %c0_i32_1 = arith.constant 0 : i32
    %c0_i32_2 = arith.constant 0 : i32
    return %c0_i32, %c0_i32_0, %c0_i32_1 : i32, i32, i32
  }
  func.func @transform_11(%arg0: i32) -> (i32, i32) {
    %c0_i32 = arith.constant 0 : i32
    %c0_i32_0 = arith.constant 0 : i32
    %c0_i32_1 = arith.constant 0 : i32
    return %c0_i32, %c0_i32_0 : i32, i32
  }
  func.func @transform_12(%arg0: i32) -> (i32, i32, i32) {
    %c0_i32 = arith.constant 0 : i32
    %c0_i32_0 = arith.constant 0 : i32
    %c0_i32_1 = arith.constant 0 : i32
    %c0_i32_2 = arith.constant 0 : i32
    return %c0_i32, %c0_i32_0, %c0_i32_1 : i32, i32, i32
  }
  func.func @transform_13(%arg0: i32) -> (i32, i32) {
    %c0_i32 = arith.constant 0 : i32
    %c0_i32_0 = arith.constant 0 : i32
    %c0_i32_1 = arith.constant 0 : i32
    return %c0_i32, %c0_i32_0 : i32, i32
  }
  func.func @transform_14(%arg0: i32) -> (i32, i32, i32) {
    %c0_i32 = arith.constant 0 : i32
    %c0_i32_0 = arith.constant 0 : i32
    %c0_i32_1 = arith.constant 0 : i32
    %c0_i32_2 = arith.constant 0 : i32
    return %c0_i32, %c0_i32_0, %c0_i32_1 : i32, i32, i32
  }
  func.func @transform_15(%arg0: i32) -> (i32, i32) {
    %c0_i32 = arith.constant 0 : i32
    %c0_i32_0 = arith.constant 0 : i32
    %c0_i32_1 = arith.constant 0 : i32
    return %c0_i32, %c0_i32_0 : i32, i32
  }
  func.func @transform_16(%arg0: i32) -> (i32, i32, i32) {
    %c0_i32 = arith.constant 0 : i32
    %c0_i32_0 = arith.constant 0 : i32
    %c0_i32_1 = arith.constant 0 : i32
    %c0_i32_2 = arith.constant 0 : i32
    return %c0_i32, %c0_i32_0, %c0_i32_1 : i32, i32, i32
  }
  func.func @transform_17(%arg0: i32) -> (i32, i32) {
    %c0_i32 = arith.constant 0 : i32
    %c0_i32_0 = arith.constant 0 : i32
    %c0_i32_1 = arith.constant 0 : i32
    return %c0_i32, %c0_i32_0 : i32, i32
  }
  func.func @transform_18(%arg0: i32) -> (i32, i32) {
    %c0_i32 = arith.constant 0 : i32
    %c0_i32_0 = arith.constant 0 : i32
    %c0_i32_1 = arith.constant 0 : i32
    return %c0_i32, %c0_i32_0 : i32, i32
  }
  func.func @transform_19(%arg0: i32) -> (i32, i32) {
    %c0_i32 = arith.constant 0 : i32
    %c0_i32_0 = arith.constant 0 : i32
    %c0_i32_1 = arith.constant 0 : i32
    return %c0_i32, %c0_i32_0 : i32, i32
  }
  func.func @transform_20(%arg0: i32) -> (i32, i32, i32) {
    %c0_i32 = arith.constant 0 : i32
    %c0_i32_0 = arith.constant 0 : i32
    %c0_i32_1 = arith.constant 0 : i32
    %c0_i32_2 = arith.constant 0 : i32
    return %c0_i32, %c0_i32_0, %c0_i32_1 : i32, i32, i32
  }
  func.func @transform_21(%arg0: i32) -> (i32, i32) {
    %c0_i32 = arith.constant 0 : i32
    %c0_i32_0 = arith.constant 0 : i32
    %c0_i32_1 = arith.constant 0 : i32
    return %c0_i32, %c0_i32_0 : i32, i32
  }
  func.func @transform_22(%arg0: i32) -> (i32, i32, i32) {
    %c0_i32 = arith.constant 0 : i32
    %c0_i32_0 = arith.constant 0 : i32
    %c0_i32_1 = arith.constant 0 : i32
    %c0_i32_2 = arith.constant 0 : i32
    return %c0_i32, %c0_i32_0, %c0_i32_1 : i32, i32, i32
  }
  func.func @transform_23(%arg0: i32) -> (i32, i32) {
    %c0_i32 = arith.constant 0 : i32
    %c0_i32_0 = arith.constant 0 : i32
    %c0_i32_1 = arith.constant 0 : i32
    return %c0_i32, %c0_i32_0 : i32, i32
  }
  func.func @transform_24(%arg0: i32) -> (i32, i32, i32) {
    %c0_i32 = arith.constant 0 : i32
    %c0_i32_0 = arith.constant 0 : i32
    %c0_i32_1 = arith.constant 0 : i32
    %c0_i32_2 = arith.constant 0 : i32
    return %c0_i32, %c0_i32_0, %c0_i32_1 : i32, i32, i32
  }
  func.func @transform_25(%arg0: i32) -> (i32, i32) {
    %c0_i32 = arith.constant 0 : i32
    %c0_i32_0 = arith.constant 0 : i32
    %c0_i32_1 = arith.constant 0 : i32
    return %c0_i32, %c0_i32_0 : i32, i32
  }
  func.func @transform_26(%arg0: i32) -> (i32, i32, i32) {
    %c0_i32 = arith.constant 0 : i32
    %c0_i32_0 = arith.constant 0 : i32
    %c0_i32_1 = arith.constant 0 : i32
    %c0_i32_2 = arith.constant 0 : i32
    return %c0_i32, %c0_i32_0, %c0_i32_1 : i32, i32, i32
  }
  func.func @transform_27(%arg0: i32) -> (i32, i32) {
    %c0_i32 = arith.constant 0 : i32
    %c0_i32_0 = arith.constant 0 : i32
    %c0_i32_1 = arith.constant 0 : i32
    return %c0_i32, %c0_i32_0 : i32, i32
  }
  func.func @transform_28(%arg0: i32) -> (i32, i32) {
    %c0_i32 = arith.constant 0 : i32
    %c0_i32_0 = arith.constant 0 : i32
    %c0_i32_1 = arith.constant 0 : i32
    return %c0_i32, %c0_i32_0 : i32, i32
  }
  func.func @transform_29(%arg0: i32) -> (i32, i32) {
    %c0_i32 = arith.constant 0 : i32
    %c0_i32_0 = arith.constant 0 : i32
    %c0_i32_1 = arith.constant 0 : i32
    return %c0_i32, %c0_i32_0 : i32, i32
  }
  func.func @transform_30(%arg0: i32) -> (i32, i32, i32) {
    %c0_i32 = arith.constant 0 : i32
    %c0_i32_0 = arith.constant 0 : i32
    %c0_i32_1 = arith.constant 0 : i32
    %c0_i32_2 = arith.constant 0 : i32
    return %c0_i32, %c0_i32_0, %c0_i32_1 : i32, i32, i32
  }
  func.func @transform_31(%arg0: i32) -> (i32, i32) {
    %c0_i32 = arith.constant 0 : i32
    %c0_i32_0 = arith.constant 0 : i32
    %c0_i32_1 = arith.constant 0 : i32
    return %c0_i32, %c0_i32_0 : i32, i32
  }
  func.func @transform_32(%arg0: i32) -> (i32, i32, i32) {
    %c0_i32 = arith.constant 0 : i32
    %c0_i32_0 = arith.constant 0 : i32
    %c0_i32_1 = arith.constant 0 : i32
    %c0_i32_2 = arith.constant 0 : i32
    return %c0_i32, %c0_i32_0, %c0_i32_1 : i32, i32, i32
  }
  func.func @transform_33(%arg0: i32) -> (i32, i32) {
    %c0_i32 = arith.constant 0 : i32
    %c0_i32_0 = arith.constant 0 : i32
    %c0_i32_1 = arith.constant 0 : i32
    return %c0_i32, %c0_i32_0 : i32, i32
  }
  func.func @transform_34(%arg0: i32) -> (i32, i32) {
    %c0_i32 = arith.constant 0 : i32
    %c0_i32_0 = arith.constant 0 : i32
    %c0_i32_1 = arith.constant 0 : i32
    return %c0_i32, %c0_i32_0 : i32, i32
  }
  func.func @transform_35(%arg0: i32) -> (i32, i32) {
    %c0_i32 = arith.constant 0 : i32
    %c0_i32_0 = arith.constant 0 : i32
    %c0_i32_1 = arith.constant 0 : i32
    return %c0_i32, %c0_i32_0 : i32, i32
  }
  func.func @transform_36(%arg0: i32) -> (i32, i32, i32) {
    %c0_i32 = arith.constant 0 : i32
    %c0_i32_0 = arith.constant 0 : i32
    %c0_i32_1 = arith.constant 0 : i32
    return %arg0, %c0_i32, %c0_i32_0 : i32, i32, i32
  }
}

</mosaic_0001>

<bundles_post_ra>
// kernel: memory_attention.1
= control target key start
LH: loop header
LB: loop body
LE: loop exit
PB: predicated region body
PF: predicated region fallthrough
CT: control target
= control target key end

     0   :  { %s6435_s6 = smov 1   ;;  %s6436_s10 = smov 2   ;;  %s7327_s0 = inlined_call_operand.smem [shape: u32[37], index: -1, kind: input, shape index: {}] }
   0x1   :  { %s6482_s5 = sld [smem:[%s7327_s0]]   ;;  %s6437_s14 = smov 3  }
   0x2   :  { %s6487_s9 = sld [smem:[%s7327_s0 + %s6435_s6]]   ;;  %s6438_s18 = smov 4  }
   0x3   :  { %s6492_s13 = sld [smem:[%s7327_s0 + %s6436_s10]]   ;;  %s6439_s22 = smov 5  }
   0x4   :  { %s6497_s17 = sld [smem:[%s7327_s0 + %s6437_s14]]   ;;  %s6440_s26 = smov 6  }
   0x5   :  { %s6502_s21 = sld [smem:[%s7327_s0 + %s6438_s18]]   ;;  %s6441_s30 = smov 7  }
   0x6   :  { %s6507_s25 = sld [smem:[%s7327_s0 + %s6439_s22]]   ;;  %s6442_s4 = smov 8  }
   0x7   :  { %7355 = sst [smem:[#allocation2_spill]] %s6482_s5  ;;  %s6443_s10 = smov 9  }
   0x8   :  { %7356 = sst [smem:[#allocation3_spill]] %s6487_s9  ;;  %s6444_s15 = smov 10  }
   0x9   :  { %7357 = sst [smem:[#allocation4_spill]] %s6492_s13  ;;  %s6445_s20 = smov 11  }
   0xa   :  { %s6512_s29 = sld [smem:[%s7327_s0 + %s6440_s26]]   ;;  %s6446_s26 = smov 12  }
   0xb   :  { %s6517_s3 = sld [smem:[%s7327_s0 + %s6441_s30]]   ;;  %s6447_s1 = smov 13  }
   0xc   :  { %7358 = sst [smem:[#allocation5_spill]] %s6507_s25  ;;  %s6448_s7 = smov 14  }
   0xd   :  { %s6522_s8 = sld [smem:[%s7327_s0 + %s6442_s4]]   ;;  %s6450_s22 = smov 16  }
   0xe   :  { %s6527_s14 = sld [smem:[%s7327_s0 + %s6443_s10]]   ;;  %s6451_s28 = smov 17  }
   0xf   :  { %s6532_s19 = sld [smem:[%s7327_s0 + %s6444_s15]]   ;;  %s6449_s15 = smov 15  }
  0x10   :  { %7359 = sst [smem:[#allocation6_spill]] %s6512_s29 }
  0x11   :  { %7360 = sst [smem:[#allocation7_spill]] %s6517_s3 }
  0x12   :  { %s6537_s24 = sld [smem:[%s7327_s0 + %s6445_s20]]  }
  0x13   :  { %s6542_s30 = sld [smem:[%s7327_s0 + %s6446_s26]]  }
  0x14   :  { %s6547_s6 = sld [smem:[%s7327_s0 + %s6447_s1]]  }
  0x15   :  { %s6552_s12 = sld [smem:[%s7327_s0 + %s6448_s7]]   ;;  %s6452_s7 = smov 18  }
  0x16   :  { %s6557_s20 = sld [smem:[%s7327_s0 + %s6449_s15]]   ;;  %s6453_s15 = smov 19  }
  0x17   :  { %s6562_s27 = sld [smem:[%s7327_s0 + %s6450_s22]]   ;;  %s6454_s22 = smov 20  }
  0x18   :  { %s6567_s4 = sld [smem:[%s7327_s0 + %s6451_s28]]   ;;  %s6455_s28 = smov 21  }
  0x19   :  { %s6572_s29 = sld [smem:[%s7327_s0 + %s6452_s7]]   ;;  %s6456_s7 = smov 22  }
  0x1a   :  { %s6577_s25 = sld [smem:[%s7327_s0 + %s6453_s15]]   ;;  %s6457_s15 = smov 23  }
  0x1b   :  { %s6582_s13 = sld [smem:[%s7327_s0 + %s6454_s22]]   ;;  %s6458_s22 = smov 24  }
  0x1c   :  { %s6587_s9 = sld [smem:[%s7327_s0 + %s6455_s28]]   ;;  %s6459_s28 = smov 25  }
  0x1e   :  { %7361 = sst [smem:[#allocation8_spill]] %s6567_s4 }
  0x1f   :  { %7362 = sst [smem:[#allocation9_spill]] %s6572_s29 }
  0x20   :  { %7363 = sst [smem:[#allocation10_spill]] %s6577_s25 }
  0x21   :  { %7364 = sst [smem:[#allocation11_spill]] %s6582_s13 }
  0x22   :  { %7365 = sst [smem:[#allocation12_spill]] %s6587_s9 }
  0x23   :  { %s6592_s29 = sld [smem:[%s7327_s0 + %s6456_s7]]   ;;  %s6460_s7 = smov 26  }
  0x24   :  { %s6597_s25 = sld [smem:[%s7327_s0 + %s6457_s15]]   ;;  %s6461_s15 = smov 27  }
  0x25   :  { %s6602_s13 = sld [smem:[%s7327_s0 + %s6458_s22]]   ;;  %s6462_s22 = smov 28  }
  0x26   :  { %s6607_s9 = sld [smem:[%s7327_s0 + %s6459_s28]]   ;;  %s6463_s28 = smov 29  }
  0x29   :  { %7366 = sst [smem:[#allocation13_spill]] %s6592_s29 }
  0x2a   :  { %7367 = sst [smem:[#allocation14_spill]] %s6597_s25 }
  0x2b   :  { %7368 = sst [smem:[#allocation15_spill]] %s6602_s13 }
  0x2c   :  { %7369 = sst [smem:[#allocation16_spill]] %s6607_s9 }
  0x2d   :  { %s6612_s29 = sld [smem:[%s7327_s0 + %s6460_s7]]   ;;  %s6464_s7 = smov 30  }
  0x2e   :  { %s6617_s25 = sld [smem:[%s7327_s0 + %s6461_s15]]   ;;  %s6465_s15 = smov 31  }
  0x2f   :  { %s6622_s13 = sld [smem:[%s7327_s0 + %s6462_s22]]   ;;  %s6466_s22 = smov 32  }
  0x30   :  { %s6627_s9 = sld [smem:[%s7327_s0 + %s6463_s28]]   ;;  %s6467_s28 = smov 33  }
  0x33   :  { %7370 = sst [smem:[#allocation17_spill]] %s6612_s29 }
  0x34   :  { %7371 = sst [smem:[#allocation18_spill]] %s6617_s25 }
  0x35   :  { %7372 = sst [smem:[#allocation19_spill]] %s6622_s13 }
  0x36   :  { %7373 = sst [smem:[#allocation20_spill]] %s6627_s9 }
  0x37   :  { %s6632_s29 = sld [smem:[%s7327_s0 + %s6464_s7]]   ;;  %s6468_s7 = smov 34  }
  0x38   :  { %s6637_s25 = sld [smem:[%s7327_s0 + %s6465_s15]]   ;;  %s6469_s15 = smov 35  }
  0x39   :  { %s6642_s13 = sld [smem:[%s7327_s0 + %s6466_s22]]   ;;  %s6470_s22 = smov 36  }
  0x3a   :  { %s6647_s9 = sld [smem:[%s7327_s0 + %s6467_s28]]   ;;  %s6664_s28 = smov 0  }
  0x3d   :  { %7374 = sst [smem:[#allocation21_spill]] %s6632_s29 }
  0x3e   :  { %7375 = sst [smem:[#allocation22_spill]] %s6637_s25 }
  0x3f   :  { %7376 = sst [smem:[#allocation23_spill]] %s6642_s13 }
  0x40   :  { %s6652_s29 = sld [smem:[%s7327_s0 + %s6468_s7]]  }
  0x41   :  { %s6657_s25 = sld [smem:[%s7327_s0 + %s6469_s15]]  }
  0x42   :  { %s6662_s13 = sld [smem:[%s7327_s0 + %s6470_s22]]  }
  0x46   :  { %7377 = sst [smem:[#allocation24_spill]] %s6652_s29 }
  0x47   :  { %7378 = sst [smem:[#allocation25_spill]] %s6657_s25 }
  0x48   :  { %7379 = sst [smem:[#allocation26_spill]] %s6662_s13 }
  0x49 LB: > { %s7380_s4 = sld [smem:[#allocation8_spill]]  ;;  %s7381_s3 = sld [smem:[#allocation7_spill]]  ;;  %s6433_s28 = sphi %s6664_s28, %s83_s28  }
  0x4a   : > { %7382 = sst [smem:[#allocation27_spill]] %s6433_s28  ;;  %s5014_s1 = sadd.s32 4294967295, %s6433_s28  }
  0x4b   : > { %p5018_p0 = scmp.ge.s32.totalorder %s6433_s28, 1  ;;  %p1019_p1 = scmp.lt.s32.totalorder %s6433_s28, 3 }
  0x4d   : > { %p1020_p2 = pnand %p5018_p0, %p1019_p1 }
  0x4f   : > { %1023 = sbr.rel (%p1020_p2) target bundleno = 8231 (0x2027), region = 164 }
  0x56   : > { %p1119_p3 = scmp.lt.s32.totalorder %s5014_s1, 1  ;;  %s7383_s5 = sld [smem:[#allocation2_spill]]  ;;  %vm1171_vm0 = vcmask 261120   ;;  %v1388_v14 = vld [vmem:[%s6542_s30] sm:$0xff]  ;;  %v1389_v15 = vld [vmem:[%s6542_s30 + $0x8] sm:$0xff]  ;;  %v1390_v19 = vld [vmem:[%s6542_s30 + $0x10] sm:$0xff] }
  0x57   : > { %v1211_v16 = vld [vmem:[%s6532_s19] sm:$0xff]  ;;  %v5999_v17 = vpack.c.bf16 %v1389_v15, %v1388_v14  ;;  %v1212_v18 = vld [vmem:[%s6532_s19 + $0x8] sm:$0xff]  ;;  %v1391_v20 = vld [vmem:[%s6542_s30 + $0x18] sm:$0xff]  ;;  %vm1730_vm2 = vcmask 130048   ;;  %s7387_s7 = sld [smem:[#allocation11_spill]]  ;;  %s7388_s10 = sld [smem:[#allocation9_spill]] }
  0x58   : > { %s7417_s1 = smov (!%p1119_p3, %s5014_s1), 1  ;;  %v5983_v21 = vpack.c.bf16 %v1212_v18, %v1211_v16  ;;  %v6003_v22 = vpack.c.bf16 %v1391_v20, %v1390_v19  ;;  %v1213_v23 = vld [vmem:[%s6532_s19 + $0x10] sm:$0xff]  ;;  %v1214_v24 = vld [vmem:[%s6532_s19 + $0x18] sm:$0xff]  ;;  %v1559_v26 = vld [vmem:[%s6552_s12] sm:$0xff]  ;;  %s7389_s11 = sld [smem:[#allocation10_spill]]  ;;  %vm6472_vm3 = vmmov 0  }
  0x59   : > { %7384 = sst [smem:[#allocation28_spill]] %s7417_s1  ;;  %s7345_s0 = sshll.u32 %s7417_s1, 4  ;;  %6000 = vmatprep.subr.bf16.mxu0 %v5999_v17  ;;  %v5987_v25 = vpack.c.bf16 %v1214_v24, %v1213_v23  ;;  %v1560_v27 = vld [vmem:[%s6552_s12 + $0x8] sm:$0xff]  ;;  %v1139_v29 = vld [vmem:[%s7381_s3] sm:$0xff]  ;;  %v1561_v46 = vld [vmem:[%s6552_s12 + $0x10] sm:$0xff]  ;;  %vm2156_vm4 = vcmask 523264  }
  0x5a   : > { %5984 = vmatprep.subr.bf16.mxu1 %v5983_v21  ;;  %6002 = vmatpush3.bf16.msra.mxu0 %v5999_v17  ;;  %v6015_v28 = vpack.c.bf16 %v1560_v27, %v1559_v26  ;;  %v1140_v30 = vld [vmem:[%s7381_s3 + $0x8] sm:$0xff]  ;;  %v5025_v39 = vld [vmem:[%s6522_s8] ss:$0 sm:$0xff]  ;;  %v1562_v47 = vld [vmem:[%s6552_s12 + $0x18] sm:$0xff]  ;;  %s7390_s15 = sld [smem:[#allocation13_spill]]  ;;  %s7391_s16 = sld [smem:[#allocation3_spill]] }
  0x5b   : > { %5986 = vmatpush3.bf16.msra.mxu1 %v5983_v21  ;;  %6004 = vmatprep.subr.bf16.mxu0 %v6003_v22  ;;  %v6702_v31 = vpack.c.bf16 %v1140_v30, %v1139_v29  ;;  %v5026_v41 = vld [vmem:[%s6527_s14] ss:$0 sm:$0xff]  ;;  %v6019_v50 = vpack.c.bf16 %v1562_v47, %v1561_v46  ;;  %v1141_v51 = vld [vmem:[%s7381_s3 + $0x10] sm:$0xff]  ;;  %v1142_v52 = vld [vmem:[%s7381_s3 + $0x18] sm:$0xff]  ;;  %s6295_s18 = smul.u32 40, %s7417_s1  ;;  %s7392_s23 = sld [smem:[#allocation12_spill]] }
  0x5c   : > { %s1123_s2 = scalar_lea.vmem %s7383_s5, %s7345_s0  ;;  %5988 = vmatprep.subr.bf16.mxu1 %v5987_v25  ;;  %v6718_v53 = vpack.c.bf16 %v1142_v52, %v1141_v51  ;;  %v5027_v54 = vld [vmem:[%s6537_s24] ss:$0 sm:$0xff]  ;;  %vm6756_vm1 = vmpackc.low %vm1171_vm0, %vm1171_vm0  ;;  %v1835_v46 = vld [vmem:[%s6562_s27 + $0x8] sm:$0xff]  ;;  %s7393_s26 = sld [smem:[#allocation14_spill]]  ;;  %vm2596_vm5 = vcmask 293888   ;;  %vm2621_vm6 = vcmask 1043456  }
  0x5d   : > { %v6678_v0 = vld [vmem:[%s1123_s2] sm:$0xff]  ;;  %v6680_v1 = vld [vmem:[%s1123_s2 + $0x8] sm:$0xff]  ;;  %s7394_s2 = sld [smem:[#allocation15_spill]]  ;;  %s7398_s3 = sld [smem:[#allocation16_spill]] }
  0x5e   : > { %v1172_v2 = vsel %vm1171_vm0, %v6678_v0, 0.0  ;;  %v1175_v3 = vsel %vm1171_vm0, %v6680_v1, 0.0  ;;  %6006 = vmatpush3.bf16.msra.mxu0 %v6003_v22  ;;  %v5032_v57 = vld [vmem:[%s6547_s6] ss:$0 sm:$0xff]  ;;  %s7399_s5 = sld [smem:[#allocation17_spill]]  ;;  %s7400_s28 = sld [smem:[#allocation18_spill]] }
  0x5f   : > { %1173 = vadd.xlane.f32.xlu0 %v1172_v2  ;;  %5990 = vmatpush3.bf16.msra.mxu1 %v5987_v25  ;;  %v5037_v63 = vld [vmem:[%s6557_s20] ss:$0 sm:$0xff]  ;;  %s7401_s1 = sld [smem:[#allocation21_spill]]  ;;  %s7404_s29 = sld [smem:[#allocation19_spill]] }
  0x60   : > { %6016 = vmatprep.subr.bf16.mxu0 %v6015_v28  ;;  %5992 = vmatprep.subr.bf16.mxu1 %v6702_v31  ;;  %s6822_s22 = scalar_lea.vmem %s7391_s16, %s6295_s18  ;;  %s7395_s16 = sld [smem:[#allocation4_spill]] }
  0x61   : > { %s7405_s13 = sld [smem:[#allocation20_spill]] }
  0x63   : > { %1176 = vadd.xlane.f32.xlu0 %v1175_v3 }
  0x66   : > { %s6902_s0 = scalar_lea.vmem %s7395_s16, %s6295_s18  ;;  %s7396_s18 = sld [smem:[#allocation5_spill]] }
  0x67   : > { %s7397_s16 = sld [smem:[#allocation6_spill]] }
  0xec   : > { %v1174_v4 = vpop.xlane.xlu0 %1173 }
  0xed   : > { %v1179_v5 = vmul.f32 0.03125, %v1174_v4 }
  0xef   : > { %v1181_v6 = vsub.f32 %v6678_v0, %v1179_v5 }
  0xf0   : > { %v1177_v7 = vpop.xlane.xlu0 %1176 }
  0xf1   : > { %v1180_v8 = vmul.f32 0.03125, %v1177_v7  ;;  %v1183_v9 = vmul.f32 %v1181_v6, %v1181_v6 }
  0xf3   : > { %v1182_v10 = vsub.f32 %v6680_v1, %v1180_v8  ;;  %v1185_v11 = vsel %vm1171_vm0, %v1183_v9, 0.0  ;;  %v6734_v8 = vld [vmem:[%s6497_s17 + $0x8] sm:$0xff] }
  0xf4   : > { %1186 = vadd.xlane.f32.xlu1 %v1185_v11  ;;  %v6737_v9 = vld [vmem:[%s6502_s21 + $0x8] sm:$0xff]  ;;  %v6743_v11 = vld [vmem:[%s6502_s21] sm:$0xff] }
  0xf5   : > { %v1184_v12 = vmul.f32 %v1182_v10, %v1182_v10 }
  0xf7   : > { %v1188_v13 = vsel %vm1171_vm0, %v1184_v12, 0.0 }
  0xf8   : > { %1189 = vadd.xlane.f32.xlu1 %v1188_v13 }
 0x181   : > { %v1187_v32 = vpop.xlane.xlu1 %1186 }
 0x182   : > { %v1191_v33 = vmul.f32 0.03125, %v1187_v32 }
 0x184   : > { %v1193_v34 = vadd.f32 1e-05, %v1191_v33 }
 0x185   : > { %v1190_v35 = vpop.xlane.xlu1 %1189 }
 0x186   : > { %6343 = vrsqrt.f32 %v1193_v34  ;;  %v1192_v36 = vmul.f32 0.03125, %v1190_v35 }
 0x188   : > { %v1194_v37 = vadd.f32 1e-05, %v1192_v36 }
 0x18a   : > { %6345 = vrsqrt.f32 %v1194_v37 }
 0x190   : > { %v6344_v38 = vpop.eup %6343 }
 0x191   : > { %v1197_v40 = vmul.f32 %v6344_v38, %v1181_v6 }
 0x193   : > { %v1203_v42 = vmul.f32 %v5025_v39, %v1197_v40 }
 0x194   : > { %v6346_v43 = vpop.eup %6345 }
 0x195   : > { %v1198_v44 = vmul.f32 %v6346_v43, %v1182_v10  ;;  %v1209_v45 = vadd.f32 %v5026_v41, %v1203_v42  ;;  %v6740_v10 = vld [vmem:[%s6497_s17] sm:$0xff] }
 0x197   : > { %v1204_v48 = vmul.f32 %v5025_v39, %v1198_v44  ;;  %5483 = vmatprep.mubr.msk.f32.mxu1 %vm1171_vm0, %v1209_v45  ;;  %5505 = vmatprep.mubr.msk.f32.mxu0 %vm1171_vm0, %v1209_v45 }
 0x199   : > { %v1210_v49 = vadd.f32 %v5026_v41, %v1204_v48  ;;  %v1836_v48 = vld [vmem:[%s6562_s27 + $0x10] sm:$0xff] }
 0x19b   : > { %5484 = vmatmul.mubr.msk.f32.vlgmr.msra.gmra.mrb[0].mxu1 %vm1171_vm0, %v1210_v49  ;;  %5506 = vmatmul.mubr.msk.f32.vlgmr.msra.gmra.mrb[0].mxu0 %vm1171_vm0, %v1210_v49 }
 0x19c   : > { %6018 = vmatpush3.bf16.msra.mxu0 %v6015_v28  ;;  %5527 = vmatprep.mubr.msk.f32.mxu0 %vm1171_vm0, %v1209_v45  ;;  %v1834_v45 = vld [vmem:[%s6562_s27] sm:$0xff] }
 0x19d   : > { %6020 = vmatprep.subr.bf16.mxu0 %v6019_v50  ;;  %5994 = vmatpush3.bf16.msra.mxu1 %v6702_v31  ;;  %v6033_v47 = vpack.c.bf16 %v1835_v46, %v1834_v45 }
 0x19e   : > { %5996 = vmatprep.subr.bf16.mxu1 %v6718_v53 }
 0x1a0   : > { %6022 = vmatpush3.bf16.msra.mxu0 %v6019_v50 }
 0x1a1   : > { %5998 = vmatpush3.bf16.msra.mxu1 %v6718_v53 }
 0x1a2   : > { %6008 = vmatprep.subr.bf16.mxu1 %v6702_v31 }
 0x1a3   : > { %5528 = vmatmul.mubr.msk.f32.vlgmr.msra.gmra.mrb[2].mxu0 %vm1171_vm0, %v1210_v49  ;;  %v1837_v49 = vld [vmem:[%s6562_s27 + $0x18] sm:$0xff] }
 0x1a4   : > { %v6037_v50 = vpack.c.bf16 %v1837_v49, %v1836_v48  ;;  %v2146_v48 = vld [vmem:[%s7390_s15 + $0x18] sm:$0xff] }
 0x26e   : > { %v5485_v55 = vpop.f32.mrb[0].mxu1  ;;  %v5507_v56 = vpop.f32.mrb[0].mxu0 }
 0x26f   : > { %v1292_v58 = vpop.f32.mrb[1].mxu1  ;;  %v1463_v59 = vpop.f32.mrb[1].mxu0  ;;  %v1298_v61 = vadd.f32 %v5485_v55, %v5027_v54  ;;  %v1469_v6 = vadd.f32 %v5507_v56, %v5032_v57 }
 0x270   : > { %v1293_v60 = vadd.f32 %v5027_v54, %v1292_v58  ;;  %v1464_v62 = vadd.f32 %v5032_v57, %v1463_v59 }
 0x271   : > { %v1383_v13 = vmul.f32 %v1298_v61, %v6734_v8  ;;  %v1554_v21 = vmul.f32 %v1469_v6, %v6734_v8 }
 0x272   : > { %5494 = vmatprep.mubr.msk.f32.mxu1 %vm1171_vm0, %v1293_v60  ;;  %v1382_v16 = vmul.f32 %v1293_v60, %v6740_v10  ;;  %v1553_v24 = vmul.f32 %v1464_v62, %v6740_v10  ;;  %v5046_v60 = vld [vmem:[%s7380_s4] ss:$0 sm:$0xff] }
 0x273   : > { %5495 = vmatmul.mubr.msk.f32.vlgmr.msra.gmra.mrb[2].mxu1 %vm1171_vm0, %v1298_v61 }
 0x274   : > { %6010 = vmatpush3.bf16.msra.mxu1 %v6702_v31  ;;  %5516 = vmatprep.mubr.msk.f32.mxu1 %vm1171_vm0, %v1464_v62 }
 0x275   : > { %6012 = vmatprep.subr.bf16.mxu1 %v6718_v53 }
 0x276   : > { %v5529_v2 = vpop.f32.mrb[2].mxu0 }
 0x277   : > { %v1640_v3 = vadd.f32 %v5529_v2, %v5037_v63  ;;  %v1634_v4 = vpop.f32.mrb[3].mxu0 }
 0x278   : > { %v1635_v5 = vadd.f32 %v5037_v63, %v1634_v4  ;;  %6014 = vmatpush3.bf16.msra.mxu1 %v6718_v53 }
 0x27a   : > { %v6029_v7 = vpack.c.bf16 %v1640_v3, %v1635_v5 }
 0x27b   : > { %5517 = vmatmul.mubr.msk.f32.vlgmr.msra.gmra.mrb[4].mxu1 %vm1171_vm0, %v1469_v6 }
 0x27c   : > { %6030 = vmatprep.subr.bf16.mxu0 %v6029_v7 }
 0x27d   : > { %6032 = vmatpush3.bf16.msra.mxu0 %v6029_v7 }
 0x346   : > { %v5496_v12 = vpop.f32.mrb[2].mxu1 }
 0x347   : > { %v1385_v14 = vmul.f32 %v5496_v12, %v6737_v9  ;;  %v1373_v15 = vpop.f32.mrb[3].mxu1 }
 0x348   : > { %v1384_v17 = vmul.f32 %v1373_v15, %v6743_v11 }
 0x349   : > { %v1387_v18 = vadd.f32 %v1385_v14, %v1383_v13 }
 0x34a   : > { %v1386_v19 = vadd.f32 %v1384_v17, %v1382_v16 }
 0x34c   : > { %5534 = vmatprep.mubr.msk.f32.mxu1 %vm1171_vm0, %v1386_v19  ;;  %v1966_v19 = vld [vmem:[%s7387_s7] sm:$0xff] }
 0x34e   : > { %v5518_v20 = vpop.f32.mrb[4].mxu1 }
 0x34f   : > { %v1556_v22 = vmul.f32 %v5518_v20, %v6737_v9  ;;  %v1544_v23 = vpop.f32.mrb[5].mxu1  ;;  %v1967_v20 = vld [vmem:[%s7387_s7 + $0x8] sm:$0xff] }
 0x350   : > { %v1555_v25 = vmul.f32 %v1544_v23, %v6743_v11  ;;  %v1969_v23 = vld [vmem:[%s7387_s7 + $0x18] sm:$0xff] }
 0x351   : > { %v1558_v26 = vadd.f32 %v1556_v22, %v1554_v21  ;;  %v6041_v21 = vpack.c.bf16 %v1967_v20, %v1966_v19  ;;  %v1968_v22 = vld [vmem:[%s7387_s7 + $0x10] sm:$0xff] }
 0x352   : > { %v1557_v27 = vadd.f32 %v1555_v25, %v1553_v24  ;;  %v6045_v24 = vpack.c.bf16 %v1969_v23, %v1968_v22  ;;  %v6471_v25 = vmov 0.0|0.0  }
 0x353   : > { %6042 = vmatprep.subr.bf16.mxu0 %v6041_v21 }
 0x354   : > { %v6023_v29 = vpack.c.bf16 %v1558_v26, %v1557_v27 }
 0x356   : > { %6025 = vmatprep.subr.msk.bf16.mxu1 %vm6756_vm1, %v6023_v29 }
 0x357   : > { %6028 = vmatpush3.bf16.xpose.msk.msra.mxu1 %vm6756_vm1, %v6023_v29 }
 0x358   : > { %6034 = vmatprep.subr.bf16.mxu1 %v6033_v47 }
 0x35e   : > { %5535 = vmatmul.mubr.msk.f32.vlgmr.msra.gmra.mrb[6].mxu1 %vm1171_vm0, %v1387_v18 }
 0x35f   : > { %6036 = vmatpush3.bf16.msra.mxu1 %v6033_v47  ;;  %v2145_v47 = vld [vmem:[%s7390_s15 + $0x10] sm:$0xff] }
 0x360   : > { %6038 = vmatprep.subr.bf16.mxu1 %v6037_v50  ;;  %v6061_v49 = vpack.c.bf16 %v2146_v48, %v2145_v47 }
 0x363   : > { %6040 = vmatpush3.bf16.msra.mxu1 %v6037_v50  ;;  %v6473_v50 = vmov 0.0  }
 0x364   : > { %6050 = vmatprep.subr.bf16.mxu1 %v6702_v31 }
 0x431   : > { %v5536_v30 = vpop.f32.mrb[6].mxu1 }
 0x432   : > { %v1721_v32 = vpop.f32.mrb[7].mxu1  ;;  %v1734_v33 = vsel %vm1730_vm2, %v5536_v30, -inf }
 0x433   : > { %1735 = vmax.xlane.f32.xlu1 %v1734_v33  ;;  %v1731_v34 = vsel %vm1730_vm2, %v1721_v32, -inf }
 0x434   : > { %1732 = vmax.xlane.f32.xlu0 %v1731_v34 }
 0x4c0   : > { %v1736_v35 = vpop.xlane.xlu1 %1735 }
 0x4c1   : > { %v1738_v36 = vsub.f32 %v5536_v30, %v1736_v35  ;;  %v1733_v37 = vpop.xlane.xlu0 %1732  ;;  %v5049_v35 = vld [vmem:[%s7388_s10] ss:$0 sm:$0xff] }
 0x4c2   : > { %v1737_v38 = vsub.f32 %v1721_v32, %v1733_v37 }
 0x4c3   : > { %v1741_v39 = vmul.f32 1.442695, %v1738_v36 }
 0x4c4   : > { %v1739_v40 = vmul.f32 1.442695, %v1737_v38 }
 0x4c5   : > { %6347 = vpow2.f32 %v1741_v39  ;;  %v5050_v39 = vld [vmem:[%s7389_s11] ss:$0 sm:$0xff] }
 0x4c6   : > { %6349 = vpow2.f32 %v1739_v40 }
 0x4cf   : > { %v6348_v41 = vpop.eup %6347 }
 0x4d0   : > { %v6350_v42 = vpop.eup %6349  ;;  %v1746_v43 = vsel %vm1730_vm2, %v6348_v41, 0.0 }
 0x4d1   : > { %1747 = vadd.xlane.f32.xlu1 %v1746_v43  ;;  %5541 = vmatprep.mubr.msk.f32.mxu0 %vm1730_vm2, %v6350_v42  ;;  %v1743_v44 = vsel %vm1730_vm2, %v6350_v42, 0.0  ;;  %v2144_v42 = vld [vmem:[%s7390_s15 + $0x8] sm:$0xff] }
 0x4d2   : > { %5542 = vmatmul.mubr.msk.f32.vlgmr.msra.gmra.mrb[4].mxu0 %vm1730_vm2, %v6348_v41  ;;  %1744 = vadd.xlane.f32.xlu0 %v1743_v44  ;;  %v2143_v41 = vld [vmem:[%s7390_s15] sm:$0xff] }
 0x4d3   : > { %6044 = vmatpush3.bf16.msra.mxu0 %v6041_v21  ;;  %v6058_v45 = vpack.c.bf16 %v2144_v42, %v2143_v41  ;;  %v1164_v41 = vld [vmem:[%s6902_s0] sm:$0xff]  ;;  %v1165_v42 = vld [vmem:[%s6902_s0 + $0x8] sm:$0xff] }
 0x4d4   : > { %6046 = vmatprep.subr.bf16.mxu0 %v6045_v24 }
 0x4d7   : > { %6048 = vmatpush3.bf16.msra.mxu0 %v6045_v24 }
 0x4d8   : > { %6057 = vmatprep.subr.bf16.mxu0 %v6471_v25 }
 0x55e   : > { %v1748_v52 = vpop.xlane.xlu1 %1747 }
 0x55f   : > { %v1745_v51 = vpop.xlane.xlu0 %1744 }
 0x560   : > { %6351 = vrcp.f32 %v1745_v51  ;;  %v2147_v51 = vld [vmem:[%s7390_s15 + $0x20] sm:$0xff] }
 0x561   : > { %6353 = vrcp.f32 %v1748_v52  ;;  %v2148_v52 = vld [vmem:[%s7390_s15 + $0x28] sm:$0xff] }
 0x56a   : > { %v6352_v55 = vpop.eup %6351 }
 0x56b   : > { %v6354_v57 = vpop.eup %6353 }
 0x5a5   : > { %v5543_v54 = vpop.f32.mrb[4].mxu0 }
 0x5a6   : > { %v1821_v56 = vpop.f32.mrb[5].mxu0  ;;  %v1833_v59 = vmul.f32 %v6354_v57, %v5543_v54  ;;  %v6064_v54 = vpack.c.bf16 %v2148_v52, %v2147_v51 }
 0x5a7   : > { %v1832_v58 = vmul.f32 %v6352_v55, %v1821_v56  ;;  %v2149_v55 = vld [vmem:[%s7390_s15 + $0x30] sm:$0xff]  ;;  %v2150_v56 = vld [vmem:[%s7390_s15 + $0x38] sm:$0xff] }
 0x5a8   : > { %v6067_v57 = vpack.c.bf16 %v2150_v56, %v2149_v55  ;;  %v1147_v56 = vld [vmem:[%s7396_s18] sm:$0xff] }
 0x5a9   : > { %5552 = vmatprep.mubr.msk.f32.mxu1 %vm1171_vm0, %v1832_v58  ;;  %v1159_v58 = vld [vmem:[%s6822_s22] sm:$0xff] }
 0x5aa   : > { %5553 = vmatmul.mubr.msk.f32.vlgmr.msra.gmra.mrb[8].mxu1 %vm1171_vm0, %v1833_v59  ;;  %v1160_v59 = vld [vmem:[%s6822_s22 + $0x8] sm:$0xff] }
 0x5ab   : > { %6052 = vmatpush3.bf16.msra.mxu1 %v6702_v31 }
 0x5ac   : > { %6054 = vmatprep.subr.bf16.mxu1 %v6718_v53 }
 0x5af   : > { %6056 = vmatpush3.bf16.msra.mxu1 %v6718_v53 }
 0x5b0   : > { %6069 = vmatprep.subr.bf16.mxu1 %v6471_v25 }
 0x67d   : > { %v5554_v61 = vpop.f32.mrb[8].mxu1 }
 0x67e   : > { %v1921_v62 = vadd.f32 %v5554_v61, %v5046_v60  ;;  %v1915_v63 = vpop.f32.mrb[9].mxu1  ;;  %v1162_v61 = vld [vmem:[%s6822_s22 + $0x18] sm:$0xff] }
 0x67f   : > { %v1916_v2 = vadd.f32 %v5046_v60, %v1915_v63  ;;  %v1161_v60 = vld [vmem:[%s6822_s22 + $0x10] sm:$0xff]  ;;  %v5051_v63 = vld [vmem:[%s7392_s23] ss:$0 sm:$0xff] }
 0x680   : > { %v6783_v3 = vadd.f32 %v1921_v62, %v6680_v1  ;;  %v1163_v62 = vld [vmem:[%s6822_s22 + $0x20] sm:$0xf] }
 0x681   : > { %v6786_v4 = vadd.f32 %v1916_v2, %v6678_v0 }
 0x682   : > { %v1931_v5 = vsel %vm1171_vm0, %v6783_v3, 0.0 }
 0x683   : > { %1932 = vadd.xlane.f32.xlu1 %v1931_v5  ;;  %v1928_v6 = vsel %vm1171_vm0, %v6786_v4, 0.0 }
 0x684   : > { %1929 = vadd.xlane.f32.xlu0 %v1928_v6 }
 0x710   : > { %v1933_v7 = vpop.xlane.xlu1 %1932 }
 0x711   : > { %v1935_v12 = vmul.f32 0.03125, %v1933_v7  ;;  %v1930_v13 = vpop.xlane.xlu0 %1929 }
 0x712   : > { %v1934_v1 = vmul.f32 0.03125, %v1930_v13 }
 0x713   : > { %v1937_v14 = vsub.f32 %v6783_v3, %v1935_v12  ;;  %v5056_v12 = vld [vmem:[%s7393_s26] ss:$0 sm:$0xff] }
 0x714   : > { %v1936_v0 = vsub.f32 %v6786_v4, %v1934_v1 }
 0x715   : > { %v1939_v15 = vmul.f32 %v1937_v14, %v1937_v14 }
 0x716   : > { %v1938_v16 = vmul.f32 %v1936_v0, %v1936_v0 }
 0x717   : > { %v1943_v17 = vsel %vm1171_vm0, %v1939_v15, 0.0 }
 0x718   : > { %1944 = vadd.xlane.f32.xlu1 %v1943_v17  ;;  %v1940_v18 = vsel %vm1171_vm0, %v1938_v16, 0.0 }
 0x719   : > { %1941 = vadd.xlane.f32.xlu0 %v1940_v18 }
 0x7a5   : > { %v1945_v26 = vpop.xlane.xlu1 %1944 }
 0x7a6   : > { %v1947_v27 = vmul.f32 0.03125, %v1945_v26  ;;  %v1942_v29 = vpop.xlane.xlu0 %1941 }
 0x7a7   : > { %v1946_v30 = vmul.f32 0.03125, %v1942_v29  ;;  %v2383_v29 = vld [vmem:[%s7394_s2 + $0x8] sm:$0xff] }
 0x7a8   : > { %v1949_v32 = vadd.f32 1e-05, %v1947_v27  ;;  %v2382_v27 = vld [vmem:[%s7394_s2] sm:$0xff] }
 0x7a9   : > { %v1948_v33 = vadd.f32 1e-05, %v1946_v30  ;;  %v2384_v30 = vld [vmem:[%s7394_s2 + $0x10] sm:$0xff] }
 0x7aa   : > { %6355 = vrsqrt.f32 %v1949_v32  ;;  %v6076_v32 = vpack.c.bf16 %v2383_v29, %v2382_v27 }
 0x7ab   : > { %6357 = vrsqrt.f32 %v1948_v33  ;;  %v2385_v33 = vld [vmem:[%s7394_s2 + $0x18] sm:$0xff] }
 0x7b4   : > { %v6356_v34 = vpop.eup %6355 }
 0x7b5   : > { %v6358_v36 = vpop.eup %6357  ;;  %v1953_v37 = vmul.f32 %v6356_v34, %v1937_v14  ;;  %v6079_v34 = vpack.c.bf16 %v2385_v33, %v2384_v30 }
 0x7b6   : > { %v1952_v38 = vmul.f32 %v6358_v36, %v1936_v0  ;;  %v2387_v36 = vld [vmem:[%s7394_s2 + $0x28] sm:$0xff] }
 0x7b7   : > { %v1959_v40 = vmul.f32 %v5049_v35, %v1953_v37 }
 0x7b8   : > { %v1958_v43 = vmul.f32 %v5049_v35, %v1952_v38  ;;  %v2386_v35 = vld [vmem:[%s7394_s2 + $0x20] sm:$0xff]  ;;  %v2388_v38 = vld [vmem:[%s7394_s2 + $0x30] sm:$0xff] }
 0x7b9   : > { %v1965_v46 = vadd.f32 %v5050_v39, %v1959_v40  ;;  %v6082_v37 = vpack.c.bf16 %v2387_v36, %v2386_v35 }
 0x7ba   : > { %v1964_v44 = vadd.f32 %v5050_v39, %v1958_v43  ;;  %v2389_v39 = vld [vmem:[%s7394_s2 + $0x38] sm:$0xff]  ;;  %v1166_v43 = vld [vmem:[%s6902_s0 + $0x10] sm:$0xff] }
 0x7bb   : > { %v6085_v40 = vpack.c.bf16 %v2389_v39, %v2388_v38 }
 0x7bc   : > { %5563 = vmatprep.mubr.msk.f32.mxu0 %vm1171_vm0, %v1964_v44  ;;  %v1167_v44 = vld [vmem:[%s6902_s0 + $0x18] sm:$0xff] }
 0x7bd   : > { %5564 = vmatmul.mubr.msk.f32.vlgmr.msra.gmra.mrb[6].mxu0 %vm1171_vm0, %v1965_v46 }
 0x7be   : > { %6059 = vmatpush3.bf16.msra.mxu0 %v6058_v45  ;;  %5593 = vmatprep.mubr.msk.f32.mxu0 %vm6472_vm3, %v6473_v50  ;;  %v1168_v45 = vld [vmem:[%s6902_s0 + $0x20] sm:$0xf] }
 0x7bf   : > { %6060 = vmatprep.subr.bf16.mxu0 %v6471_v25 }
 0x7c2   : > { %6062 = vmatpush3.bf16.msra.mxu0 %v6061_v49 }
 0x7c3   : > { %6063 = vmatprep.subr.bf16.mxu0 %v6471_v25 }
 0x7c6   : > { %6065 = vmatpush3.bf16.msra.mxu0 %v6064_v54 }
 0x7c7   : > { %6066 = vmatprep.subr.bf16.mxu0 %v6471_v25 }
 0x7ca   : > { %6068 = vmatpush3.bf16.msra.mxu0 %v6067_v57  ;;  %v1152_v57 = vld [vmem:[%s7397_s16] sm:$0xff] }
 0x7cd   : > { %5594 = vmatmul.mubr.msk.f32.vlgmr.msra.gmra.mrb[8].mxu0 %vm2156_vm4, %v1159_v58 }
 0x7ce   : > { %5596 = vmatprep.mubr.msk.f32.mxu0 %vm6472_vm3, %v6473_v50 }
 0x7d1   : > { %5597 = vmatmul.mubr.msk.f32.gmra.mrb[10].mxu0 %vm2156_vm4, %v1160_v59 }
 0x7d2   : > { %5599 = vmatprep.mubr.msk.f32.mxu0 %vm6472_vm3, %v6473_v50 }
 0x7d5   : > { %5600 = vmatmul.mubr.msk.f32.gmra.mrb[12].mxu0 %vm2156_vm4, %v1161_v60 }
 0x7d6   : > { %5602 = vmatprep.mubr.msk.f32.mxu0 %vm6472_vm3, %v6473_v50 }
 0x7d9   : > { %5603 = vmatmul.mubr.msk.f32.gmra.mrb[14].mxu0 %vm2156_vm4, %v1162_v61  ;;  %v1153_v61 = vld [vmem:[%s7397_s16 + $0x8] sm:$0xff] }
 0x7da   : > { %5605 = vmatprep.mubr.msk.f32.mxu0 %vm6472_vm3, %v6473_v50 }
 0x7dd   : > { %5606 = vmatmul.mubr.msk.f32.gmra.mrb[16].mxu0 %vm2156_vm4, %v1163_v62 }
 0x890   : > { %v5565_v2 = vpop.f32.mrb[6].mxu0 }
 0x891   : > { %v2047_v5 = vpop.f32.mrb[7].mxu0  ;;  %v6846_v7 = vadd.f32 %v5565_v2, %v5051_v63 }
 0x892   : > { %v6844_v6 = vadd.f32 %v5051_v63, %v2047_v5  ;;  %v1149_v5 = vld [vmem:[%s7396_s18 + $0x10] sm:$0xff] }
 0x893   : > { %v2138_v47 = vmul.f32 %v6846_v7, %v6734_v8 }
 0x894   : > { %5574 = vmatprep.mubr.msk.f32.mxu1 %vm1171_vm0, %v6844_v6  ;;  %v2137_v51 = vmul.f32 %v6844_v6, %v6740_v10  ;;  %v1154_v6 = vld [vmem:[%s7397_s16 + $0x10] sm:$0xff] }
 0x895   : > { %5575 = vmatmul.mubr.msk.f32.vlgmr.msra.gmra.mrb[10].mxu1 %vm1171_vm0, %v6846_v7 }
 0x896   : > { %6071 = vmatpush3.bf16.msra.mxu1 %v6702_v31  ;;  %5616 = vmatprep.mubr.msk.f32.mxu1 %vm6472_vm3, %v6473_v50 }
 0x897   : > { %6072 = vmatprep.subr.bf16.mxu1 %v6471_v25 }
 0x89a   : > { %6074 = vmatpush3.bf16.msra.mxu1 %v6718_v53 }
 0x89b   : > { %6075 = vmatprep.subr.bf16.mxu1 %v6471_v25 }
 0x8a0   : > { %v2238_v13 = vpop.f32.mrb[8].mxu0 }
 0x8a1   : > { %v6859_v1 = vadd.f32 %v5056_v12, %v2238_v13  ;;  %v5595_v14 = vpop.f32.mrb[9].mxu0 }
 0x8a3   : > { %5617 = vmatmul.mubr.msk.f32.vlgmr.msra.gmra.mrb[12].mxu1 %vm1171_vm0, %v6859_v1  ;;  %v2367_v59 = vmul.f32 %v6859_v1, %v1147_v56 }
 0x8a4   : > { %v2243_v0 = vpop.f32.mrb[10].mxu0  ;;  %5619 = vmatprep.mubr.msk.f32.mxu1 %vm6472_vm3, %v6473_v50  ;;  %6077 = vmatpush3.bf16.msra.mxu1 %v6076_v32 }
 0x8a5   : > { %v6865_v15 = vadd.f32 %v5056_v12, %v2243_v0  ;;  %v5598_v16 = vpop.f32.mrb[11].mxu0  ;;  %6078 = vmatprep.subr.bf16.mxu1 %v6471_v25 }
 0x8a6   : > { %v1150_v16 = vld [vmem:[%s7396_s18 + $0x18] sm:$0xff] }
 0x8a7   : > { %5620 = vmatmul.mubr.msk.f32.gmra.mrb[14].mxu1 %vm1171_vm0, %v6865_v15 }
 0x8a8   : > { %v2248_v17 = vpop.f32.mrb[12].mxu0  ;;  %5622 = vmatprep.mubr.msk.f32.mxu1 %vm6472_vm3, %v6473_v50  ;;  %6080 = vmatpush3.bf16.msra.mxu1 %v6079_v34 }
 0x8a9   : > { %v6871_v18 = vadd.f32 %v5056_v12, %v2248_v17  ;;  %v5601_v19 = vpop.f32.mrb[13].mxu0  ;;  %6081 = vmatprep.subr.bf16.mxu1 %v6471_v25  ;;  %v1155_v17 = vld [vmem:[%s7397_s16 + $0x18] sm:$0xff] }
 0x8ab   : > { %5623 = vmatmul.mubr.msk.f32.gmra.mrb[16].mxu1 %vm1171_vm0, %v6871_v18  ;;  %v2369_v13 = vmul.f32 %v6871_v18, %v1149_v5  ;;  %v1156_v18 = vld [vmem:[%s7397_s16 + $0x20] sm:$0xf]  ;;  %v2705_v5 = vld [vmem:[%s7399_s5 + $0x8] sm:$0xff] }
 0x8ac   : > { %v2253_v20 = vpop.f32.mrb[14].mxu0  ;;  %5625 = vmatprep.mubr.msk.f32.mxu1 %vm6472_vm3, %v6473_v50  ;;  %6083 = vmatpush3.bf16.msra.mxu1 %v6082_v37 }
 0x8ad   : > { %v6877_v21 = vadd.f32 %v5056_v12, %v2253_v20  ;;  %v5604_v22 = vpop.f32.mrb[15].mxu0  ;;  %6084 = vmatprep.subr.bf16.mxu1 %v6471_v25 }
 0x8af   : > { %5626 = vmatmul.mubr.msk.f32.gmra.mrb[18].mxu1 %vm1171_vm0, %v6877_v21  ;;  %v2370_v20 = vmul.f32 %v6877_v21, %v1150_v16  ;;  %v5067_v21 = vld [vmem:[%s7398_s3] ss:$0 sm:$0xff] }
 0x8b0   : > { %v2258_v23 = vpop.f32.mrb[16].mxu0  ;;  %5628 = vmatprep.mubr.msk.f32.mxu1 %vm6472_vm3, %v6473_v50  ;;  %6086 = vmatpush3.bf16.msra.mxu1 %v6085_v40 }
 0x8b1   : > { %v6883_v24 = vadd.f32 %v5056_v12, %v2258_v23  ;;  %v5607_v26 = vpop.f32.mrb[17].mxu0 }
 0x8b2   : > { %v1151_v26 = vld [vmem:[%s7396_s18 + $0x20] sm:$0xf] }
 0x8b3   : > { %5629 = vmatmul.mubr.msk.f32.gmra.mrb[20].mxu1 %vm1171_vm0, %v6883_v24  ;;  %v2371_v30 = vmul.f32 %v6883_v24, %v1151_v26 }
 0x8b4   : > { %5647 = vmatprep.mubr.msk.f32.mxu1 %vm6472_vm3, %v6473_v50 }
 0x8b7   : > { %5648 = vmatmul.mubr.msk.f32.vlgmr.msra.gmra.mrb[22].mxu1 %vm2156_vm4, %v1164_v41 }
 0x8b8   : > { %5650 = vmatprep.mubr.msk.f32.mxu1 %vm6472_vm3, %v6473_v50 }
 0x8bb   : > { %5651 = vmatmul.mubr.msk.f32.gmra.mrb[24].mxu1 %vm2156_vm4, %v1165_v42 }
 0x8bc   : > { %5653 = vmatprep.mubr.msk.f32.mxu1 %vm6472_vm3, %v6473_v50 }
 0x8bf   : > { %5654 = vmatmul.mubr.msk.f32.gmra.mrb[26].mxu1 %vm2156_vm4, %v1166_v43 }
 0x8c0   : > { %5656 = vmatprep.mubr.msk.f32.mxu1 %vm6472_vm3, %v6473_v50 }
 0x8c3   : > { %5657 = vmatmul.mubr.msk.f32.gmra.mrb[28].mxu1 %vm2156_vm4, %v1167_v44 }
 0x8c4   : > { %5659 = vmatprep.mubr.msk.f32.mxu1 %vm6472_vm3, %v6473_v50 }
 0x8c7   : > { %5660 = vmatmul.mubr.msk.f32.gmra.mrb[30].mxu1 %vm2156_vm4, %v1168_v45 }
 0x968   : > { %v5576_v46 = vpop.f32.mrb[10].mxu1 }
 0x969   : > { %v2140_v48 = vmul.f32 %v5576_v46, %v6737_v9  ;;  %v2128_v49 = vpop.f32.mrb[11].mxu1  ;;  %v1148_v9 = vld [vmem:[%s7396_s18 + $0x8] sm:$0xff] }
 0x96a   : > { %v2139_v52 = vmul.f32 %v2128_v49, %v6743_v11  ;;  %v2368_v11 = vmul.f32 %v6865_v15, %v1148_v9 }
 0x96b   : > { %v2142_v54 = vadd.f32 %v2140_v48, %v2138_v47 }
 0x96c   : > { %v2141_v55 = vadd.f32 %v2139_v52, %v2137_v51 }
 0x96e   : > { %5672 = vmatprep.mubr.msk.f32.mxu0 %vm1171_vm0, %v2141_v55 }
 0x976   : > { %v2343_v58 = vpop.f32.mrb[12].mxu1 }
 0x977   : > { %v2372_v8 = vmul.f32 %v2343_v58, %v1152_v57  ;;  %v5618_v60 = vpop.f32.mrb[13].mxu1 }
 0x979   : > { %v2377_v10 = vadd.f32 %v2372_v8, %v2367_v59 }
 0x97a   : > { %v2348_v62 = vpop.f32.mrb[14].mxu1 }
 0x97b   : > { %v2373_v63 = vmul.f32 %v2348_v62, %v1153_v61  ;;  %v5621_v2 = vpop.f32.mrb[15].mxu1 }
 0x97c   : > { %v2704_v2 = vld [vmem:[%s7399_s5] sm:$0xff] }
 0x97d   : > { %v2378_v7 = vadd.f32 %v2373_v63, %v2368_v11 }
 0x97e   : > { %v2353_v12 = vpop.f32.mrb[16].mxu1 }
 0x97f   : > { %v6087_v1 = vpack.c.bf16 %v2378_v7, %v2377_v10  ;;  %v2374_v14 = vmul.f32 %v2353_v12, %v1154_v6  ;;  %v5624_v0 = vpop.f32.mrb[17].mxu1  ;;  %v2706_v6 = vld [vmem:[%s7399_s5 + $0x10] sm:$0xff]  ;;  %v6107_v7 = vpack.c.bf16 %v2705_v5, %v2704_v2  ;;  %v2707_v12 = vld [vmem:[%s7399_s5 + $0x18] sm:$0xff]  ;;  %v5087_v2 = vld [vmem:[%s7405_s13] ss:$0 sm:$0xff] }
 0x981   : > { %v2379_v19 = vadd.f32 %v2374_v14, %v2369_v13  ;;  %6089 = vmatprep.subr.msk.bf16.mxu0 %vm6756_vm1, %v6087_v1  ;;  %v6111_v13 = vpack.c.bf16 %v2707_v12, %v2706_v6  ;;  %6108 = vmatprep.subr.bf16.mxu1 %v6107_v7 }
 0x982   : > { %v2358_v15 = vpop.f32.mrb[18].mxu1  ;;  %6092 = vmatpush3.bf16.xpose.msk.msra.mxu0 %vm6756_vm1, %v6087_v1  ;;  %6110 = vmatpush3.bf16.msra.mxu1 %v6107_v7 }
 0x983   : > { %v2375_v22 = vmul.f32 %v2358_v15, %v1155_v17  ;;  %v5627_v23 = vpop.f32.mrb[19].mxu1  ;;  %6112 = vmatprep.subr.bf16.mxu1 %v6111_v13 }
 0x985   : > { %v2380_v27 = vadd.f32 %v2375_v22, %v2370_v20  ;;  %v5083_v22 = vld [vmem:[%s7400_s28] ss:$0 sm:$0xff]  ;;  %s7402_s28 = sld [smem:[#allocation23_spill]] }
 0x986   : > { %v2363_v29 = vpop.f32.mrb[20].mxu1  ;;  %6114 = vmatpush3.bf16.msra.mxu1 %v6111_v13 }
 0x987   : > { %v6093_v32 = vpack.c.bf16 %v2380_v27, %v2379_v19  ;;  %v2376_v33 = vmul.f32 %v2363_v29, %v1156_v18  ;;  %v5630_v34 = vpop.f32.mrb[21].mxu1 }
 0x989   : > { %v2381_v35 = vadd.f32 %v2376_v33, %v2371_v30  ;;  %6095 = vmatprep.subr.msk.bf16.mxu0 %vm6756_vm1, %v6093_v32 }
 0x98a   : > { %6098 = vmatpush3.bf16.xpose.msk.msra.mxu0 %vm6756_vm1, %v6093_v32  ;;  %v2476_v36 = vpop.f32.mrb[22].mxu1 }
 0x98b   : > { %5670 = vmatprep.subr.msk.mxu0 %vm1171_vm0, %v2381_v35  ;;  %v5649_v37 = vpop.f32.mrb[23].mxu1  ;;  %v2477_v24 = vadd.f32 %v5067_v21, %v2476_v36  ;;  %s7403_s25 = smov %s7402_s28 }
 0x98c   : > { %v2934_v13 = vld [vmem:[%s7403_s25 + $0x30] sm:$0xff] }
 0x98e   : > { %v2481_v38 = vpop.f32.mrb[24].mxu1 }
 0x98f   : > { %v2482_v39 = vadd.f32 %v5067_v21, %v2481_v38  ;;  %v5652_v40 = vpop.f32.mrb[25].mxu1 }
 0x990   : > { %v2836_v40 = vld [vmem:[%s7401_s1] sm:$0xff] }
 0x991   : > { %v6099_v41 = vpack.c.bf16 %v2482_v39, %v2477_v24 }
 0x992   : > { %5671 = vmatpush3.xpose.msk.msra.mxu0 %vm1171_vm0, %v2381_v35  ;;  %v2486_v42 = vpop.f32.mrb[26].mxu1 }
 0x993   : > { %6100 = vmatprep.subr.bf16.mxu0 %v6099_v41  ;;  %v5655_v43 = vpop.f32.mrb[27].mxu1  ;;  %v2487_v48 = vadd.f32 %v5067_v21, %v2486_v42 }
 0x994   : > { %v2838_v43 = vld [vmem:[%s7401_s1 + $0x10] sm:$0xff] }
 0x995   : > { %5673 = vmatmul.mubr.msk.f32.vlgmr.msra.gmra.mrb[18].mxu0 %vm1171_vm0, %v2142_v54 }
 0x996   : > { %6102 = vmatpush3.bf16.msra.mxu0 %v6099_v41  ;;  %v2491_v49 = vpop.f32.mrb[28].mxu1  ;;  %v2837_v41 = vld [vmem:[%s7401_s1 + $0x8] sm:$0xff] }
 0x997   : > { %v2492_v51 = vadd.f32 %v5067_v21, %v2491_v49  ;;  %v5658_v52 = vpop.f32.mrb[29].mxu1  ;;  %v6115_v42 = vpack.c.bf16 %v2837_v41, %v2836_v40  ;;  %v5105_v41 = vld [vmem:[%s6542_s30 + $0x20] sm:$0xff] }
 0x999   : > { %v6103_v54 = vpack.c.bf16 %v2492_v51, %v2487_v48  ;;  %v2930_v48 = vld [vmem:[%s7403_s25 + $0x10] sm:$0xff]  ;;  %v2931_v51 = vld [vmem:[%s7403_s25 + $0x18] sm:$0xff] }
 0x99a   : > { %v2496_v55 = vpop.f32.mrb[30].mxu1  ;;  %v6127_v52 = vpack.c.bf16 %v2931_v51, %v2930_v48  ;;  %v5108_v48 = vld [vmem:[%s6542_s30 + $0x38] sm:$0xff] }
 0x99b   : > { %6104 = vmatprep.subr.bf16.mxu0 %v6103_v54  ;;  %v2497_v56 = vadd.f32 %v5067_v21, %v2496_v55  ;;  %v5661_v57 = vpop.f32.mrb[31].mxu1  ;;  %v2933_v55 = vld [vmem:[%s7403_s25 + $0x28] sm:$0xff] }
 0x99c   : > { %6106 = vmatpush3.bf16.msra.mxu0 %v6103_v54  ;;  %v2932_v54 = vld [vmem:[%s7403_s25 + $0x20] sm:$0xff] }
 0x99d   : > { %5683 = vmatprep.subr.msk.mxu0 %vm2621_vm6, %v2497_v56 }
 0x9a0   : > { %5684 = vmatpush3.msk.msra.mxu0 %vm2621_vm6, %v2497_v56  ;;  %v6131_v56 = vpack.c.bf16 %v2933_v55, %v2932_v54  ;;  %v5114_v55 = vld [vmem:[%s6552_s12 + $0x20] sm:$0xff] }
 0x9a1   : > { %6116 = vmatprep.subr.bf16.mxu0 %v6115_v42 }
 0xa68   : > { %v5674_v44 = vpop.f32.mrb[18].mxu0 }
 0xa69   : > { %v2587_v45 = vpop.f32.mrb[19].mxu0  ;;  %v2600_v46 = vsel %vm2596_vm5, %v5674_v44, -inf }
 0xa6a   : > { %2601 = vmax.xlane.f32.xlu1 %v2600_v46  ;;  %v2597_v47 = vsel %vm2596_vm5, %v2587_v45, -inf  ;;  %v2928_v46 = vld [vmem:[%s7402_s28] sm:$0xff]  ;;  %s7406_s28 = sld [smem:[#allocation22_spill]] }
 0xa6b   : > { %2598 = vmax.xlane.f32.xlu0 %v2597_v47  ;;  %v2929_v47 = vld [vmem:[%s7403_s25 + $0x8] sm:$0xff] }
 0xa6c   : > { %v6123_v49 = vpack.c.bf16 %v2929_v47, %v2928_v46  ;;  %v5107_v47 = vld [vmem:[%s6542_s30 + $0x30] sm:$0xff] }
 0xa6d   : > { %v6159_v51 = vpack.c.bf16 %v5108_v48, %v5107_v47 }
 0xa6e   : > { %6124 = vmatprep.subr.bf16.mxu1 %v6123_v49 }
 0xaf7   : > { %v2602_v58 = vpop.xlane.xlu1 %2601 }
 0xaf8   : > { %v2604_v59 = vsub.f32 %v5674_v44, %v2602_v58  ;;  %v2599_v8 = vpop.xlane.xlu0 %2598  ;;  %v2839_v44 = vld [vmem:[%s7401_s1 + $0x18] sm:$0xff]  ;;  %s7407_s1 = smov %s7406_s28 }
 0xaf9   : > { %v2603_v60 = vsub.f32 %v2587_v45, %v2599_v8  ;;  %v6119_v45 = vpack.c.bf16 %v2839_v44, %v2838_v43  ;;  %v5096_v44 = vld [vmem:[%s6532_s19 + $0x20] sm:$0xff] }
 0xafa   : > { %v2607_v9 = vmul.f32 1.442695, %v2604_v59 }
 0xafb   : > { %v2605_v61 = vmul.f32 1.442695, %v2603_v60 }
 0xafc   : > { %6359 = vpow2.f32 %v2607_v9 }
 0xafd   : > { %6361 = vpow2.f32 %v2605_v61 }
 0xb06   : > { %v6360_v10 = vpop.eup %6359 }
 0xb07   : > { %v6362_v62 = vpop.eup %6361  ;;  %v2612_v11 = vsel %vm2596_vm5, %v6360_v10, 0.0 }
 0xb08   : > { %2613 = vadd.xlane.f32.xlu1 %v2612_v11  ;;  %5685 = vmatprep.mubr.msk.f32.mxu0 %vm2596_vm5, %v6362_v62  ;;  %v2609_v63 = vsel %vm2596_vm5, %v6362_v62, 0.0 }
 0xb09   : > { %5686 = vmatmul.mubr.msk.f32.vlgmr.msra.gmra.mrb[20].mxu0 %vm2596_vm5, %v6360_v10  ;;  %2610 = vadd.xlane.f32.xlu0 %v2609_v63  ;;  %v5086_v10 = vld [vmem:[%s7404_s29] ss:$0 sm:$0xff] }
 0xb0a   : > { %6118 = vmatpush3.bf16.msra.mxu0 %v6115_v42  ;;  %v5106_v42 = vld [vmem:[%s6542_s30 + $0x28] sm:$0xff] }
 0xb0b   : > { %6120 = vmatprep.subr.bf16.mxu0 %v6119_v45  ;;  %v6155_v43 = vpack.c.bf16 %v5106_v42, %v5105_v41  ;;  %v7068_v42 = vld [vmem:[%s6502_s21] sm:$0xff] }
 0xb0e   : > { %6122 = vmatpush3.bf16.msra.mxu0 %v6119_v45  ;;  %v5097_v45 = vld [vmem:[%s6532_s19 + $0x28] sm:$0xff] }
 0xb0f   : > { %v6139_v46 = vpack.c.bf16 %v5097_v45, %v5096_v44 }
 0xb11   : > { %6140 = vmatprep.subr.bf16.mxu0 %v6139_v46 }
 0xb95   : > { %v2614_v14 = vpop.xlane.xlu1 %2613 }
 0xb96   : > { %v2611_v1 = vpop.xlane.xlu0 %2610 }
 0xb97   : > { %6363 = vrcp.f32 %v2611_v1  ;;  %v2935_v1 = vld [vmem:[%s7403_s25 + $0x38] sm:$0xff] }
 0xb98   : > { %6365 = vrcp.f32 %v2614_v14  ;;  %v6135_v14 = vpack.c.bf16 %v2935_v1, %v2934_v13  ;;  %v5117_v13 = vld [vmem:[%s6552_s12 + $0x38] sm:$0xff] }
 0xba1   : > { %v6364_v16 = vpop.eup %6363 }
 0xba2   : > { %v6366_v19 = vpop.eup %6365 }
 0xbdc   : > { %v5687_v0 = vpop.f32.mrb[20].mxu0 }
 0xbdd   : > { %v2691_v17 = vpop.f32.mrb[21].mxu0  ;;  %v2703_v20 = vmul.f32 %v6366_v19, %v5687_v0  ;;  %v5088_v0 = vld [vmem:[%s7406_s28] ss:$0 sm:$0xff]  ;;  %s7410_s28 = sld [smem:[#allocation24_spill]] }
 0xbde   : > { %v2702_v15 = vmul.f32 %v6364_v16, %v2691_v17 }
 0xbe0   : > { %5696 = vmatprep.mubr.msk.f32.mxu1 %vm1171_vm0, %v2702_v15 }
 0xbe1   : > { %5697 = vmatmul.mubr.msk.f32.vlgmr.msra.gmra.mrb[32].mxu1 %vm1171_vm0, %v2703_v20 }
 0xbe2   : > { %6126 = vmatpush3.bf16.msra.mxu1 %v6123_v49  ;;  %v5098_v49 = vld [vmem:[%s6532_s19 + $0x30] sm:$0xff] }
 0xbe3   : > { %6128 = vmatprep.subr.bf16.mxu1 %v6127_v52 }
 0xbe6   : > { %6130 = vmatpush3.bf16.msra.mxu1 %v6127_v52  ;;  %v5099_v52 = vld [vmem:[%s6532_s19 + $0x38] sm:$0xff] }
 0xbe7   : > { %6132 = vmatprep.subr.bf16.mxu1 %v6131_v56  ;;  %v6143_v54 = vpack.c.bf16 %v5099_v52, %v5098_v49 }
 0xbea   : > { %6134 = vmatpush3.bf16.msra.mxu1 %v6131_v56  ;;  %v5115_v56 = vld [vmem:[%s6552_s12 + $0x28] sm:$0xff] }
 0xbeb   : > { %6136 = vmatprep.subr.bf16.mxu1 %v6135_v14 }
 0xbee   : > { %6138 = vmatpush3.bf16.msra.mxu1 %v6135_v14 }
 0xbef   : > { %6156 = vmatprep.subr.bf16.mxu1 %v6155_v43 }
 0xcb4   : > { %v5698_v23 = vpop.f32.mrb[32].mxu1 }
 0xcb5   : > { %v2791_v26 = vadd.f32 %v5698_v23, %v5083_v22  ;;  %v2785_v18 = vpop.f32.mrb[33].mxu1  ;;  %v5091_v23 = vld [vmem:[%s6647_s9] ss:$0 sm:$0xff] }
 0xcb6   : > { %v2786_v27 = vadd.f32 %v5083_v22, %v2785_v18 }
 0xcb7   : > { %v6973_v29 = vadd.f32 %v2791_v26, %v6783_v3 }
 0xcb8   : > { %v6976_v30 = vadd.f32 %v2786_v27, %v6786_v4 }
 0xcb9   : > { %v2801_v32 = vsel %vm1171_vm0, %v6973_v29, 0.0 }
 0xcba   : > { %2802 = vadd.xlane.f32.xlu1 %v2801_v32  ;;  %v2798_v33 = vsel %vm1171_vm0, %v6976_v30, 0.0 }
 0xcbb   : > { %2799 = vadd.xlane.f32.xlu0 %v2798_v33 }
 0xd47   : > { %v2803_v34 = vpop.xlane.xlu1 %2802 }
 0xd48   : > { %v2805_v35 = vmul.f32 0.03125, %v2803_v34  ;;  %v2800_v21 = vpop.xlane.xlu0 %2799 }
 0xd49   : > { %v2804_v3 = vmul.f32 0.03125, %v2800_v21 }
 0xd4a   : > { %v2807_v36 = vsub.f32 %v6973_v29, %v2805_v35 }
 0xd4b   : > { %v2806_v4 = vsub.f32 %v6976_v30, %v2804_v3 }
 0xd4c   : > { %v2809_v37 = vmul.f32 %v2807_v36, %v2807_v36 }
 0xd4d   : > { %v2808_v24 = vmul.f32 %v2806_v4, %v2806_v4 }
 0xd4e   : > { %v2813_v38 = vsel %vm1171_vm0, %v2809_v37, 0.0 }
 0xd4f   : > { %2814 = vadd.xlane.f32.xlu1 %v2813_v38  ;;  %v2810_v39 = vsel %vm1171_vm0, %v2808_v24, 0.0 }
 0xd50   : > { %2811 = vadd.xlane.f32.xlu0 %v2810_v39 }
 0xddc   : > { %v2815_v57 = vpop.xlane.xlu1 %2814 }
 0xddd   : > { %v2817_v58 = vmul.f32 0.03125, %v2815_v57  ;;  %v2812_v59 = vpop.xlane.xlu0 %2811  ;;  %v6171_v57 = vpack.c.bf16 %v5115_v56, %v5114_v55 }
 0xdde   : > { %v2816_v8 = vmul.f32 0.03125, %v2812_v59 }
 0xddf   : > { %v2819_v60 = vadd.f32 1e-05, %v2817_v58 }
 0xde0   : > { %v2818_v9 = vadd.f32 1e-05, %v2816_v8 }
 0xde1   : > { %6367 = vrsqrt.f32 %v2819_v60 }
 0xde2   : > { %6369 = vrsqrt.f32 %v2818_v9 }
 0xdeb   : > { %v6368_v61 = vpop.eup %6367 }
 0xdec   : > { %v6370_v62 = vpop.eup %6369  ;;  %v2823_v11 = vmul.f32 %v6368_v61, %v2807_v36 }
 0xded   : > { %v2822_v63 = vmul.f32 %v6370_v62, %v2806_v4  ;;  %v5094_v62 = vld [vmem:[%s6522_s8 + $0x1] ss:$0 sm:$0xff] }
 0xdee   : > { %v2829_v5 = vmul.f32 %v5086_v10, %v2823_v11 }
 0xdef   : > { %v2828_v6 = vmul.f32 %v5086_v10, %v2822_v63 }
 0xdf0   : > { %v2835_v12 = vadd.f32 %v5087_v2, %v2829_v5  ;;  %v5095_v5 = vld [vmem:[%s6527_s14 + $0x1] ss:$0 sm:$0xff] }
 0xdf1   : > { %v2834_v7 = vadd.f32 %v5087_v2, %v2828_v6 }
 0xdf3   : > { %5707 = vmatprep.mubr.msk.f32.mxu0 %vm1171_vm0, %v2834_v7 }
 0xdf4   : > { %5708 = vmatmul.mubr.msk.f32.vlgmr.msra.gmra.mrb[22].mxu0 %vm1171_vm0, %v2835_v12  ;;  %v5116_v12 = vld [vmem:[%s6552_s12 + $0x30] sm:$0xff] }
 0xdf5   : > { %6142 = vmatpush3.bf16.msra.mxu0 %v6139_v46 }
 0xdf6   : > { %6144 = vmatprep.subr.bf16.mxu0 %v6143_v54 }
 0xdf9   : > { %6146 = vmatpush3.bf16.msra.mxu0 %v6143_v54 }
 0xdfa   : > { %6148 = vmatprep.subr.bf16.mxu0 %v6702_v31 }
 0xec7   : > { %v5709_v16 = vpop.f32.mrb[22].mxu0 }
 0xec8   : > { %v2923_v17 = vadd.f32 %v5709_v16, %v5088_v0  ;;  %v2917_v19 = vpop.f32.mrb[23].mxu0  ;;  %v5100_v16 = vld [vmem:[%s6537_s24 + $0x1] ss:$0 sm:$0xff] }
 0xec9   : > { %v2918_v15 = vadd.f32 %v5088_v0, %v2917_v19  ;;  %v6175_v0 = vpack.c.bf16 %v5117_v13, %v5116_v12  ;;  %v5128_v12 = vld [vmem:[%s6562_s27 + $0x28] sm:$0xff] }
 0xeca   : > { %v2927_v22 = vmax.f32 %v2923_v17, 0.0 }
 0xecb   : > { %v2926_v20 = vmax.f32 %v2918_v15, 0.0  ;;  %v5109_v15 = vld [vmem:[%s6547_s6 + $0x1] ss:$0 sm:$0xff] }
 0xecd   : > { %5726 = vmatprep.mubr.msk.f32.mxu1 %vm2156_vm4, %v2926_v20 }
 0xece   : > { %5727 = vmatmul.mubr.msk.f32.vlgmr.msra.gmra.mrb[34].mxu1 %vm2156_vm4, %v2927_v22 }
 0xecf   : > { %6158 = vmatpush3.bf16.msra.mxu1 %v6155_v43 }
 0xed0   : > { %6160 = vmatprep.subr.bf16.mxu1 %v6159_v51 }
 0xed3   : > { %6162 = vmatpush3.bf16.msra.mxu1 %v6159_v51 }
 0xed4   : > { %6172 = vmatprep.subr.bf16.mxu1 %v6171_v57 }
 0xfa1   : > { %v5728_v26 = vpop.f32.mrb[34].mxu1 }
 0xfa2   : > { %v3019_v18 = vadd.f32 %v5728_v26, %v5091_v23  ;;  %v3013_v27 = vpop.f32.mrb[35].mxu1 }
 0xfa3   : > { %v3014_v32 = vadd.f32 %v5091_v23, %v3013_v27  ;;  %v5118_v27 = vld [vmem:[%s6557_s20 + $0x1] ss:$0 sm:$0xff] }
 0xfa4   : > { %v7007_v33 = vadd.f32 %v3019_v18, %v6973_v29 }
 0xfa5   : > { %v7010_v34 = vadd.f32 %v3014_v32, %v6976_v30 }
 0xfa6   : > { %v3029_v35 = vsel %vm1171_vm0, %v7007_v33, 0.0 }
 0xfa7   : > { %3030 = vadd.xlane.f32.xlu1 %v3029_v35  ;;  %v3026_v21 = vsel %vm1171_vm0, %v7010_v34, 0.0 }
 0xfa8   : > { %3027 = vadd.xlane.f32.xlu0 %v3026_v21 }
0x1034   : > { %v3031_v3 = vpop.xlane.xlu1 %3030 }
0x1035   : > { %v3033_v36 = vmul.f32 0.03125, %v3031_v3  ;;  %v3028_v4 = vpop.xlane.xlu0 %3027 }
0x1036   : > { %v3032_v29 = vmul.f32 0.03125, %v3028_v4 }
0x1037   : > { %v3035_v37 = vsub.f32 %v7007_v33, %v3033_v36 }
0x1038   : > { %v3034_v30 = vsub.f32 %v7010_v34, %v3032_v29 }
0x1039   : > { %v3037_v24 = vmul.f32 %v3035_v37, %v3035_v37 }
0x103a   : > { %v3036_v38 = vmul.f32 %v3034_v30, %v3034_v30 }
0x103b   : > { %v3041_v39 = vsel %vm1171_vm0, %v3037_v24, 0.0  ;;  %v7060_v24 = vld [vmem:[%s6502_s21 + $0x8] sm:$0xff] }
0x103c   : > { %3042 = vadd.xlane.f32.xlu1 %v3041_v39  ;;  %v3038_v40 = vsel %vm1171_vm0, %v3036_v38, 0.0 }
0x103d   : > { %3039 = vadd.xlane.f32.xlu0 %v3038_v40  ;;  %v7064_v40 = vld [vmem:[%s6497_s17] sm:$0xff] }
0x10c9   : > { %v3043_v58 = vpop.xlane.xlu1 %3042 }
0x10ca   : > { %v3045_v59 = vmul.f32 0.03125, %v3043_v58  ;;  %v3040_v8 = vpop.xlane.xlu0 %3039 }
0x10cb   : > { %v3044_v60 = vmul.f32 0.03125, %v3040_v8 }
0x10cc   : > { %v3047_v9 = vadd.f32 1e-05, %v3045_v59 }
0x10cd   : > { %v3046_v61 = vadd.f32 1e-05, %v3044_v60 }
0x10ce   : > { %6371 = vrsqrt.f32 %v3047_v9 }
0x10cf   : > { %6373 = vrsqrt.f32 %v3046_v61 }
0x10d8   : > { %v6372_v10 = vpop.eup %6371 }
0x10d9   : > { %v6374_v11 = vpop.eup %6373  ;;  %v3051_v63 = vmul.f32 %v6372_v10, %v3035_v37  ;;  %v7056_v37 = vld [vmem:[%s6497_s17 + $0x8] sm:$0xff] }
0x10da   : > { %v3050_v2 = vmul.f32 %v6374_v11, %v3034_v30 }
0x10db   : > { %v3057_v6 = vmul.f32 %v5094_v62, %v3051_v63 }
0x10dc   : > { %v3056_v7 = vmul.f32 %v5094_v62, %v3050_v2 }
0x10dd   : > { %v3063_v14 = vadd.f32 %v5095_v5, %v3057_v6 }
0x10de   : > { %v3062_v1 = vadd.f32 %v5095_v5, %v3056_v7  ;;  %v5127_v7 = vld [vmem:[%s6562_s27 + $0x20] sm:$0xff] }
0x10df   : > { %v6189_v13 = vpack.c.bf16 %v5128_v12, %v5127_v7 }
0x10e0   : > { %5737 = vmatprep.mubr.msk.f32.mxu0 %vm1171_vm0, %v3062_v1  ;;  %5759 = vmatprep.mubr.msk.f32.mxu1 %vm1171_vm0, %v3062_v1 }
0x10e1   : > { %5738 = vmatmul.mubr.msk.f32.vlgmr.msra.gmra.mrb[24].mxu0 %vm1171_vm0, %v3063_v14  ;;  %5760 = vmatmul.mubr.msk.f32.vlgmr.msra.gmra.mrb[36].mxu1 %vm1171_vm0, %v3063_v14 }
0x10e2   : > { %6174 = vmatpush3.bf16.msra.mxu1 %v6171_v57  ;;  %5781 = vmatprep.mubr.msk.f32.mxu1 %vm1171_vm0, %v3062_v1  ;;  %v5129_v1 = vld [vmem:[%s6562_s27 + $0x30] sm:$0xff] }
0x10e3   : > { %6176 = vmatprep.subr.bf16.mxu1 %v6175_v0  ;;  %6150 = vmatpush3.bf16.msra.mxu0 %v6702_v31 }
0x10e4   : > { %6152 = vmatprep.subr.bf16.mxu0 %v6718_v53 }
0x10e6   : > { %6178 = vmatpush3.bf16.msra.mxu1 %v6175_v0 }
0x10e7   : > { %6154 = vmatpush3.bf16.msra.mxu0 %v6718_v53 }
0x10e8   : > { %6164 = vmatprep.subr.bf16.mxu0 %v6702_v31 }
0x10e9   : > { %5782 = vmatmul.mubr.msk.f32.vlgmr.msra.gmra.mrb[38].mxu1 %vm1171_vm0, %v3063_v14  ;;  %v5130_v14 = vld [vmem:[%s6562_s27 + $0x38] sm:$0xff] }
0x10ea   : > { %v6193_v0 = vpack.c.bf16 %v5130_v14, %v5129_v1  ;;  %v5147_v1 = vld [vmem:[%s7390_s15 + $0x50] sm:$0xff]  ;;  %v5148_v14 = vld [vmem:[%s7390_s15 + $0x58] sm:$0xff] }
0x11b4   : > { %v5739_v17 = vpop.f32.mrb[24].mxu0  ;;  %v5761_v19 = vpop.f32.mrb[36].mxu1 }
0x11b5   : > { %v3146_v20 = vpop.f32.mrb[25].mxu0  ;;  %v3318_v22 = vpop.f32.mrb[37].mxu1  ;;  %v3152_v26 = vadd.f32 %v5739_v17, %v5100_v16  ;;  %v3324_v36 = vadd.f32 %v5761_v19, %v5109_v15 }
0x11b6   : > { %v3147_v23 = vadd.f32 %v5100_v16, %v3146_v20  ;;  %v3319_v18 = vadd.f32 %v5109_v15, %v3318_v22 }
0x11b7   : > { %v3237_v30 = vmul.f32 %v7056_v37, %v3152_v26  ;;  %v3409_v47 = vmul.f32 %v7056_v37, %v3324_v36 }
0x11b8   : > { %5748 = vmatprep.mubr.msk.f32.mxu0 %vm1171_vm0, %v3147_v23  ;;  %v3236_v41 = vmul.f32 %v7064_v40, %v3147_v23  ;;  %v3408_v51 = vmul.f32 %v7064_v40, %v3319_v18 }
0x11b9   : > { %5749 = vmatmul.mubr.msk.f32.vlgmr.msra.gmra.mrb[26].mxu0 %vm1171_vm0, %v3152_v26 }
0x11ba   : > { %6166 = vmatpush3.bf16.msra.mxu0 %v6702_v31  ;;  %5770 = vmatprep.mubr.msk.f32.mxu0 %vm1171_vm0, %v3319_v18  ;;  %v5131_v18 = vld [vmem:[%s7380_s4 + $0x1] ss:$0 sm:$0xff] }
0x11bb   : > { %6168 = vmatprep.subr.bf16.mxu0 %v6718_v53 }
0x11bc   : > { %v5783_v32 = vpop.f32.mrb[38].mxu1 }
0x11bd   : > { %v3496_v35 = vadd.f32 %v5783_v32, %v5118_v27  ;;  %v3490_v21 = vpop.f32.mrb[39].mxu1 }
0x11be   : > { %v3491_v3 = vadd.f32 %v5118_v27, %v3490_v21  ;;  %6170 = vmatpush3.bf16.msra.mxu0 %v6718_v53 }
0x11c0   : > { %v6185_v4 = vpack.c.bf16 %v3496_v35, %v3491_v3 }
0x11c1   : > { %5771 = vmatmul.mubr.msk.f32.vlgmr.msra.gmra.mrb[28].mxu0 %vm1171_vm0, %v3324_v36 }
0x11c2   : > { %6186 = vmatprep.subr.bf16.mxu1 %v6185_v4 }
0x11c3   : > { %6188 = vmatpush3.bf16.msra.mxu1 %v6185_v4 }
0x128c   : > { %v5750_v29 = vpop.f32.mrb[26].mxu0 }
0x128d   : > { %v3239_v38 = vmul.f32 %v7060_v24, %v5750_v29  ;;  %v3227_v39 = vpop.f32.mrb[27].mxu0 }
0x128e   : > { %v3238_v43 = vmul.f32 %v7068_v42, %v3227_v39 }
0x128f   : > { %v3241_v44 = vadd.f32 %v3239_v38, %v3237_v30 }
0x1290   : > { %v3240_v45 = vadd.f32 %v3238_v43, %v3236_v41 }
0x1292   : > { %5788 = vmatprep.mubr.msk.f32.mxu0 %vm1171_vm0, %v3240_v45 }
0x1294   : > { %v5772_v46 = vpop.f32.mrb[28].mxu0 }
0x1295   : > { %v3411_v48 = vmul.f32 %v7060_v24, %v5772_v46  ;;  %v3399_v49 = vpop.f32.mrb[29].mxu0 }
0x1296   : > { %v3410_v52 = vmul.f32 %v7068_v42, %v3399_v49 }
0x1297   : > { %v3413_v54 = vadd.f32 %v3411_v48, %v3409_v47  ;;  %v5136_v47 = vld [vmem:[%s7387_s7 + $0x20] sm:$0xff]  ;;  %v5137_v48 = vld [vmem:[%s7387_s7 + $0x28] sm:$0xff] }
0x1298   : > { %v3412_v55 = vadd.f32 %v3410_v52, %v3408_v51  ;;  %v6197_v49 = vpack.c.bf16 %v5137_v48, %v5136_v47  ;;  %v5138_v51 = vld [vmem:[%s7387_s7 + $0x30] sm:$0xff]  ;;  %v5139_v52 = vld [vmem:[%s7387_s7 + $0x38] sm:$0xff] }
0x129a   : > { %v6179_v56 = vpack.c.bf16 %v3413_v54, %v3412_v55  ;;  %6198 = vmatprep.subr.bf16.mxu1 %v6197_v49  ;;  %v6201_v54 = vpack.c.bf16 %v5139_v52, %v5138_v51 }
0x129c   : > { %6181 = vmatprep.subr.msk.bf16.mxu0 %vm6756_vm1, %v6179_v56 }
0x129d   : > { %6184 = vmatpush3.bf16.xpose.msk.msra.mxu0 %vm6756_vm1, %v6179_v56 }
0x129e   : > { %6190 = vmatprep.subr.bf16.mxu0 %v6189_v13 }
0x12a4   : > { %5789 = vmatmul.mubr.msk.f32.vlgmr.msra.gmra.mrb[30].mxu0 %vm1171_vm0, %v3241_v44 }
0x12a5   : > { %6192 = vmatpush3.bf16.msra.mxu0 %v6189_v13 }
0x12a6   : > { %6194 = vmatprep.subr.bf16.mxu0 %v6193_v0 }
0x12a9   : > { %6196 = vmatpush3.bf16.msra.mxu0 %v6193_v0  ;;  %v6217_v0 = vpack.c.bf16 %v5148_v14, %v5147_v1 }
0x12aa   : > { %6206 = vmatprep.subr.bf16.mxu0 %v6702_v31 }
0x1377   : > { %v5790_v57 = vpop.f32.mrb[30].mxu0 }
0x1378   : > { %v3577_v58 = vpop.f32.mrb[31].mxu0  ;;  %v3589_v59 = vsel %vm1730_vm2, %v5790_v57, -inf }
0x1379   : > { %3590 = vmax.xlane.f32.xlu1 %v3589_v59  ;;  %v3586_v8 = vsel %vm1730_vm2, %v3577_v58, -inf }
0x137a   : > { %3587 = vmax.xlane.f32.xlu0 %v3586_v8 }
0x1406   : > { %v3591_v60 = vpop.xlane.xlu1 %3590 }
0x1407   : > { %v3593_v9 = vsub.f32 %v5790_v57, %v3591_v60  ;;  %v3588_v61 = vpop.xlane.xlu0 %3587 }
0x1408   : > { %v3592_v10 = vsub.f32 %v3577_v58, %v3588_v61 }
0x1409   : > { %v3596_v62 = vmul.f32 1.442695, %v3593_v9  ;;  %v5134_v9 = vld [vmem:[%s7388_s10 + $0x1] ss:$0 sm:$0xff] }
0x140a   : > { %v3594_v11 = vmul.f32 1.442695, %v3592_v10 }
0x140b   : > { %6375 = vpow2.f32 %v3596_v62 }
0x140c   : > { %6377 = vpow2.f32 %v3594_v11  ;;  %v5135_v11 = vld [vmem:[%s7389_s11 + $0x1] ss:$0 sm:$0xff] }
0x1415   : > { %v6376_v63 = vpop.eup %6375 }
0x1416   : > { %v6378_v2 = vpop.eup %6377  ;;  %v3601_v5 = vsel %vm1730_vm2, %v6376_v63, 0.0 }
0x1417   : > { %3602 = vadd.xlane.f32.xlu1 %v3601_v5  ;;  %5795 = vmatprep.mubr.msk.f32.mxu1 %vm1730_vm2, %v6378_v2  ;;  %v3598_v6 = vsel %vm1730_vm2, %v6378_v2, 0.0  ;;  %v5145_v2 = vld [vmem:[%s7390_s15 + $0x40] sm:$0xff]  ;;  %v5146_v5 = vld [vmem:[%s7390_s15 + $0x48] sm:$0xff] }
0x1418   : > { %5796 = vmatmul.mubr.msk.f32.vlgmr.msra.gmra.mrb[40].mxu1 %vm1730_vm2, %v6376_v63  ;;  %3599 = vadd.xlane.f32.xlu0 %v3598_v6  ;;  %v6214_v12 = vpack.c.bf16 %v5146_v5, %v5145_v2  ;;  %v6414_v2 = vld [vmem:[%s6902_s0 + $0x10] sm:$0xff]  ;;  %v6416_v5 = vld [vmem:[%s6902_s0 + $0x20] sm:$0xf] }
0x1419   : > { %6200 = vmatpush3.bf16.msra.mxu1 %v6197_v49 }
0x141a   : > { %6202 = vmatprep.subr.bf16.mxu1 %v6201_v54 }
0x141d   : > { %6204 = vmatpush3.bf16.msra.mxu1 %v6201_v54  ;;  %v5164_v54 = vld [vmem:[%s7394_s2 + $0x40] sm:$0xff] }
0x141e   : > { %6213 = vmatprep.subr.bf16.mxu1 %v6471_v25 }
0x14a4   : > { %v3603_v17 = vpop.xlane.xlu1 %3602 }
0x14a5   : > { %v3600_v16 = vpop.xlane.xlu0 %3599 }
0x14a6   : > { %6379 = vrcp.f32 %v3600_v16  ;;  %v5149_v16 = vld [vmem:[%s7390_s15 + $0x60] sm:$0xff] }
0x14a7   : > { %6381 = vrcp.f32 %v3603_v17  ;;  %v5150_v17 = vld [vmem:[%s7390_s15 + $0x68] sm:$0xff] }
0x14b0   : > { %v6380_v15 = vpop.eup %6379 }
0x14b1   : > { %v6382_v22 = vpop.eup %6381 }
0x14eb   : > { %v5797_v19 = vpop.f32.mrb[40].mxu1 }
0x14ec   : > { %v3676_v20 = vpop.f32.mrb[41].mxu1  ;;  %v3688_v26 = vmul.f32 %v6382_v22, %v5797_v19  ;;  %v6220_v19 = vpack.c.bf16 %v5150_v17, %v5149_v16  ;;  %v6417_v17 = vld [vmem:[%s7396_s18] sm:$0xff] }
0x14ed   : > { %v3687_v23 = vmul.f32 %v6380_v15, %v3676_v20  ;;  %v5151_v15 = vld [vmem:[%s7390_s15 + $0x70] sm:$0xff]  ;;  %v5152_v20 = vld [vmem:[%s7390_s15 + $0x78] sm:$0xff] }
0x14ee   : > { %v6223_v22 = vpack.c.bf16 %v5152_v20, %v5151_v15 }
0x14ef   : > { %5806 = vmatprep.mubr.msk.f32.mxu0 %vm1171_vm0, %v3687_v23  ;;  %v6407_v23 = vld [vmem:[%s6822_s22] sm:$0xff] }
0x14f0   : > { %5807 = vmatmul.mubr.msk.f32.vlgmr.msra.gmra.mrb[32].mxu0 %vm1171_vm0, %v3688_v26  ;;  %v6408_v26 = vld [vmem:[%s6822_s22 + $0x8] sm:$0xff] }
0x14f1   : > { %6208 = vmatpush3.bf16.msra.mxu0 %v6702_v31 }
0x14f2   : > { %6210 = vmatprep.subr.bf16.mxu0 %v6718_v53 }
0x14f5   : > { %6212 = vmatpush3.bf16.msra.mxu0 %v6718_v53 }
0x14f6   : > { %6225 = vmatprep.subr.bf16.mxu0 %v6471_v25 }
0x15c3   : > { %v5808_v27 = vpop.f32.mrb[32].mxu0 }
0x15c4   : > { %v3777_v32 = vadd.f32 %v5808_v27, %v5131_v18  ;;  %v3771_v35 = vpop.f32.mrb[33].mxu0  ;;  %v6410_v27 = vld [vmem:[%s6822_s22 + $0x18] sm:$0xff] }
0x15c5   : > { %v3772_v21 = vadd.f32 %v5131_v18, %v3771_v35  ;;  %v6409_v18 = vld [vmem:[%s6822_s22 + $0x10] sm:$0xff]  ;;  %v5140_v35 = vld [vmem:[%s7392_s23 + $0x1] ss:$0 sm:$0xff] }
0x15c6   : > { %v7100_v3 = vadd.f32 %v3777_v32, %v7007_v33  ;;  %v6411_v32 = vld [vmem:[%s6822_s22 + $0x20] sm:$0xf]  ;;  %s7409_s22 = sld [smem:[#allocation21_spill]] }
0x15c7   : > { %v7103_v36 = vadd.f32 %v3772_v21, %v7010_v34 }
0x15c8   : > { %v3787_v4 = vsel %vm1171_vm0, %v7100_v3, 0.0 }
0x15c9   : > { %3788 = vadd.xlane.f32.xlu1 %v3787_v4  ;;  %v3784_v29 = vsel %vm1171_vm0, %v7103_v36, 0.0 }
0x15ca   : > { %3785 = vadd.xlane.f32.xlu0 %v3784_v29 }
0x1656   : > { %v3789_v30 = vpop.xlane.xlu1 %3788 }
0x1657   : > { %v3791_v38 = vmul.f32 0.03125, %v3789_v30  ;;  %v3786_v39 = vpop.xlane.xlu0 %3785 }
0x1658   : > { %v3790_v33 = vmul.f32 0.03125, %v3786_v39 }
0x1659   : > { %v3793_v41 = vsub.f32 %v7100_v3, %v3791_v38  ;;  %v5153_v38 = vld [vmem:[%s7393_s26 + $0x1] ss:$0 sm:$0xff] }
0x165a   : > { %v3792_v34 = vsub.f32 %v7103_v36, %v3790_v33 }
0x165b   : > { %v3795_v43 = vmul.f32 %v3793_v41, %v3793_v41 }
0x165c   : > { %v3794_v44 = vmul.f32 %v3792_v34, %v3792_v34 }
0x165d   : > { %v3799_v45 = vsel %vm1171_vm0, %v3795_v43, 0.0 }
0x165e   : > { %3800 = vadd.xlane.f32.xlu1 %v3799_v45  ;;  %v3796_v46 = vsel %vm1171_vm0, %v3794_v44, 0.0 }
0x165f   : > { %3797 = vadd.xlane.f32.xlu0 %v3796_v46 }
0x16eb   : > { %v3801_v55 = vpop.xlane.xlu1 %3800 }
0x16ec   : > { %v3803_v56 = vmul.f32 0.03125, %v3801_v55  ;;  %v3798_v57 = vpop.xlane.xlu0 %3797  ;;  %v5165_v55 = vld [vmem:[%s7394_s2 + $0x48] sm:$0xff] }
0x16ed   : > { %v3802_v58 = vmul.f32 0.03125, %v3798_v57  ;;  %v6232_v57 = vpack.c.bf16 %v5165_v55, %v5164_v54 }
0x16ee   : > { %v3805_v59 = vadd.f32 1e-05, %v3803_v56  ;;  %v5166_v56 = vld [vmem:[%s7394_s2 + $0x50] sm:$0xff] }
0x16ef   : > { %v3804_v8 = vadd.f32 1e-05, %v3802_v58  ;;  %v5167_v58 = vld [vmem:[%s7394_s2 + $0x58] sm:$0xff] }
0x16f0   : > { %6383 = vrsqrt.f32 %v3805_v59  ;;  %v6235_v59 = vpack.c.bf16 %v5167_v58, %v5166_v56 }
0x16f1   : > { %6385 = vrsqrt.f32 %v3804_v8  ;;  %v5168_v8 = vld [vmem:[%s7394_s2 + $0x60] sm:$0xff] }
0x16fa   : > { %v6384_v60 = vpop.eup %6383 }
0x16fb   : > { %v6386_v61 = vpop.eup %6385  ;;  %v3809_v10 = vmul.f32 %v6384_v60, %v3793_v41  ;;  %v5169_v60 = vld [vmem:[%s7394_s2 + $0x68] sm:$0xff] }
0x16fc   : > { %v3808_v62 = vmul.f32 %v6386_v61, %v3792_v34  ;;  %v5170_v61 = vld [vmem:[%s7394_s2 + $0x70] sm:$0xff] }
0x16fd   : > { %v3815_v63 = vmul.f32 %v5134_v9, %v3809_v10  ;;  %v5171_v10 = vld [vmem:[%s7394_s2 + $0x78] sm:$0xff]  ;;  %s7413_s2 = sld [smem:[#allocation26_spill]] }
0x16fe   : > { %v3814_v6 = vmul.f32 %v5134_v9, %v3808_v62  ;;  %v6238_v9 = vpack.c.bf16 %v5169_v60, %v5168_v8  ;;  %v6241_v62 = vpack.c.bf16 %v5171_v10, %v5170_v61 }
0x16ff   : > { %v3821_v13 = vadd.f32 %v5135_v11, %v3815_v63  ;;  %v6413_v63 = vld [vmem:[%s6902_s0 + $0x8] sm:$0xff] }
0x1700   : > { %v3820_v7 = vadd.f32 %v5135_v11, %v3814_v6  ;;  %v6412_v11 = vld [vmem:[%s6902_s0] sm:$0xff] }
0x1702   : > { %5817 = vmatprep.mubr.msk.f32.mxu1 %vm1171_vm0, %v3820_v7 }
0x1703   : > { %5818 = vmatmul.mubr.msk.f32.vlgmr.msra.gmra.mrb[42].mxu1 %vm1171_vm0, %v3821_v13 }
0x1704   : > { %6215 = vmatpush3.bf16.msra.mxu1 %v6214_v12  ;;  %5847 = vmatprep.mubr.msk.f32.mxu1 %vm6472_vm3, %v6473_v50 }
0x1705   : > { %6216 = vmatprep.subr.bf16.mxu1 %v6471_v25 }
0x1708   : > { %6218 = vmatpush3.bf16.msra.mxu1 %v6217_v0 }
0x1709   : > { %6219 = vmatprep.subr.bf16.mxu1 %v6471_v25 }
0x170c   : > { %6221 = vmatpush3.bf16.msra.mxu1 %v6220_v19 }
0x170d   : > { %6222 = vmatprep.subr.bf16.mxu1 %v6471_v25 }
0x1710   : > { %6224 = vmatpush3.bf16.msra.mxu1 %v6223_v22 }
0x1713   : > { %5848 = vmatmul.mubr.msk.f32.vlgmr.msra.gmra.mrb[44].mxu1 %vm2156_vm4, %v6407_v23  ;;  %v6419_v23 = vld [vmem:[%s7396_s18 + $0x8] sm:$0xff] }
0x1714   : > { %5850 = vmatprep.mubr.msk.f32.mxu1 %vm6472_vm3, %v6473_v50 }
0x1717   : > { %5851 = vmatmul.mubr.msk.f32.gmra.mrb[46].mxu1 %vm2156_vm4, %v6408_v26 }
0x1718   : > { %5853 = vmatprep.mubr.msk.f32.mxu1 %vm6472_vm3, %v6473_v50 }
0x171b   : > { %5854 = vmatmul.mubr.msk.f32.gmra.mrb[48].mxu1 %vm2156_vm4, %v6409_v18 }
0x171c   : > { %5856 = vmatprep.mubr.msk.f32.mxu1 %vm6472_vm3, %v6473_v50 }
0x171f   : > { %5857 = vmatmul.mubr.msk.f32.gmra.mrb[50].mxu1 %vm2156_vm4, %v6410_v27 }
0x1720   : > { %5859 = vmatprep.mubr.msk.f32.mxu1 %vm6472_vm3, %v6473_v50 }
0x1723   : > { %5860 = vmatmul.mubr.msk.f32.gmra.mrb[52].mxu1 %vm2156_vm4, %v6411_v32 }
0x17d6   : > { %v5819_v21 = vpop.f32.mrb[42].mxu1 }
0x17d7   : > { %v3904_v4 = vpop.f32.mrb[43].mxu1  ;;  %v7156_v30 = vadd.f32 %v5819_v21, %v5140_v35 }
0x17d8   : > { %v7154_v29 = vadd.f32 %v5140_v35, %v3904_v4  ;;  %v6421_v35 = vld [vmem:[%s7396_s18 + $0x10] sm:$0xff] }
0x17d9   : > { %v3995_v7 = vmul.f32 %v7056_v37, %v7156_v30  ;;  %v6418_v37 = vld [vmem:[%s7397_s16] sm:$0xff] }
0x17da   : > { %5828 = vmatprep.mubr.msk.f32.mxu0 %vm1171_vm0, %v7154_v29  ;;  %v3994_v1 = vmul.f32 %v7064_v40, %v7154_v29  ;;  %v6422_v29 = vld [vmem:[%s7397_s16 + $0x10] sm:$0xff] }
0x17db   : > { %5829 = vmatmul.mubr.msk.f32.vlgmr.msra.gmra.mrb[34].mxu0 %vm1171_vm0, %v7156_v30 }
0x17dc   : > { %6227 = vmatpush3.bf16.msra.mxu0 %v6702_v31  ;;  %5870 = vmatprep.mubr.msk.f32.mxu0 %vm6472_vm3, %v6473_v50 }
0x17dd   : > { %6228 = vmatprep.subr.bf16.mxu0 %v6471_v25 }
0x17e0   : > { %6230 = vmatpush3.bf16.msra.mxu0 %v6718_v53 }
0x17e1   : > { %6231 = vmatprep.subr.bf16.mxu0 %v6471_v25 }
0x17e6   : > { %v4080_v39 = vpop.f32.mrb[44].mxu1 }
0x17e7   : > { %v7169_v33 = vadd.f32 %v5153_v38, %v4080_v39  ;;  %v5849_v41 = vpop.f32.mrb[45].mxu1 }
0x17e8   : > { %v6423_v41 = vld [vmem:[%s7396_s18 + $0x18] sm:$0xff] }
0x17e9   : > { %5871 = vmatmul.mubr.msk.f32.vlgmr.msra.gmra.mrb[36].mxu0 %vm1171_vm0, %v7169_v33  ;;  %v4209_v19 = vmul.f32 %v6417_v17, %v7169_v33 }
0x17ea   : > { %v4085_v34 = vpop.f32.mrb[46].mxu1  ;;  %5873 = vmatprep.mubr.msk.f32.mxu0 %vm6472_vm3, %v6473_v50  ;;  %6233 = vmatpush3.bf16.msra.mxu0 %v6232_v57 }
0x17eb   : > { %v7175_v31 = vadd.f32 %v5153_v38, %v4085_v34  ;;  %v5852_v43 = vpop.f32.mrb[47].mxu1  ;;  %6234 = vmatprep.subr.bf16.mxu0 %v6471_v25 }
0x17ed   : > { %5874 = vmatmul.mubr.msk.f32.gmra.mrb[38].mxu0 %vm1171_vm0, %v7175_v31  ;;  %v4210_v40 = vmul.f32 %v6419_v23, %v7175_v31  ;;  %v6424_v31 = vld [vmem:[%s7397_s16 + $0x18] sm:$0xff]  ;;  %v5189_v23 = vld [vmem:[%s7399_s5 + $0x28] sm:$0xff] }
0x17ee   : > { %v4090_v53 = vpop.f32.mrb[48].mxu1  ;;  %5876 = vmatprep.mubr.msk.f32.mxu0 %vm6472_vm3, %v6473_v50  ;;  %6236 = vmatpush3.bf16.msra.mxu0 %v6235_v59 }
0x17ef   : > { %v7181_v44 = vadd.f32 %v5153_v38, %v4090_v53  ;;  %v5855_v45 = vpop.f32.mrb[49].mxu1  ;;  %6237 = vmatprep.subr.bf16.mxu0 %v6471_v25 }
0x17f1   : > { %5877 = vmatmul.mubr.msk.f32.gmra.mrb[40].mxu0 %vm1171_vm0, %v7181_v44  ;;  %v4211_v21 = vmul.f32 %v6421_v35, %v7181_v44 }
0x17f2   : > { %v4095_v46 = vpop.f32.mrb[50].mxu1  ;;  %5879 = vmatprep.mubr.msk.f32.mxu0 %vm6472_vm3, %v6473_v50  ;;  %6239 = vmatpush3.bf16.msra.mxu0 %v6238_v9 }
0x17f3   : > { %v7187_v47 = vadd.f32 %v5153_v38, %v4095_v46  ;;  %v5858_v48 = vpop.f32.mrb[51].mxu1  ;;  %6240 = vmatprep.subr.bf16.mxu0 %v6471_v25  ;;  %v6415_v25 = vld [vmem:[%s6902_s0 + $0x18] sm:$0xff]  ;;  %v6425_v46 = vld [vmem:[%s7396_s18 + $0x20] sm:$0xf]  ;;  %s7408_s0 = sld [smem:[#allocation18_spill]] }
0x17f5   : > { %5880 = vmatmul.mubr.msk.f32.gmra.mrb[42].mxu0 %vm1171_vm0, %v7187_v47  ;;  %v4212_v34 = vmul.f32 %v6423_v41, %v7187_v47  ;;  %v5172_v47 = vld [vmem:[%s7398_s3 + $0x1] ss:$0 sm:$0xff] }
0x17f6   : > { %v4100_v49 = vpop.f32.mrb[52].mxu1  ;;  %5882 = vmatprep.mubr.msk.f32.mxu0 %vm6472_vm3, %v6473_v50  ;;  %6242 = vmatpush3.bf16.msra.mxu0 %v6241_v62 }
0x17f7   : > { %v7193_v51 = vadd.f32 %v5153_v38, %v4100_v49  ;;  %v5861_v52 = vpop.f32.mrb[53].mxu1 }
0x17f8   : > { %v6426_v52 = vld [vmem:[%s7397_s16 + $0x20] sm:$0xf] }
0x17f9   : > { %5883 = vmatmul.mubr.msk.f32.gmra.mrb[44].mxu0 %vm1171_vm0, %v7193_v51  ;;  %v4213_v48 = vmul.f32 %v6425_v46, %v7193_v51 }
0x17fa   : > { %5901 = vmatprep.mubr.msk.f32.mxu0 %vm6472_vm3, %v6473_v50 }
0x17fd   : > { %5902 = vmatmul.mubr.msk.f32.vlgmr.msra.gmra.mrb[46].mxu0 %vm2156_vm4, %v6412_v11 }
0x17fe   : > { %5904 = vmatprep.mubr.msk.f32.mxu0 %vm6472_vm3, %v6473_v50 }
0x1801   : > { %5905 = vmatmul.mubr.msk.f32.gmra.mrb[48].mxu0 %vm2156_vm4, %v6413_v63 }
0x1802   : > { %5907 = vmatprep.mubr.msk.f32.mxu0 %vm6472_vm3, %v6473_v50 }
0x1805   : > { %5908 = vmatmul.mubr.msk.f32.gmra.mrb[50].mxu0 %vm2156_vm4, %v6414_v2 }
0x1806   : > { %5910 = vmatprep.mubr.msk.f32.mxu0 %vm6472_vm3, %v6473_v50 }
0x1809   : > { %5911 = vmatmul.mubr.msk.f32.gmra.mrb[52].mxu0 %vm2156_vm4, %v6415_v25 }
0x180a   : > { %5913 = vmatprep.mubr.msk.f32.mxu0 %vm6472_vm3, %v6473_v50 }
0x180d   : > { %5914 = vmatmul.mubr.msk.f32.gmra.mrb[54].mxu0 %vm2156_vm4, %v6416_v5 }
0x18ae   : > { %v5830_v6 = vpop.f32.mrb[34].mxu0 }
0x18af   : > { %v3997_v12 = vmul.f32 %v7060_v24, %v5830_v6  ;;  %v3985_v13 = vpop.f32.mrb[35].mxu0 }
0x18b0   : > { %v3996_v14 = vmul.f32 %v7068_v42, %v3985_v13  ;;  %v6420_v42 = vld [vmem:[%s7397_s16 + $0x8] sm:$0xff] }
0x18b1   : > { %v3999_v0 = vadd.f32 %v3997_v12, %v3995_v7 }
0x18b2   : > { %v3998_v16 = vadd.f32 %v3996_v14, %v3994_v1 }
0x18b4   : > { %5926 = vmatprep.mubr.msk.f32.mxu1 %vm1171_vm0, %v3998_v16 }
0x18bc   : > { %v4185_v50 = vpop.f32.mrb[36].mxu0 }
0x18bd   : > { %v4214_v15 = vmul.f32 %v6418_v37, %v4185_v50  ;;  %v5872_v24 = vpop.f32.mrb[37].mxu0 }
0x18bf   : > { %v4219_v20 = vadd.f32 %v4214_v15, %v4209_v19 }
0x18c0   : > { %v4190_v22 = vpop.f32.mrb[38].mxu0 }
0x18c1   : > { %v4215_v26 = vmul.f32 %v6420_v42, %v4190_v22  ;;  %v5875_v18 = vpop.f32.mrb[39].mxu0  ;;  %v5188_v22 = vld [vmem:[%s7399_s5 + $0x20] sm:$0xff] }
0x18c2   : > { %v6263_v42 = vpack.c.bf16 %v5189_v23, %v5188_v22  ;;  %v5210_v22 = vld [vmem:[%s7403_s25 + $0x70] sm:$0xff]  ;;  %v5211_v23 = vld [vmem:[%s7403_s25 + $0x78] sm:$0xff] }
0x18c3   : > { %v4220_v27 = vadd.f32 %v4215_v26, %v4210_v40  ;;  %v5190_v40 = vld [vmem:[%s7399_s5 + $0x30] sm:$0xff]  ;;  %v5191_v26 = vld [vmem:[%s7399_s5 + $0x38] sm:$0xff] }
0x18c4   : > { %v4195_v32 = vpop.f32.mrb[40].mxu0  ;;  %v6267_v18 = vpack.c.bf16 %v5191_v26, %v5190_v40  ;;  %6264 = vmatprep.subr.bf16.mxu0 %v6263_v42  ;;  %v6291_v40 = vpack.c.bf16 %v5211_v23, %v5210_v22 }
0x18c5   : > { %v6243_v4 = vpack.c.bf16 %v4220_v27, %v4219_v20  ;;  %v4216_v30 = vmul.f32 %v6422_v29, %v4195_v32  ;;  %v5878_v38 = vpop.f32.mrb[41].mxu0  ;;  %6266 = vmatpush3.bf16.msra.mxu0 %v6263_v42  ;;  %v5201_v42 = vld [vmem:[%s7407_s1 + $0x1] ss:$0 sm:$0xff]  ;;  %s7412_s1 = sld [smem:[#allocation28_spill]] }
0x18c6   : > { %6268 = vmatprep.subr.bf16.mxu0 %v6267_v18 }
0x18c7   : > { %v4221_v39 = vadd.f32 %v4216_v30, %v4211_v21  ;;  %6245 = vmatprep.subr.msk.bf16.mxu1 %vm6756_vm1, %v6243_v4 }
0x18c8   : > { %v4200_v33 = vpop.f32.mrb[42].mxu0  ;;  %6248 = vmatpush3.bf16.xpose.msk.msra.mxu1 %vm6756_vm1, %v6243_v4 }
0x18c9   : > { %v4217_v43 = vmul.f32 %v6424_v31, %v4200_v33  ;;  %v5881_v53 = vpop.f32.mrb[43].mxu0  ;;  %6270 = vmatpush3.bf16.msra.mxu0 %v6267_v18 }
0x18cb   : > { %v4222_v44 = vadd.f32 %v4217_v43, %v4212_v34  ;;  %s7414_s3 = sshll.u32 %s7412_s1, 4 }
0x18cc   : > { %v4205_v45 = vpop.f32.mrb[44].mxu0  ;;  %s1138_s4 = scalar_lea.vmem %s7413_s2, %s7414_s3 }
0x18cd   : > { %v6249_v49 = vpack.c.bf16 %v4222_v44, %v4221_v39  ;;  %v4218_v54 = vmul.f32 %v6426_v52, %v4205_v45  ;;  %v5884_v55 = vpop.f32.mrb[45].mxu0  ;;  %v5192_v39 = vld [vmem:[%s7408_s0 + $0x1] ss:$0 sm:$0xff]  ;;  %s7411_s0 = sld [smem:[#allocation25_spill]] }
0x18cf   : > { %v4223_v56 = vadd.f32 %v4218_v54, %v4213_v48  ;;  %6251 = vmatprep.subr.msk.bf16.mxu1 %vm6756_vm1, %v6249_v49 }
0x18d0   : > { %6254 = vmatpush3.bf16.xpose.msk.msra.mxu1 %vm6756_vm1, %v6249_v49  ;;  %v4304_v57 = vpop.f32.mrb[46].mxu0 }
0x18d1   : > { %5924 = vmatprep.subr.msk.mxu1 %vm1171_vm0, %v4223_v56  ;;  %v5903_v51 = vpop.f32.mrb[47].mxu0  ;;  %v4305_v58 = vadd.f32 %v5172_v47, %v4304_v57  ;;  %v5197_v57 = vld [vmem:[%s7409_s22 + $0x20] sm:$0xff] }
0x18d2   : > { %v5198_v51 = vld [vmem:[%s7409_s22 + $0x28] sm:$0xff] }
0x18d4   : > { %v4309_v59 = vpop.f32.mrb[48].mxu0 }
0x18d5   : > { %v4310_v8 = vadd.f32 %v5172_v47, %v4309_v59  ;;  %v5906_v60 = vpop.f32.mrb[49].mxu0  ;;  %v5199_v59 = vld [vmem:[%s7409_s22 + $0x30] sm:$0xff] }
0x18d7   : > { %v6255_v9 = vpack.c.bf16 %v4310_v8, %v4305_v58  ;;  %v6271_v58 = vpack.c.bf16 %v5198_v51, %v5197_v57  ;;  %v5200_v8 = vld [vmem:[%s7409_s22 + $0x38] sm:$0xff] }
0x18d8   : > { %5925 = vmatpush3.xpose.msk.msra.mxu1 %vm1171_vm0, %v4223_v56  ;;  %v4314_v11 = vpop.f32.mrb[50].mxu0  ;;  %v6275_v60 = vpack.c.bf16 %v5200_v8, %v5199_v59  ;;  %v5215_v59 = vld [vmem:[%s7410_s28] ss:$0 sm:$0xff] }
0x18d9   : > { %6256 = vmatprep.subr.bf16.mxu1 %v6255_v9  ;;  %v5909_v63 = vpop.f32.mrb[51].mxu0  ;;  %v4315_v25 = vadd.f32 %v5172_v47, %v4314_v11 }
0x18da   : > { %v5208_v63 = vld [vmem:[%s7403_s25 + $0x60] sm:$0xff] }
0x18db   : > { %5927 = vmatmul.mubr.msk.f32.vlgmr.msra.gmra.mrb[54].mxu1 %vm1171_vm0, %v3999_v0 }
0x18dc   : > { %6258 = vmatpush3.bf16.msra.mxu1 %v6255_v9  ;;  %v4319_v2 = vpop.f32.mrb[52].mxu0  ;;  %v5204_v9 = vld [vmem:[%s7403_s25 + $0x40] sm:$0xff] }
0x18dd   : > { %v4320_v5 = vadd.f32 %v5172_v47, %v4319_v2  ;;  %v5912_v6 = vpop.f32.mrb[53].mxu0  ;;  %v5209_v2 = vld [vmem:[%s7403_s25 + $0x68] sm:$0xff] }
0x18df   : > { %v6259_v7 = vpack.c.bf16 %v4320_v5, %v4315_v25  ;;  %v6287_v25 = vpack.c.bf16 %v5209_v2, %v5208_v63 }
0x18e0   : > { %v4324_v12 = vpop.f32.mrb[54].mxu0 }
0x18e1   : > { %6260 = vmatprep.subr.bf16.mxu1 %v6259_v7  ;;  %v4325_v13 = vadd.f32 %v5172_v47, %v4324_v12  ;;  %v5915_v1 = vpop.f32.mrb[55].mxu0 }
0x18e2   : > { %6262 = vmatpush3.bf16.msra.mxu1 %v6259_v7 }
0x18e3   : > { %5937 = vmatprep.subr.msk.mxu1 %vm2621_vm6, %v4325_v13 }
0x18e6   : > { %5938 = vmatpush3.msk.msra.mxu1 %vm2621_vm6, %v4325_v13 }
0x18e7   : > { %6272 = vmatprep.subr.bf16.mxu1 %v6271_v58 }
0x19ae   : > { %v5928_v61 = vpop.f32.mrb[54].mxu1 }
0x19af   : > { %v4415_v10 = vpop.f32.mrb[55].mxu1  ;;  %v4427_v28 = vsel %vm2596_vm5, %v5928_v61, -inf }
0x19b0   : > { %4428 = vmax.xlane.f32.xlu1 %v4427_v28  ;;  %v4424_v62 = vsel %vm2596_vm5, %v4415_v10, -inf }
0x19b1   : > { %4425 = vmax.xlane.f32.xlu0 %v4424_v62  ;;  %v5207_v62 = vld [vmem:[%s7403_s25 + $0x58] sm:$0xff] }
0x1a3d   : > { %v4429_v14 = vpop.xlane.xlu1 %4428 }
0x1a3e   : > { %v4431_v0 = vsub.f32 %v5928_v61, %v4429_v14  ;;  %v4426_v16 = vpop.xlane.xlu0 %4425  ;;  %v5205_v61 = vld [vmem:[%s7403_s25 + $0x48] sm:$0xff] }
0x1a3f   : > { %v4430_v50 = vsub.f32 %v4415_v10, %v4426_v16  ;;  %v5206_v10 = vld [vmem:[%s7403_s25 + $0x50] sm:$0xff]  ;;  %v6279_v28 = vpack.c.bf16 %v5205_v61, %v5204_v9  ;;  %v5216_v9 = vld [vmem:[%s7411_s0] ss:$0 sm:$0xff] }
0x1a40   : > { %v4434_v17 = vmul.f32 1.442695, %v4431_v0  ;;  %v6283_v11 = vpack.c.bf16 %v5207_v62, %v5206_v10  ;;  %v5195_v0 = vld [vmem:[%s7404_s29 + $0x1] ss:$0 sm:$0xff] }
0x1a41   : > { %v4432_v19 = vmul.f32 1.442695, %v4430_v50  ;;  %6280 = vmatprep.subr.bf16.mxu0 %v6279_v28 }
0x1a42   : > { %6387 = vpow2.f32 %v4434_v17 }
0x1a43   : > { %6389 = vpow2.f32 %v4432_v19  ;;  %v5196_v19 = vld [vmem:[%s7405_s13 + $0x1] ss:$0 sm:$0xff] }
0x1a4c   : > { %v6388_v37 = vpop.eup %6387 }
0x1a4d   : > { %v6390_v15 = vpop.eup %6389  ;;  %v4439_v24 = vsel %vm2596_vm5, %v6388_v37, 0.0 }
0x1a4e   : > { %4440 = vadd.xlane.f32.xlu1 %v4439_v24  ;;  %5939 = vmatprep.mubr.msk.f32.mxu1 %vm2596_vm5, %v6390_v15  ;;  %v4436_v20 = vsel %vm2596_vm5, %v6390_v15, 0.0 }
0x1a4f   : > { %5940 = vmatmul.mubr.msk.f32.vlgmr.msra.gmra.mrb[56].mxu1 %vm2596_vm5, %v6388_v37  ;;  %4437 = vadd.xlane.f32.xlu0 %v4436_v20 }
0x1a50   : > { %6274 = vmatpush3.bf16.msra.mxu1 %v6271_v58 }
0x1a51   : > { %6276 = vmatprep.subr.bf16.mxu1 %v6275_v60 }
0x1a54   : > { %6278 = vmatpush3.bf16.msra.mxu1 %v6275_v60 }
0x1adb   : > { %v4441_v32 = vpop.xlane.xlu1 %4440 }
0x1adc   : > { %v4438_v27 = vpop.xlane.xlu0 %4437 }
0x1add   : > { %6391 = vrcp.f32 %v4438_v27 }
0x1ade   : > { %6393 = vrcp.f32 %v4441_v32 }
0x1ae7   : > { %v6392_v21 = vpop.eup %6391 }
0x1ae8   : > { %v6394_v29 = vpop.eup %6393 }
0x1b22   : > { %v5941_v35 = vpop.f32.mrb[56].mxu1 }
0x1b23   : > { %v4517_v4 = vpop.f32.mrb[57].mxu1  ;;  %v4529_v38 = vmul.f32 %v6394_v29, %v5941_v35 }
0x1b24   : > { %v4528_v30 = vmul.f32 %v6392_v21, %v4517_v4  ;;  %v5212_v4 = vld [vmem:[%s6647_s9 + $0x1] ss:$0 sm:$0xff] }
0x1b26   : > { %5950 = vmatprep.mubr.msk.f32.mxu0 %vm1171_vm0, %v4528_v30 }
0x1b27   : > { %5951 = vmatmul.mubr.msk.f32.vlgmr.msra.gmra.mrb[56].mxu0 %vm1171_vm0, %v4529_v38 }
0x1b28   : > { %6282 = vmatpush3.bf16.msra.mxu0 %v6279_v28 }
0x1b29   : > { %6284 = vmatprep.subr.bf16.mxu0 %v6283_v11 }
0x1b2c   : > { %6286 = vmatpush3.bf16.msra.mxu0 %v6283_v11 }
0x1b2d   : > { %6288 = vmatprep.subr.bf16.mxu0 %v6287_v25 }
0x1b30   : > { %6290 = vmatpush3.bf16.msra.mxu0 %v6287_v25 }
0x1b31   : > { %6292 = vmatprep.subr.bf16.mxu0 %v6291_v40 }
0x1b34   : > { %6294 = vmatpush3.bf16.msra.mxu0 %v6291_v40 }
0x1bfa   : > { %v5952_v33 = vpop.f32.mrb[56].mxu0 }
0x1bfb   : > { %v4618_v41 = vadd.f32 %v5952_v33, %v5192_v39  ;;  %v4612_v34 = vpop.f32.mrb[57].mxu0 }
0x1bfc   : > { %v4613_v31 = vadd.f32 %v5192_v39, %v4612_v34 }
0x1bfd   : > { %v7278_v43 = vadd.f32 %v4618_v41, %v7100_v3 }
0x1bfe   : > { %v7281_v53 = vadd.f32 %v4613_v31, %v7103_v36 }
0x1bff   : > { %v4628_v44 = vsel %vm1171_vm0, %v7278_v43, 0.0 }
0x1c00   : > { %4629 = vadd.xlane.f32.xlu1 %v4628_v44  ;;  %v4625_v45 = vsel %vm1171_vm0, %v7281_v53, 0.0 }
0x1c01   : > { %4626 = vadd.xlane.f32.xlu0 %v4625_v45 }
0x1c8d   : > { %v4630_v46 = vpop.xlane.xlu1 %4629 }
0x1c8e   : > { %v4632_v48 = vmul.f32 0.03125, %v4630_v46  ;;  %v4627_v49 = vpop.xlane.xlu0 %4626 }
0x1c8f   : > { %v4631_v3 = vmul.f32 0.03125, %v4627_v49 }
0x1c90   : > { %v4634_v52 = vsub.f32 %v7278_v43, %v4632_v48 }
0x1c91   : > { %v4633_v36 = vsub.f32 %v7281_v53, %v4631_v3 }
0x1c92   : > { %v4636_v54 = vmul.f32 %v4634_v52, %v4634_v52 }
0x1c93   : > { %v4635_v55 = vmul.f32 %v4633_v36, %v4633_v36 }
0x1c94   : > { %v4640_v56 = vsel %vm1171_vm0, %v4636_v54, 0.0 }
0x1c95   : > { %4641 = vadd.xlane.f32.xlu1 %v4640_v56  ;;  %v4637_v47 = vsel %vm1171_vm0, %v4635_v55, 0.0 }
0x1c96   : > { %4638 = vadd.xlane.f32.xlu0 %v4637_v47 }
0x1d22   : > { %v4642_v5 = vpop.xlane.xlu1 %4641 }
0x1d23   : > { %v4644_v6 = vmul.f32 0.03125, %v4642_v5  ;;  %v4639_v7 = vpop.xlane.xlu0 %4638 }
0x1d24   : > { %v4643_v12 = vmul.f32 0.03125, %v4639_v7 }
0x1d25   : > { %v4646_v13 = vadd.f32 1e-05, %v4644_v6 }
0x1d26   : > { %v4645_v1 = vadd.f32 1e-05, %v4643_v12 }
0x1d27   : > { %6395 = vrsqrt.f32 %v4646_v13 }
0x1d28   : > { %6397 = vrsqrt.f32 %v4645_v1 }
0x1d31   : > { %v6396_v14 = vpop.eup %6395 }
0x1d32   : > { %v6398_v16 = vpop.eup %6397  ;;  %v4650_v50 = vmul.f32 %v6396_v14, %v4634_v52 }
0x1d33   : > { %v4649_v17 = vmul.f32 %v6398_v16, %v4633_v36 }
0x1d34   : > { %v4656_v37 = vmul.f32 %v5195_v0, %v4650_v50 }
0x1d35   : > { %v4655_v15 = vmul.f32 %v5195_v0, %v4649_v17 }
0x1d36   : > { %v4662_v20 = vadd.f32 %v5196_v19, %v4656_v37 }
0x1d37   : > { %v4661_v24 = vadd.f32 %v5196_v19, %v4655_v15 }
0x1d39   : > { %5961 = vmatprep.mubr.msk.f32.mxu1 %vm1171_vm0, %v4661_v24 }
0x1d3a   : > { %5962 = vmatmul.mubr.msk.f32.vlgmr.msra.gmra.mrb[58].mxu1 %vm1171_vm0, %v4662_v20 }
0x1e0d   : > { %v5963_v26 = vpop.f32.mrb[58].mxu1 }
0x1e0e   : > { %v4751_v18 = vadd.f32 %v5963_v26, %v5201_v42  ;;  %v4745_v27 = vpop.f32.mrb[59].mxu1 }
0x1e0f   : > { %v4746_v32 = vadd.f32 %v5201_v42, %v4745_v27 }
0x1e10   : > { %v4755_v21 = vmax.f32 %v4751_v18, 0.0 }
0x1e11   : > { %v4754_v35 = vmax.f32 %v4746_v32, 0.0 }
0x1e13   : > { %5980 = vmatprep.mubr.msk.f32.mxu0 %vm2156_vm4, %v4754_v35 }
0x1e14   : > { %5981 = vmatmul.mubr.msk.f32.vlgmr.msra.gmra.mrb[58].mxu0 %vm2156_vm4, %v4755_v21 }
0x1ee7   : > { %v5982_v29 = vpop.f32.mrb[58].mxu0 }
0x1ee8   : > { %v4848_v30 = vadd.f32 %v5982_v29, %v5212_v4  ;;  %v4842_v38 = vpop.f32.mrb[59].mxu0 }
0x1ee9   : > { %v4843_v39 = vadd.f32 %v5212_v4, %v4842_v38 }
0x1eea   : > { %v4852_v33 = vadd.f32 %v4848_v30, %v7278_v43 }
0x1eeb   : > { %v4851_v41 = vadd.f32 %v4843_v39, %v7281_v53 }
0x1eec   : > { %v4858_v34 = vsel %vm1171_vm0, %v4852_v33, 0.0 }
0x1eed   : > { %4859 = vadd.xlane.f32.xlu1 %v4858_v34  ;;  %v4855_v31 = vsel %vm1171_vm0, %v4851_v41, 0.0 }
0x1eee   : > { %4856 = vadd.xlane.f32.xlu0 %v4855_v31 }
0x1f7a   : > { %v4860_v44 = vpop.xlane.xlu1 %4859 }
0x1f7b   : > { %v4862_v45 = vmul.f32 0.03125, %v4860_v44  ;;  %v4857_v46 = vpop.xlane.xlu0 %4856 }
0x1f7c   : > { %v4861_v48 = vmul.f32 0.03125, %v4857_v46 }
0x1f7d   : > { %v4864_v49 = vsub.f32 %v4852_v33, %v4862_v45 }
0x1f7e   : > { %v4863_v3 = vsub.f32 %v4851_v41, %v4861_v48 }
0x1f7f   : > { %v4866_v52 = vmul.f32 %v4864_v49, %v4864_v49 }
0x1f80   : > { %v4865_v36 = vmul.f32 %v4863_v3, %v4863_v3 }
0x1f81   : > { %v4870_v54 = vsel %vm1171_vm0, %v4866_v52, 0.0 }
0x1f82   : > { %4871 = vadd.xlane.f32.xlu1 %v4870_v54  ;;  %v4867_v43 = vsel %vm1171_vm0, %v4865_v36, 0.0 }
0x1f83   : > { %4868 = vadd.xlane.f32.xlu0 %v4867_v43 }
0x200f   : > { %v4872_v53 = vpop.xlane.xlu1 %4871 }
0x2010   : > { %v4874_v55 = vmul.f32 0.03125, %v4872_v53  ;;  %v4869_v56 = vpop.xlane.xlu0 %4868 }
0x2011   : > { %v4873_v47 = vmul.f32 0.03125, %v4869_v56 }
0x2012   : > { %v4876_v57 = vadd.f32 1e-05, %v4874_v55 }
0x2013   : > { %v4875_v51 = vadd.f32 1e-05, %v4873_v47 }
0x2014   : > { %6399 = vrsqrt.f32 %v4876_v57 }
0x2015   : > { %6401 = vrsqrt.f32 %v4875_v51 }
0x201e   : > { %v6400_v58 = vpop.eup %6399 }
0x201f   : > { %v6402_v8 = vpop.eup %6401  ;;  %v4880_v60 = vmul.f32 %v6400_v58, %v4864_v49 }
0x2020   : > { %v4879_v61 = vmul.f32 %v6402_v8, %v4863_v3 }
0x2021   : > { %v4888_v10 = vmul.f32 %v5215_v59, %v4880_v60 }
0x2022   : > { %v4887_v28 = vmul.f32 %v5215_v59, %v4879_v61 }
0x2023   : > { %v4896_v62 = vadd.f32 %v5216_v9, %v4888_v10 }
0x2024   : > { %v4895_v11 = vadd.f32 %v5216_v9, %v4887_v28 }
0x2025   : > { %4898 = vst.msk [vmem:[%s1138_s4 + $0x8] sm:$0xff] %vm1171_vm0, %v4896_v62 }
0x2026   : > { %4897 = vst.msk [vmem:[%s1138_s4] sm:$0xff] %vm1171_vm0, %v4895_v11 }
0x2027 PF: > { %s7415_s5 = sld [smem:[#allocation27_spill]] }
0x202d   : > { %s83_s28 = sadd.s32 1, %s7415_s5  }
0x202e   : > { %p80_p4 = scmp.ge.s32.totalorder %s83_s28, 4  }
0x2030   :  { %82 = sbr.rel (!%p80_p4) target bundleno = 73 (0x49), region = 246 }

</bundles_post_ra>
